<compile_context>
chip_gen: v7x
topology: tpu7x:2x2x1
jax: 0.10.0
libtpu: 0.0.40
codegen_flags: <defaults>
</compile_context>

<pallas_src>
import functools

import jax
import jax.numpy as jnp
from jax.experimental import pallas as pl
from jax.experimental.pallas import tpu as pltpu

BN_EPS = 1e-5


# ----------------------------------------------------------------------------
# Fused per-image kernel: 3x (conv3x3 + folded-BN + ReLU) + avg-pool + FC
# ----------------------------------------------------------------------------
def _fused_forward_kernel(H, W,
                          col1_ref, w1_ref, s1_ref, w2_ref, s2_ref,
                          w3_ref, s3_ref, fcw_ref, fcb_ref, o_ref):
    """One image per grid step.

    col1_ref: (1, H*W, 9*Cin) bf16  host-prepacked im2col of the input image
    wK_ref:   (9*CinK, CoutK) bf16  conv weights with BN scale folded in
    sK_ref:   (1, CoutK)      f32   folded BN shift (+ conv bias)
    fcw_ref:  (128, nc)       bf16  classifier weight
    fcb_ref:  (1, nc)         f32   classifier bias
    o_ref:    (1, 1, nc)      f32   logits for this image
    """
    HW = H * W

    def conv_bn_relu(col, w_ref, s_ref):
        # Single K = 9*Cin matmul per layer; f32 accumulation in the MXU.
        y = jnp.dot(col, w_ref[...], preferred_element_type=jnp.float32)
        # BN shift + ReLU, then ONE cast to bf16 for the next layer / pooling.
        return jnp.maximum(y + s_ref[...], 0.0).astype(jnp.bfloat16)

    def pad_halo(a2, cout):
        # (HW, C) -> (H+2, W+2, C) with a freshly-zeroed halo (halo stays
        # exactly zero every layer, so taps need no masking).
        a3 = a2.reshape(H, W, cout)
        zrow = jnp.zeros((1, W, cout), a2.dtype)
        a3 = jnp.concatenate([zrow, a3, zrow], axis=0)           # (H+2, W, C)
        zcol = jnp.zeros((H + 2, 1, cout), a2.dtype)
        return jnp.concatenate([zcol, a3, zcol], axis=1)         # (H+2, W+2, C)

    def im2col(a3):
        # 9 static slices of the zero-padded activation, concatenated along
        # channels -> (HW, 9*C) block for one MXU matmul.
        taps = [a3[dy:dy + H, dx:dx + W, :]
                for dy in range(3) for dx in range(3)]
        return jnp.concatenate(taps, axis=-1).reshape(HW, -1)

    a = conv_bn_relu(col1_ref[0], w1_ref, s1_ref)                    # (HW, 32)
    a = conv_bn_relu(im2col(pad_halo(a, 32)), w2_ref, s2_ref)        # (HW, 64)
    a = conv_bn_relu(im2col(pad_halo(a, 64)), w3_ref, s3_ref)        # (HW, 128)

    # Global average pool: in-kernel row reduction (no pool matrix).
    pooled = jnp.sum(a.astype(jnp.float32), axis=0, keepdims=True) * (1.0 / HW)
    logits = jnp.dot(pooled.astype(jnp.bfloat16), fcw_ref[...],
                     preferred_element_type=jnp.float32) + fcb_ref[...]
    o_ref[0] = logits.astype(o_ref.dtype)


# ----------------------------------------------------------------------------
# Parameter construction (deterministic, synthetic; BN scale folded into W)
# ----------------------------------------------------------------------------
def make_block_params(key, cin, cout):
    kw, kb, kg, kbeta = jax.random.split(key, 4)
    w = jax.random.normal(kw, (3, 3, cin, cout), jnp.float32) * 0.05
    bias = jax.random.normal(kb, (cout,), jnp.float32) * 0.05
    gamma = 1.0 + 0.1 * jax.random.normal(kg, (cout,), jnp.float32)
    beta = 0.1 * jax.random.normal(kbeta, (cout,), jnp.float32)
    running_mean = jnp.zeros((cout,), jnp.float32)
    running_var = jnp.ones((cout,), jnp.float32)
    # Eval-mode BN folded to per-channel scale/shift; scale hoisted into W.
    scale = gamma / jnp.sqrt(running_var + BN_EPS)
    shift = (bias - running_mean) * scale + beta
    # (3,3,cin,cout) -> (9*cin, cout): tap-major (dy, dx), then channel —
    # matches the im2col column ordering used in the kernel / host prepack.
    w_folded = (w * scale).reshape(9 * cin, cout).astype(jnp.bfloat16)
    return {"w": w_folded, "shift": shift.reshape(1, cout).astype(jnp.float32)}


def make_params(key, input_channels=3, num_classes=10):
    k1, k2, k3, k4, k5 = jax.random.split(key, 5)
    return {
        "block1": make_block_params(k1, input_channels, 32),
        "block2": make_block_params(k2, 32, 64),
        "block3": make_block_params(k3, 64, 128),
        "fc_w": (jax.random.normal(k4, (128, num_classes), jnp.float32) * 0.05
                 ).astype(jnp.bfloat16),
        "fc_b": (jax.random.normal(k5, (num_classes,), jnp.float32) * 0.05
                 ).reshape(1, num_classes),
    }


# ----------------------------------------------------------------------------
# Forward pass: per-image grid, one fused pallas_call
# ----------------------------------------------------------------------------
def forward(x_nchw, params):
    N, Cin, H, W = x_nchw.shape
    HW = H * W
    num_classes = params["fc_w"].shape[-1]

    # Host-side im2col for layer 1 only (Cin=3 is tiny; 9x replication in HBM
    # is negligible and gives the first matmul K=27 instead of K=3).
    x_nhwc = jnp.transpose(x_nchw, (0, 2, 3, 1)).astype(jnp.float32)
    xp = jnp.pad(x_nhwc, ((0, 0), (1, 1), (1, 1), (0, 0)))
    taps = [xp[:, dy:dy + H, dx:dx + W, :]
            for dy in range(3) for dx in range(3)]
    col1 = jnp.concatenate(taps, axis=-1).reshape(N, HW, 9 * Cin)
    col1 = col1.astype(jnp.bfloat16)

    kernel = functools.partial(_fused_forward_kernel, H, W)
    const = lambda i: (0, 0)   # weights: same block every grid step (no re-DMA)

    in_specs = [
        pl.BlockSpec((1, HW, 9 * Cin), lambda i: (i, 0, 0)),
        pl.BlockSpec(params["block1"]["w"].shape, const),
        pl.BlockSpec(params["block1"]["shift"].shape, const),
        pl.BlockSpec(params["block2"]["w"].shape, const),
        pl.BlockSpec(params["block2"]["shift"].shape, const),
        pl.BlockSpec(params["block3"]["w"].shape, const),
        pl.BlockSpec(params["block3"]["shift"].shape, const),
        pl.BlockSpec(params["fc_w"].shape, const),
        pl.BlockSpec(params["fc_b"].shape, const),
    ]
    out_specs = pl.BlockSpec((1, 1, num_classes), lambda i: (i, 0, 0))

    out = pl.pallas_call(
        kernel,
        out_shape=jax.ShapeDtypeStruct((N, 1, num_classes), jnp.float32),
        grid=(N,),
        in_specs=in_specs,
        out_specs=out_specs,
        compiler_params=pltpu.CompilerParams(
            dimension_semantics=("parallel",),          # megacore on v7x
            vmem_limit_bytes=32 * 1024 * 1024,          # per-step use is ~2 MiB
        ),
    )(col1,
      params["block1"]["w"], params["block1"]["shift"],
      params["block2"]["w"], params["block2"]["shift"],
      params["block3"]["w"], params["block3"]["shift"],
      params["fc_w"], params["fc_b"])
    return out.reshape(N, num_classes)


if __name__ == "__main__":
    key = jax.random.PRNGKey(0)
    k_x, k_p = jax.random.split(key)

    N, C_in, H, W = 2, 3, 16, 16
    x_nchw = jax.random.normal(k_x, (N, C_in, H, W), jnp.float32)

    params = make_params(k_p, input_channels=C_in, num_classes=10)

    logits = forward(x_nchw, params)
    jax.block_until_ready(logits)

    assert logits.shape == (N, 10), logits.shape
    assert logits.dtype == jnp.float32
    print("KERNEL_OK")
</pallas_src>

<mosaic_0001>
module attributes {stable_mosaic.version = 11 : i64} {
  func.func @_fused_forward_kernel(%arg0: i32, %arg1: memref<1x256x27xbf16, #tpu.memory_space<vmem>>, %arg2: memref<27x32xbf16, #tpu.memory_space<vmem>>, %arg3: memref<1x32xf32, #tpu.memory_space<vmem>>, %arg4: memref<288x64xbf16, #tpu.memory_space<vmem>>, %arg5: memref<1x64xf32, #tpu.memory_space<vmem>>, %arg6: memref<576x128xbf16, #tpu.memory_space<vmem>>, %arg7: memref<1x128xf32, #tpu.memory_space<vmem>>, %arg8: memref<128x10xbf16, #tpu.memory_space<vmem>>, %arg9: memref<1x10xf32, #tpu.memory_space<vmem>>, %arg10: memref<1x1x10xf32, #tpu.memory_space<vmem>>) attributes {dimension_semantics = [#tpu.dimension_semantics<parallel>], iteration_bounds = array<i64: 2>, scalar_prefetch = 0 : i64, scratch_operands = 0 : i64, tpu.core_type = #tpu.core_type<tc>, window_params = [{transform_indices = @transform_0, window_bounds = array<i64: 1, 256, 27>}, {pipeline_mode = #tpu.pipeline_mode<synchronous>, transform_indices = @transform_1, window_bounds = array<i64: 27, 32>}, {pipeline_mode = #tpu.pipeline_mode<synchronous>, transform_indices = @transform_2, window_bounds = array<i64: 1, 32>}, {pipeline_mode = #tpu.pipeline_mode<synchronous>, transform_indices = @transform_3, window_bounds = array<i64: 288, 64>}, {pipeline_mode = #tpu.pipeline_mode<synchronous>, transform_indices = @transform_4, window_bounds = array<i64: 1, 64>}, {pipeline_mode = #tpu.pipeline_mode<synchronous>, transform_indices = @transform_5, window_bounds = array<i64: 576, 128>}, {pipeline_mode = #tpu.pipeline_mode<synchronous>, transform_indices = @transform_6, window_bounds = array<i64: 1, 128>}, {pipeline_mode = #tpu.pipeline_mode<synchronous>, transform_indices = @transform_7, window_bounds = array<i64: 128, 10>}, {pipeline_mode = #tpu.pipeline_mode<synchronous>, transform_indices = @transform_8, window_bounds = array<i64: 1, 10>}, {transform_indices = @transform_9, window_bounds = array<i64: 1, 1, 10>}]} {
    %c0 = arith.constant 0 : index
    %c0_0 = arith.constant 0 : index
    %c0_1 = arith.constant 0 : index
    %0 = vector.load %arg1[%c0, %c0_0, %c0_1] : memref<1x256x27xbf16, #tpu.memory_space<vmem>>, vector<1x256x27xbf16>
    %1 = vector.shape_cast %0 : vector<1x256x27xbf16> to vector<256x27xbf16>
    %c0_2 = arith.constant 0 : index
    %c0_3 = arith.constant 0 : index
    %2 = vector.load %arg2[%c0_2, %c0_3] : memref<27x32xbf16, #tpu.memory_space<vmem>>, vector<27x32xbf16>
    %cst = arith.constant dense<0.000000e+00> : vector<256x32xf32>
    %3 = tpu.matmul %1, %2, %cst {dimension_numbers = #tpu.dot_dimension_numbers<[1], [0], [0], [1], [0, 0, 1, 1], [], []>} : vector<256x27xbf16>, vector<27x32xbf16>, vector<256x32xf32> -> vector<256x32xf32>
    %c0_4 = arith.constant 0 : index
    %c0_5 = arith.constant 0 : index
    %4 = vector.load %arg3[%c0_4, %c0_5] : memref<1x32xf32, #tpu.memory_space<vmem>>, vector<1x32xf32>
    %5 = vector.broadcast %4 : vector<1x32xf32> to vector<256x32xf32>
    %6 = arith.addf %3, %5 : vector<256x32xf32>
    %cst_6 = arith.constant 0.000000e+00 : f32
    %7 = vector.broadcast %cst_6 : f32 to vector<256x32xf32>
    %8 = arith.maximumf %6, %7 : vector<256x32xf32>
    %9 = arith.truncf %8 : vector<256x32xf32> to vector<256x32xbf16>
    %10 = vector.shape_cast %9 : vector<256x32xbf16> to vector<16x16x32xbf16>
    %cst_7 = arith.constant 0.000000e+00 : bf16
    %11 = vector.broadcast %cst_7 : bf16 to vector<1x16x32xbf16>
    %12 = tpu.concatenate %11, %10, %11 in 0 : vector<1x16x32xbf16>, vector<16x16x32xbf16>, vector<1x16x32xbf16> -> vector<18x16x32xbf16>
    %cst_8 = arith.constant 0.000000e+00 : bf16
    %13 = vector.broadcast %cst_8 : bf16 to vector<18x1x32xbf16>
    %14 = tpu.concatenate %13, %12, %13 in 1 : vector<18x1x32xbf16>, vector<18x16x32xbf16>, vector<18x1x32xbf16> -> vector<18x18x32xbf16>
    %15 = vector.extract_strided_slice %14 {offsets = [0, 0, 0], sizes = [16, 16, 32], strides = [1, 1, 1]} : vector<18x18x32xbf16> to vector<16x16x32xbf16>
    %16 = vector.extract_strided_slice %14 {offsets = [0, 1, 0], sizes = [16, 16, 32], strides = [1, 1, 1]} : vector<18x18x32xbf16> to vector<16x16x32xbf16>
    %17 = vector.extract_strided_slice %14 {offsets = [0, 2, 0], sizes = [16, 16, 32], strides = [1, 1, 1]} : vector<18x18x32xbf16> to vector<16x16x32xbf16>
    %18 = vector.extract_strided_slice %14 {offsets = [1, 0, 0], sizes = [16, 16, 32], strides = [1, 1, 1]} : vector<18x18x32xbf16> to vector<16x16x32xbf16>
    %19 = vector.extract_strided_slice %14 {offsets = [1, 1, 0], sizes = [16, 16, 32], strides = [1, 1, 1]} : vector<18x18x32xbf16> to vector<16x16x32xbf16>
    %20 = vector.extract_strided_slice %14 {offsets = [1, 2, 0], sizes = [16, 16, 32], strides = [1, 1, 1]} : vector<18x18x32xbf16> to vector<16x16x32xbf16>
    %21 = vector.extract_strided_slice %14 {offsets = [2, 0, 0], sizes = [16, 16, 32], strides = [1, 1, 1]} : vector<18x18x32xbf16> to vector<16x16x32xbf16>
    %22 = vector.extract_strided_slice %14 {offsets = [2, 1, 0], sizes = [16, 16, 32], strides = [1, 1, 1]} : vector<18x18x32xbf16> to vector<16x16x32xbf16>
    %23 = vector.extract_strided_slice %14 {offsets = [2, 2, 0], sizes = [16, 16, 32], strides = [1, 1, 1]} : vector<18x18x32xbf16> to vector<16x16x32xbf16>
    %24 = tpu.concatenate %15, %16, %17, %18, %19, %20, %21, %22, %23 in 2 : vector<16x16x32xbf16>, vector<16x16x32xbf16>, vector<16x16x32xbf16>, vector<16x16x32xbf16>, vector<16x16x32xbf16>, vector<16x16x32xbf16>, vector<16x16x32xbf16>, vector<16x16x32xbf16>, vector<16x16x32xbf16> -> vector<16x16x288xbf16>
    %25 = vector.shape_cast %24 : vector<16x16x288xbf16> to vector<256x288xbf16>
    %c0_9 = arith.constant 0 : index
    %c0_10 = arith.constant 0 : index
    %26 = vector.load %arg4[%c0_9, %c0_10] : memref<288x64xbf16, #tpu.memory_space<vmem>>, vector<288x64xbf16>
    %cst_11 = arith.constant dense<0.000000e+00> : vector<256x64xf32>
    %27 = tpu.matmul %25, %26, %cst_11 {dimension_numbers = #tpu.dot_dimension_numbers<[1], [0], [0], [1], [0, 0, 1, 1], [], []>} : vector<256x288xbf16>, vector<288x64xbf16>, vector<256x64xf32> -> vector<256x64xf32>
    %c0_12 = arith.constant 0 : index
    %c0_13 = arith.constant 0 : index
    %28 = vector.load %arg5[%c0_12, %c0_13] : memref<1x64xf32, #tpu.memory_space<vmem>>, vector<1x64xf32>
    %29 = vector.broadcast %28 : vector<1x64xf32> to vector<256x64xf32>
    %30 = arith.addf %27, %29 : vector<256x64xf32>
    %cst_14 = arith.constant 0.000000e+00 : f32
    %31 = vector.broadcast %cst_14 : f32 to vector<256x64xf32>
    %32 = arith.maximumf %30, %31 : vector<256x64xf32>
    %33 = arith.truncf %32 : vector<256x64xf32> to vector<256x64xbf16>
    %34 = vector.shape_cast %33 : vector<256x64xbf16> to vector<16x16x64xbf16>
    %cst_15 = arith.constant 0.000000e+00 : bf16
    %35 = vector.broadcast %cst_15 : bf16 to vector<1x16x64xbf16>
    %36 = tpu.concatenate %35, %34, %35 in 0 : vector<1x16x64xbf16>, vector<16x16x64xbf16>, vector<1x16x64xbf16> -> vector<18x16x64xbf16>
    %cst_16 = arith.constant 0.000000e+00 : bf16
    %37 = vector.broadcast %cst_16 : bf16 to vector<18x1x64xbf16>
    %38 = tpu.concatenate %37, %36, %37 in 1 : vector<18x1x64xbf16>, vector<18x16x64xbf16>, vector<18x1x64xbf16> -> vector<18x18x64xbf16>
    %39 = vector.extract_strided_slice %38 {offsets = [0, 0, 0], sizes = [16, 16, 64], strides = [1, 1, 1]} : vector<18x18x64xbf16> to vector<16x16x64xbf16>
    %40 = vector.extract_strided_slice %38 {offsets = [0, 1, 0], sizes = [16, 16, 64], strides = [1, 1, 1]} : vector<18x18x64xbf16> to vector<16x16x64xbf16>
    %41 = vector.extract_strided_slice %38 {offsets = [0, 2, 0], sizes = [16, 16, 64], strides = [1, 1, 1]} : vector<18x18x64xbf16> to vector<16x16x64xbf16>
    %42 = vector.extract_strided_slice %38 {offsets = [1, 0, 0], sizes = [16, 16, 64], strides = [1, 1, 1]} : vector<18x18x64xbf16> to vector<16x16x64xbf16>
    %43 = vector.extract_strided_slice %38 {offsets = [1, 1, 0], sizes = [16, 16, 64], strides = [1, 1, 1]} : vector<18x18x64xbf16> to vector<16x16x64xbf16>
    %44 = vector.extract_strided_slice %38 {offsets = [1, 2, 0], sizes = [16, 16, 64], strides = [1, 1, 1]} : vector<18x18x64xbf16> to vector<16x16x64xbf16>
    %45 = vector.extract_strided_slice %38 {offsets = [2, 0, 0], sizes = [16, 16, 64], strides = [1, 1, 1]} : vector<18x18x64xbf16> to vector<16x16x64xbf16>
    %46 = vector.extract_strided_slice %38 {offsets = [2, 1, 0], sizes = [16, 16, 64], strides = [1, 1, 1]} : vector<18x18x64xbf16> to vector<16x16x64xbf16>
    %47 = vector.extract_strided_slice %38 {offsets = [2, 2, 0], sizes = [16, 16, 64], strides = [1, 1, 1]} : vector<18x18x64xbf16> to vector<16x16x64xbf16>
    %48 = tpu.concatenate %39, %40, %41, %42, %43, %44, %45, %46, %47 in 2 : vector<16x16x64xbf16>, vector<16x16x64xbf16>, vector<16x16x64xbf16>, vector<16x16x64xbf16>, vector<16x16x64xbf16>, vector<16x16x64xbf16>, vector<16x16x64xbf16>, vector<16x16x64xbf16>, vector<16x16x64xbf16> -> vector<16x16x576xbf16>
    %49 = vector.shape_cast %48 : vector<16x16x576xbf16> to vector<256x576xbf16>
    %c0_17 = arith.constant 0 : index
    %c0_18 = arith.constant 0 : index
    %50 = vector.load %arg6[%c0_17, %c0_18] : memref<576x128xbf16, #tpu.memory_space<vmem>>, vector<576x128xbf16>
    %cst_19 = arith.constant dense<0.000000e+00> : vector<256x128xf32>
    %51 = tpu.matmul %49, %50, %cst_19 {dimension_numbers = #tpu.dot_dimension_numbers<[1], [0], [0], [1], [0, 0, 1, 1], [], []>} : vector<256x576xbf16>, vector<576x128xbf16>, vector<256x128xf32> -> vector<256x128xf32>
    %c0_20 = arith.constant 0 : index
    %c0_21 = arith.constant 0 : index
    %52 = vector.load %arg7[%c0_20, %c0_21] : memref<1x128xf32, #tpu.memory_space<vmem>>, vector<1x128xf32>
    %53 = vector.broadcast %52 : vector<1x128xf32> to vector<256x128xf32>
    %54 = arith.addf %51, %53 : vector<256x128xf32>
    %cst_22 = arith.constant 0.000000e+00 : f32
    %55 = vector.broadcast %cst_22 : f32 to vector<256x128xf32>
    %56 = arith.maximumf %54, %55 : vector<256x128xf32>
    %57 = arith.truncf %56 : vector<256x128xf32> to vector<256x128xbf16>
    %58 = arith.extf %57 : vector<256x128xbf16> to vector<256x128xf32>
    %cst_23 = arith.constant dense<0.000000e+00> : vector<128xf32>
    %59 = vector.multi_reduction <add>, %58, %cst_23 [0] : vector<256x128xf32> to vector<128xf32>
    %60 = vector.shape_cast %59 : vector<128xf32> to vector<1x128xf32>
    %cst_24 = arith.constant 3.906250e-03 : f32
    %61 = vector.broadcast %cst_24 : f32 to vector<1x128xf32>
    %62 = arith.mulf %60, %61 : vector<1x128xf32>
    %63 = arith.truncf %62 : vector<1x128xf32> to vector<1x128xbf16>
    %c0_25 = arith.constant 0 : index
    %c0_26 = arith.constant 0 : index
    %64 = vector.load %arg8[%c0_25, %c0_26] : memref<128x10xbf16, #tpu.memory_space<vmem>>, vector<128x10xbf16>
    %cst_27 = arith.constant dense<0.000000e+00> : vector<1x10xf32>
    %65 = tpu.matmul %63, %64, %cst_27 {dimension_numbers = #tpu.dot_dimension_numbers<[1], [0], [0], [1], [0, 0, 1, 1], [], []>} : vector<1x128xbf16>, vector<128x10xbf16>, vector<1x10xf32> -> vector<1x10xf32>
    %c0_28 = arith.constant 0 : index
    %c0_29 = arith.constant 0 : index
    %66 = vector.load %arg9[%c0_28, %c0_29] : memref<1x10xf32, #tpu.memory_space<vmem>>, vector<1x10xf32>
    %67 = arith.addf %65, %66 : vector<1x10xf32>
    %c0_30 = arith.constant 0 : index
    %c0_31 = arith.constant 0 : index
    %c0_32 = arith.constant 0 : index
    %68 = vector.load %arg10[%c0_30, %c0_31, %c0_32] : memref<1x1x10xf32, #tpu.memory_space<vmem>>, vector<1x1x10xf32>
    %69 = vector.shape_cast %68 : vector<1x1x10xf32> to vector<1x10xf32>
    %70 = vector.shape_cast %67 : vector<1x10xf32> to vector<1x1x10xf32>
    tpu.vector_store %arg10[%c0_30, %c0_31, %c0_32], %70 {strides = array<i32>} : memref<1x1x10xf32, #tpu.memory_space<vmem>>, vector<1x1x10xf32>,
    return
  }
  func.func @transform_0(%arg0: i32) -> (i32, i32, i32) {
    %c0_i32 = arith.constant 0 : i32
    %c0_i32_0 = arith.constant 0 : i32
    %c0_i32_1 = arith.constant 0 : i32
    return %arg0, %c0_i32, %c0_i32_0 : i32, i32, i32
  }
  func.func @transform_1(%arg0: i32) -> (i32, i32) {
    %c0_i32 = arith.constant 0 : i32
    %c0_i32_0 = arith.constant 0 : i32
    %c0_i32_1 = arith.constant 0 : i32
    return %c0_i32, %c0_i32_0 : i32, i32
  }
  func.func @transform_2(%arg0: i32) -> (i32, i32) {
    %c0_i32 = arith.constant 0 : i32
    %c0_i32_0 = arith.constant 0 : i32
    %c0_i32_1 = arith.constant 0 : i32
    return %c0_i32, %c0_i32_0 : i32, i32
  }
  func.func @transform_3(%arg0: i32) -> (i32, i32) {
    %c0_i32 = arith.constant 0 : i32
    %c0_i32_0 = arith.constant 0 : i32
    %c0_i32_1 = arith.constant 0 : i32
    return %c0_i32, %c0_i32_0 : i32, i32
  }
  func.func @transform_4(%arg0: i32) -> (i32, i32) {
    %c0_i32 = arith.constant 0 : i32
    %c0_i32_0 = arith.constant 0 : i32
    %c0_i32_1 = arith.constant 0 : i32
    return %c0_i32, %c0_i32_0 : i32, i32
  }
  func.func @transform_5(%arg0: i32) -> (i32, i32) {
    %c0_i32 = arith.constant 0 : i32
    %c0_i32_0 = arith.constant 0 : i32
    %c0_i32_1 = arith.constant 0 : i32
    return %c0_i32, %c0_i32_0 : i32, i32
  }
  func.func @transform_6(%arg0: i32) -> (i32, i32) {
    %c0_i32 = arith.constant 0 : i32
    %c0_i32_0 = arith.constant 0 : i32
    %c0_i32_1 = arith.constant 0 : i32
    return %c0_i32, %c0_i32_0 : i32, i32
  }
  func.func @transform_7(%arg0: i32) -> (i32, i32) {
    %c0_i32 = arith.constant 0 : i32
    %c0_i32_0 = arith.constant 0 : i32
    %c0_i32_1 = arith.constant 0 : i32
    return %c0_i32, %c0_i32_0 : i32, i32
  }
  func.func @transform_8(%arg0: i32) -> (i32, i32) {
    %c0_i32 = arith.constant 0 : i32
    %c0_i32_0 = arith.constant 0 : i32
    %c0_i32_1 = arith.constant 0 : i32
    return %c0_i32, %c0_i32_0 : i32, i32
  }
  func.func @transform_9(%arg0: i32) -> (i32, i32, i32) {
    %c0_i32 = arith.constant 0 : i32
    %c0_i32_0 = arith.constant 0 : i32
    %c0_i32_1 = arith.constant 0 : i32
    return %arg0, %c0_i32, %c0_i32_0 : i32, i32, i32
  }
}

</mosaic_0001>

<bundles_post_ra>
// kernel: tpu_custom_call.1
= control target key start
LH: loop header
LB: loop body
LE: loop exit
PB: predicated region body
PF: predicated region fallthrough
CT: control target
= control target key end

     0   :  { %14 = vsyncpa [#allocation3], 0  ;;  %s6917_s0 = inlined_call_operand.vmem [shape: bf16[2,256,27], index: 0, kind: input, shape index: {}]   ;;  %s6918_s1 = inlined_call_operand.vmem [shape: bf16[27,32], index: 1, kind: input, shape index: {}]   ;;  %s6919_s2 = inlined_call_operand.vmem [shape: f32[1,32], index: 2, kind: input, shape index: {}]   ;;  %s6920_s3 = inlined_call_operand.vmem [shape: bf16[288,64], index: 3, kind: input, shape index: {}]   ;;  %s6921_s4 = inlined_call_operand.vmem [shape: f32[1,64], index: 4, kind: input, shape index: {}]   ;;  %s6922_s5 = inlined_call_operand.vmem [shape: bf16[576,128], index: 5, kind: input, shape index: {}]   ;;  %s6923_s6 = inlined_call_operand.vmem [shape: f32[1,128], index: 6, kind: input, shape index: {}]   ;;  %s6924_s7 = inlined_call_operand.vmem [shape: bf16[128,10], index: 7, kind: input, shape index: {}]   ;;  %s6925_s8 = inlined_call_operand.vmem [shape: f32[1,10], index: 8, kind: input, shape index: {}]   ;;  %s6926_s9 = inlined_call_operand.hbm [shape: f32[2,1,10], index: 9, kind: output, shape index: {}]  }
   0x1   :  { %16 = vsyncpa [#allocation3 + $0x1], 0  ;;  %s4967_s30 = smov 0   ;;  %s4969_s10 = smov 0  }
   0x2   :  { %s4971_s11 = smov 0   ;;  %s4973_s12 = smov 0  }
   0x3 LB: > { %s4988_s13 = sadd.s32 4294967295, %s4907_s12   ;;  %s4044_s14 = sadd.s32 4294967294, %s4907_s12   ;;  %s4907_s12 = sphi %s4973_s12, %s6934_s12   ;;  %s4903_s11 = sphi %s4971_s11, %s6933_s11   ;;  %s4899_s10 = sphi %s4969_s10, %s6932_s10   ;;  %s4895_s30 = sphi %s4967_s30, %s6931_s30  }
   0x4   : > { %s4992_s15 = sadd.s32 1, %s4907_s12   ;;  %s223_s16 = sadd.s32 1, %s4903_s11 }
   0x5   : > { %s220_s17 = ssub.s32 %s4907_s12, %s4992_s15  ;;  %p233_p0 = scmp.ne.s32.totalorder %s4903_s11, %s4899_s10 }
   0x6   : > { %p221_p1 = scmp.eq.s32.totalorder %s220_s17, 0  ;;  %p234_p2 = scmp.eq.s32.totalorder %s4988_s13, 1 }
   0x7   : > { %p239_p3 = scmp.ne.s32.totalorder %s4899_s10, %s4895_s30  ;;  %p240_p4 = scmp.eq.s32.totalorder %s4044_s14, 1 }
   0x8   : > { %s5003_s18 = scalar_select %p221_p1, %s4903_s11, %s223_s16  }
   0x9   : > { %p5005_p5 = por %p234_p2, %p233_p0  ;;  %p5009_p6 = por %p240_p4, %p239_p3 }
   0xa   : > { %p4047_p7 = scmp.ge.s32.totalorder %s4907_s12, 1  ;;  %p290_p8 = scmp.lt.s32.totalorder %s4907_s12, 3 }
   0xc   : > { %p291_p9 = pnand %p4047_p7, %p290_p8 }
   0xd   : > { %v4764_v0 = vld [vmem:[%s6918_s1] sm:$0xff] (!%p291_p9)   ;;  %vm514_vm0 = vcmask (!%p291_p9), 1044480   ;;  %v4765_v1 = vld [vmem:[%s6918_s1 + $0x8] sm:$0x3f] (!%p291_p9)   ;;  %vm515_vm1 = vcmask (!%p291_p9), 1045504   ;;  %p325_p10 = scmp.lt.s32.totalorder (!%p291_p9), %s4988_s13, 1 }
   0xe   : > { %294 = sbr.rel (%p291_p9) target bundleno = 1449 (0x5a9), region = 56  ;;  %4586 = vmatprep.subr.bf16.mxu0 (!%p291_p9), %v4764_v0  ;;  %v4909_v2 = vmov (!%p291_p9), 65535   ;;  %vm465_vm2 = vcmask (!%p291_p9), 220160   ;;  %vm883_vm3 = vcmask (!%p291_p9), 1040384   ;;  %vm884_vm4 = vsmask.f32 (!%p291_p9), 256 }
   0xf   : > { %4587 = vmatpush3.bf16.msra.mxu0 (!%p291_p9), %v4764_v0  ;;  %v516_v3 = vsel (!%p291_p9), %vm514_vm0, 4294967295, %v4909_v2  ;;  %v4910_v22 = vmov (!%p291_p9), 0   ;;  %vm5060_vm5 = vmand (!%p291_p9), %vm883_vm3, %vm884_vm4  ;;  %vm1177_vm6 = vcmask (!%p291_p9), 1046528   ;;  %s4911_s14 = smov (!%p291_p9), 64   ;;  %vm920_vm7 = vsmask.f32 (!%p291_p9), 7424 }
  0x10   : > { %v517_v4 = vsel (!%p291_p9), %vm515_vm1, %v516_v3, 0  ;;  %v733_v23 = vrot.slane (!%p291_p9), %v4910_v22, 7  ;;  %s4912_s16 = smov (!%p291_p9), 32   ;;  %v4782_v37 = vld [vmem:[%s6920_s3 + $0x80] sm:$0xff] (!%p291_p9)   ;;  %v4783_v38 = vld [vmem:[%s6920_s3 + $0x88] sm:$0xff] (!%p291_p9)   ;;  %v4788_v43 = vld [vmem:[%s6920_s3 + $0x50] sm:$0xff] (!%p291_p9)  }
  0x11   : > { %v519_v5 = vand.u32 (!%p291_p9), %v4765_v1, %v517_v4  ;;  %v4784_v39 = vld [vmem:[%s6920_s3 + $0x40] sm:$0xff] (!%p291_p9)   ;;  %v4786_v41 = vld [vmem:[%s6920_s3 + $0x48] sm:$0xff] (!%p291_p9)   ;;  %v4789_v44 = vld [vmem:[%s6920_s3 + $0x10] sm:$0xff] (!%p291_p9)   ;;  %vm1403_vm8 = vcmask (!%p291_p9), 261120   ;;  %s4913_s28 = smov (!%p291_p9), 96   ;;  %vm1436_vm9 = vcmask (!%p291_p9), 523264  }
  0x12   : > { %v5066_v25 = vsel (!%p291_p9), %vm5060_vm5, 0, %v733_v23  ;;  %v903_v26 = vsel (!%p291_p9), %vm5060_vm5, %v733_v23, 0  ;;  %v4785_v40 = vld [vmem:[%s6920_s3] sm:$0xff] (!%p291_p9)   ;;  %4203 = vmatprep.subr.bf16.mxu1 (!%p291_p9), %v4784_v39  ;;  %v4787_v42 = vld [vmem:[%s6920_s3 + $0x8] sm:$0xff] (!%p291_p9)   ;;  %v4790_v45 = vld [vmem:[%s6920_s3 + $0x58] sm:$0xff] (!%p291_p9)   ;;  %vm1469_vm10 = vcmask (!%p291_p9), 785408  }
  0x13   : > { %4588 = vmatprep.subr.bf16.mxu0 (!%p291_p9), %v519_v5  ;;  %v924_v27 = vshll.u32 (!%p291_p9), %v5066_v25, 16  ;;  %v1178_v28 = vrot.slane (!%p291_p9), %v5066_v25, 1  ;;  %v1179_v29 = vrot.slane (!%p291_p9), %v903_v26, 1  ;;  %v922_v30 = vshrl.u32 (!%p291_p9), %v5066_v25, 16  ;;  %4204 = vmatpush3.bf16.msra.mxu1 (!%p291_p9), %v4785_v40  ;;  %v4791_v46 = vld [vmem:[%s6920_s3 + $0x18] sm:$0xff] (!%p291_p9)   ;;  %v4792_v48 = vld [vmem:[%s6920_s3 + $0x60] sm:$0xff] (!%p291_p9)  }
  0x14   : > { %4589 = vmatpush3.bf16.msra.mxu0 (!%p291_p9), %v519_v5  ;;  %v929_v32 = vshll.u32 (!%p291_p9), %v903_v26, 16  ;;  %4205 = vmatprep.subr.bf16.mxu1 (!%p291_p9), %v4786_v41  ;;  %v5116_v47 = vld [vmem:[%s6919_s2] ss:$0 sm:$0xff] (!%p291_p9)  ;;  %v4794_v57 = vld [vmem:[%s6920_s3 + $0x68] sm:$0xff] (!%p291_p9)   ;;  %v4796_v1 = vld [vmem:[%s6920_s3 + $0x70] sm:$0xff] (!%p291_p9)   ;;  %vm4915_vm11 = vmmov (!%p291_p9), 0  }
  0x15   : > { %s326_s25 = scalar_select %p325_p10, %s4988_s13, 1  ;;  %v926_v31 = vrot.slane %v924_v27, 1  ;;  %v5074_v33 = vsel %vm1177_vm6, %v1178_v28, %v1179_v29  ;;  %4622 = vmatprep.subr.bf16.mxu0 %v4782_v37  ;;  %v4793_v50 = vld [vmem:[%s6920_s3 + $0x20] sm:$0xff]   ;;  %v4795_v59 = vld [vmem:[%s6920_s3 + $0x28] sm:$0xff]   ;;  %v4797_v4 = vld [vmem:[%s6920_s3 + $0x30] sm:$0xff]   ;;  %vm3974_vm12 = vcmask 73728  }
  0x16   : > { %1226 = vrot.lane.b32.xlu1 %v5074_v33, %s4911_s14  ;;  %v931_v35 = vrot.slane %v929_v32, 1  ;;  %s323_s22 = sand.u32 1, %s4899_s10   ;;  %s4916_s17 = smov [#allocation2]  }
  0x17   : > { %s4184_s26 = sshll.u32 %s326_s25, 7  ;;  %v927_v34 = vor.u32 %v926_v31, %v922_v30  ;;  %4206 = vmatpush3.bf16.msra.mxu1 %v4787_v42  ;;  %s4181_s25 = sshll.u32 %s4988_s13, 4 }
  0x18   : > { %s5026_s29 = scalar_lea.vmem %s6917_s0, %s4184_s26  ;;  %4207 = vmatprep.subr.bf16.mxu1 %v4788_v43  ;;  %s324_s26 = scalar_lea.vmem [#allocation2], %s323_s22 }
  0x19   : > { %v4766_v6 = vld [vmem:[%s5026_s29] sm:$0xff]   ;;  %v4767_v7 = vld [vmem:[%s5026_s29 + $0x8] sm:$0xff]   ;;  %v4768_v8 = vld [vmem:[%s5026_s29 + $0x10] sm:$0xff]   ;;  %v5079_v36 = vsel %vm920_vm7, %v927_v34, %v931_v35  ;;  %s3989_s27 = sshll.u32 %s324_s26, 4  ;;  %s3977_s13 = scalar_lea.sflag [#allocation3], %s323_s22  ;;  %s6877_s27 = int_to_ptr.vmem [resolvable:$true] %s3989_s27 }
  0x1a   : > { %4590 = vmatprep.mubr.msk.bf16.mxu0 %vm465_vm2, %v4766_v6  ;;  %v4769_v9 = vld [vmem:[%s5026_s29 + $0x18] sm:$0xff]   ;;  %v4770_v10 = vld [vmem:[%s5026_s29 + $0x20] sm:$0xff]   ;;  %v4771_v11 = vld [vmem:[%s5026_s29 + $0x28] sm:$0xff]   ;;  %1113 = vrot.lane.b32.xlu0 %v5079_v36, %s4912_s16  ;;  %s4849_s21 = sshll.u32 %s4916_s17, 4  ;;  %s4850_s21 = int_to_ptr.vmem [resolvable:$false] %s4849_s21 }
  0x1b   : > { %4591 = vmatmul.mubr.msk.bf16.vlgmr.msra.gmra.mrb[0].mxu0 %vm465_vm2, %v4767_v7  ;;  %v4772_v12 = vld [vmem:[%s5026_s29 + $0x30] sm:$0xff]   ;;  %v4773_v13 = vld [vmem:[%s5026_s29 + $0x38] sm:$0xff]   ;;  %v4774_v14 = vld [vmem:[%s5026_s29 + $0x40] sm:$0xff]   ;;  %4208 = vmatpush3.bf16.msra.mxu1 %v4789_v44  ;;  %s4851_s23 = scalar_lea.vmem %s4850_s21, 32  ;;  %p4852_p0 = scmp.lt.s32.totalorder %s6877_s27, %s4850_s21 }
  0x1c   : > { %4594 = vmatprep.mubr.msk.bf16.mxu0 %vm465_vm2, %v4768_v8  ;;  %v4775_v15 = vld [vmem:[%s5026_s29 + $0x48] sm:$0xff]   ;;  %v4776_v16 = vld [vmem:[%s5026_s29 + $0x50] sm:$0xff]   ;;  %v4777_v17 = vld [vmem:[%s5026_s29 + $0x58] sm:$0xff]   ;;  %4623 = vmatpush3.bf16.msra.mxu0 %v4782_v37 }
  0x1d   : > { %v4778_v18 = vld [vmem:[%s5026_s29 + $0x60] sm:$0xff]   ;;  %v4779_v19 = vld [vmem:[%s5026_s29 + $0x68] sm:$0xff]   ;;  %v4780_v20 = vld [vmem:[%s5026_s29 + $0x70] sm:$0xff]   ;;  %4624 = vmatprep.subr.bf16.mxu0 %v4783_v38  ;;  %4209 = vmatprep.subr.bf16.mxu1 %v4790_v45 }
  0x1e   : > { %v4781_v21 = vld [vmem:[%s5026_s29 + $0x78] sm:$0xff]   ;;  %s4845_s29 = scalar_lea.vmem %s6877_s27, 16 }
  0x1f   : > { %4210 = vmatpush3.bf16.msra.mxu1 %v4791_v46  ;;  %p4846_p11 = scmp.ne.s32.totalorder %s6877_s27, %s4845_s29  ;;  %p4853_p1 = scmp.lt.s32.totalorder %s4851_s23, %s4845_s29 }
  0x20   : > { %4625 = vmatpush3.bf16.msra.mxu0 %v4783_v38  ;;  %4211 = vmatprep.subr.bf16.mxu1 %v4792_v48 }
  0x21   : > { %p4847_p12 = pnand %p4846_p11, %p5005_p5  ;;  %p4854_p2 = por %p4853_p1, %p4852_p0 }
  0x23   : > { %4595 = vmatmul.mubr.msk.bf16.gmra.mrb[4].mxu0 %vm465_vm2, %v4769_v9  ;;  %4212 = vmatpush3.bf16.msra.mxu1 %v4793_v50  ;;  %p4848_p13 = pneg %p4847_p12 }
  0x24   : > { %4598 = vmatprep.mubr.msk.bf16.mxu0 %vm465_vm2, %v4770_v10  ;;  %4213 = vmatprep.subr.bf16.mxu1 %v4794_v57 }
  0x25   : > { %p4855_p3 = pnand %p4854_p2, %p4848_p13 }
  0x27   : > { %4214 = vmatpush3.bf16.msra.mxu1 %v4795_v59 }
  0x28   : > { %4215 = vmatprep.subr.bf16.mxu1 %v4796_v1 }
  0x2b   : > { %4599 = vmatmul.mubr.msk.bf16.gmra.mrb[8].mxu0 %vm465_vm2, %v4771_v11  ;;  %4216 = vmatpush3.bf16.msra.mxu1 %v4797_v4 }
  0x2c   : > { %4602 = vmatprep.mubr.msk.bf16.mxu0 %vm465_vm2, %v4772_v12 }
  0x33   : > { %4603 = vmatmul.mubr.msk.bf16.gmra.mrb[12].mxu0 %vm465_vm2, %v4773_v13 }
  0x34   : > { %4606 = vmatprep.mubr.msk.bf16.mxu0 %vm465_vm2, %v4774_v14 }
  0x3b   : > { %4607 = vmatmul.mubr.msk.bf16.gmra.mrb[16].mxu0 %vm465_vm2, %v4775_v15 }
  0x3c   : > { %4610 = vmatprep.mubr.msk.bf16.mxu0 %vm465_vm2, %v4776_v16  ;;  %v4798_v16 = vld [vmem:[%s6920_s3 + $0x78] sm:$0xff]  }
  0x3d   : > { %4217 = vmatprep.subr.bf16.mxu1 %v4798_v16 }
  0x43   : > { %4611 = vmatmul.mubr.msk.bf16.gmra.mrb[20].mxu0 %vm465_vm2, %v4777_v17 }
  0x44   : > { %4614 = vmatprep.mubr.msk.bf16.mxu0 %vm465_vm2, %v4778_v18 }
  0x4b   : > { %4615 = vmatmul.mubr.msk.bf16.gmra.mrb[24].mxu0 %vm465_vm2, %v4779_v19 }
  0x4c   : > { %4618 = vmatprep.mubr.msk.bf16.mxu0 %vm465_vm2, %v4780_v20 }
  0x53   : > { %4619 = vmatmul.mubr.msk.bf16.gmra.mrb[28].mxu0 %vm465_vm2, %v4781_v21  ;;  %v4799_v21 = vld [vmem:[%s6920_s3 + $0x38] sm:$0xff]  }
  0x54   : > { %4218 = vmatpush3.bf16.msra.mxu1 %v4799_v21 }
  0xee   : > { %v4592_v49 = vpop.f32.mrb[0].mxu0 }
  0xef   : > { %v564_v51 = vadd.f32 %v4592_v49, %v5116_v47  ;;  %v555_v52 = vpop.f32.mrb[1].mxu0 }
  0xf0   : > { %v556_v53 = vadd.f32 %v5116_v47, %v555_v52  ;;  %v4593_v54 = vpop.f32.mrb[2].mxu0 }
  0xf1   : > { %v567_v55 = vadd.f32 %v4593_v54, %v5116_v47  ;;  %v558_v56 = vpop.f32.mrb[3].mxu0  ;;  %v684_v60 = vmax.f32 %v564_v51, 0.0 }
  0xf2   : > { %v559_v58 = vadd.f32 %v5116_v47, %v558_v56  ;;  %v682_v62 = vmax.f32 %v556_v53, 0.0 }
  0xf3   : > { %v685_v61 = vmax.f32 %v567_v55, 0.0 }
  0xf4   : > { %v683_v63 = vmax.f32 %v559_v58, 0.0 }
  0xf5   : > { %v715_v0 = vpack.c.bf16 %v685_v61, %v684_v60 }
  0xf6   : > { %v714_v2 = vpack.c.bf16 %v683_v63, %v682_v62  ;;  %v4596_v3 = vpop.f32.mrb[4].mxu0 }
  0xf7   : > { %v745_v5 = vshrl.u32 %v715_v0, 16  ;;  %v580_v6 = vadd.f32 %v4596_v3, %v5116_v47  ;;  %v571_v7 = vpop.f32.mrb[5].mxu0  ;;  %v748_v12 = vshll.u32 %v715_v0, 16 }
  0xf8   : > { %v738_v8 = vshrl.u32 %v714_v2, 16  ;;  %v572_v9 = vadd.f32 %v5116_v47, %v571_v7  ;;  %v4597_v10 = vpop.f32.mrb[6].mxu0  ;;  %v741_v18 = vshll.u32 %v714_v2, 16 }
  0xf9   : > { %v747_v11 = vrot.slane %v745_v5, 7  ;;  %v688_v13 = vmax.f32 %v580_v6, 0.0  ;;  %v583_v14 = vadd.f32 %v4597_v10, %v5116_v47  ;;  %v574_v15 = vpop.f32.mrb[7].mxu0 }
  0xfa   : > { %v740_v17 = vrot.slane %v738_v8, 7  ;;  %v686_v19 = vmax.f32 %v572_v9, 0.0  ;;  %v575_v20 = vadd.f32 %v5116_v47, %v574_v15 }
  0xfb   : > { %v750_v22 = vor.u32 %v748_v12, %v747_v11  ;;  %v689_v23 = vmax.f32 %v583_v14, 0.0  ;;  %v905_v26 = vsel %vm5060_vm5, %v747_v11, 0 }
  0xfc   : > { %v743_v27 = vor.u32 %v741_v18, %v740_v17  ;;  %v687_v28 = vmax.f32 %v575_v20, 0.0  ;;  %v5154_v29 = vsel %vm5060_vm5, %v740_v17, 0  ;;  %v1185_v32 = vrot.slane %v905_v26, 1 }
  0xfd   : > { %v717_v30 = vpack.c.bf16 %v689_v23, %v688_v13  ;;  %v5158_v31 = vsel %vm5060_vm5, 0, %v750_v22  ;;  %v1182_v34 = vrot.slane %v5154_v29, 1  ;;  %v953_v39 = vshll.u32 %v905_v26, 16 }
  0xfe   : > { %v5163_v35 = vsel %vm5060_vm5, 0, %v743_v27  ;;  %v716_v37 = vpack.c.bf16 %v687_v28, %v686_v19  ;;  %1339 = vrot.lane.b32.xlu1 %v5158_v31, %s4911_s14  ;;  %v1184_v38 = vrot.slane %v5158_v31, 1  ;;  %v4600_v40 = vpop.f32.mrb[8].mxu0  ;;  %v948_v44 = vshll.u32 %v5158_v31, 16 }
  0xff   : > { %v759_v41 = vshrl.u32 %v717_v30, 16  ;;  %v762_v42 = vshll.u32 %v717_v30, 16  ;;  %v1181_v43 = vrot.slane %v5163_v35, 1  ;;  %v587_v45 = vpop.f32.mrb[9].mxu0  ;;  %v946_v50 = vshrl.u32 %v5158_v31, 16 }
 0x100   : > { %v752_v46 = vshrl.u32 %v716_v37, 16  ;;  %v755_v48 = vshll.u32 %v716_v37, 16  ;;  %v1186_v49 = vsel %vm1177_vm6, %v1184_v38, %v1185_v32  ;;  %v4601_v51 = vpop.f32.mrb[10].mxu0  ;;  %v950_v54 = vrot.slane %v948_v44, 1 }
 0x101   : > { %v761_v52 = vrot.slane %v759_v41, 7  ;;  %1309 = vrot.lane.b32.xlu0 %v1186_v49, %s4912_s16  ;;  %4626 = vmatprep.mubr.msk.bf16.mxu0 %vm1403_vm8, %v1186_v49  ;;  %v1183_v53 = vsel %vm1177_vm6, %v1181_v43, %v1182_v34  ;;  %v596_v55 = vadd.f32 %v4600_v40, %v5116_v47  ;;  %v590_v56 = vpop.f32.mrb[11].mxu0  ;;  %v588_v58 = vadd.f32 %v5116_v47, %v587_v45 }
 0x102   : > { %v754_v57 = vrot.slane %v752_v46, 7  ;;  %1261 = vrot.lane.b32.xlu1 %v5158_v31, %s4913_s28  ;;  %v599_v59 = vadd.f32 %v4601_v51, %v5116_v47  ;;  %v591_v60 = vadd.f32 %v5116_v47, %v590_v56  ;;  %v951_v63 = vor.u32 %v950_v54, %v946_v50 }
 0x103   : > { %v764_v61 = vor.u32 %v762_v42, %v761_v52  ;;  %v5183_v62 = vsel %vm5060_vm5, %v761_v52, 0  ;;  %v692_v0 = vmax.f32 %v596_v55, 0.0  ;;  %v690_v4 = vmax.f32 %v588_v58, 0.0 }
 0x104   : > { %v757_v1 = vor.u32 %v755_v48, %v754_v57  ;;  %v5187_v2 = vsel %vm5060_vm5, %v754_v57, 0  ;;  %v1191_v3 = vrot.slane %v5183_v62, 1  ;;  %v693_v7 = vmax.f32 %v599_v59, 0.0 }
 0x105   : > { %v5192_v5 = vsel %vm5060_vm5, 0, %v764_v61  ;;  %v1188_v6 = vrot.slane %v5187_v2, 1  ;;  %1307 = vrot.lane.b32.xlu0 %v1183_v53, %s4912_s16  ;;  %v955_v9 = vrot.slane %v953_v39, 1  ;;  %v691_v11 = vmax.f32 %v591_v60, 0.0 }
 0x106   : > { %v5198_v8 = vsel %vm5060_vm5, 0, %v757_v1  ;;  %1259 = vrot.lane.b32.xlu1 %v5163_v35, %s4913_s28  ;;  %v1190_v10 = vrot.slane %v5192_v5, 1  ;;  %v4604_v12 = vpop.f32.mrb[12].mxu0  ;;  %v719_v14 = vpack.c.bf16 %v693_v7, %v692_v0  ;;  %v936_v15 = vshll.u32 %v5163_v35, 16 }
 0x107   : > { %v1187_v13 = vrot.slane %v5198_v8, 1  ;;  %v603_v16 = vpop.f32.mrb[13].mxu0  ;;  %v5206_v17 = vsel %vm920_vm7, %v951_v63, %v955_v9  ;;  %v718_v19 = vpack.c.bf16 %v691_v11, %v690_v4  ;;  %v972_v30 = vshll.u32 %v5192_v5, 16 }
 0x108   : > { %v5209_v18 = vsel %vm1177_vm6, %v1190_v10, %v1191_v3  ;;  %v4605_v20 = vpop.f32.mrb[14].mxu0  ;;  %v773_v22 = vshrl.u32 %v719_v14, 16  ;;  %v776_v23 = vshll.u32 %v719_v14, 16  ;;  %v938_v34 = vrot.slane %v936_v15, 1 }
 0x109   : > { %1371 = vrot.lane.b32.xlu0 %v5206_v17, %s4913_s28  ;;  %v5214_v21 = vsel %vm1177_vm6, %v1187_v13, %v1188_v6  ;;  %v606_v26 = vpop.f32.mrb[15].mxu0  ;;  %v766_v27 = vshrl.u32 %v718_v19, 16  ;;  %v769_v28 = vshll.u32 %v718_v19, 16  ;;  %v934_v40 = vshrl.u32 %v5163_v35, 16 }
 0x10a   : > { %4627 = vmatmul.mubr.msk.bf16.vlgmr.msra.gmra.mrb[32].mxu0 %vm1403_vm8, %v5214_v21  ;;  %1230 = vrot.lane.b32.xlu1 %v1186_v49, %s4911_s14  ;;  %v775_v32 = vrot.slane %v773_v22, 7  ;;  %v941_v41 = vshll.u32 %v5154_v29, 16  ;;  %v970_v44 = vshrl.u32 %v5192_v5, 16  ;;  %v974_v45 = vrot.slane %v972_v30, 1 }
 0x10b   : > { %4630 = vmatprep.mubr.msk.bf16.mxu0 %vm1403_vm8, %v5209_v18  ;;  %v768_v37 = vrot.slane %v766_v27, 7  ;;  %v939_v49 = vor.u32 %v938_v34, %v934_v40  ;;  %v612_v55 = vadd.f32 %v4604_v12, %v5116_v47  ;;  %v604_v58 = vadd.f32 %v5116_v47, %v603_v16 }
 0x10c   : > { %v778_v38 = vor.u32 %v776_v23, %v775_v32  ;;  %v5226_v39 = vsel %vm5060_vm5, %v775_v32, 0  ;;  %v615_v59 = vadd.f32 %v4605_v20, %v5116_v47  ;;  %v607_v60 = vadd.f32 %v5116_v47, %v606_v26 }
 0x10d   : > { %1343 = vrot.lane.b32.xlu0 %v5192_v5, %s4911_s14  ;;  %v771_v42 = vor.u32 %v769_v28, %v768_v37  ;;  %v5233_v43 = vsel %vm5060_vm5, %v768_v37, 0  ;;  %v1197_v29 = vrot.slane %v5226_v39, 1  ;;  %v960_v63 = vshll.u32 %v5198_v8, 16 }
 0x10e   : > { %1228 = vrot.lane.b32.xlu1 %v1183_v53, %s4911_s14  ;;  %v4608_v46 = vpop.f32.mrb[16].mxu0  ;;  %v5238_v48 = vsel %vm5060_vm5, 0, %v778_v38  ;;  %v1194_v50 = vrot.slane %v5233_v43, 1  ;;  %v977_v53 = vshll.u32 %v5183_v62, 16  ;;  %v943_v62 = vrot.slane %v941_v41, 1 }
 0x10f   : > { %v619_v51 = vpop.f32.mrb[17].mxu0  ;;  %v5244_v52 = vsel %vm5060_vm5, 0, %v771_v42  ;;  %v1196_v54 = vrot.slane %v5238_v48, 1  ;;  %v696_v1 = vmax.f32 %v612_v55, 0.0  ;;  %v694_v4 = vmax.f32 %v604_v58, 0.0 }
 0x110   : > { %v4609_v56 = vpop.f32.mrb[18].mxu0  ;;  %v1193_v57 = vrot.slane %v5244_v52, 1  ;;  %v697_v6 = vmax.f32 %v615_v59, 0.0  ;;  %v695_v7 = vmax.f32 %v607_v60, 0.0  ;;  %v975_v9 = vor.u32 %v974_v45, %v970_v44 }
 0x111   : > { %1341 = vrot.lane.b32.xlu0 %v5198_v8, %s4911_s14  ;;  %v622_v61 = vpop.f32.mrb[19].mxu0  ;;  %v5259_v0 = vsel %vm1177_vm6, %v1196_v54, %v1197_v29  ;;  %v965_v10 = vshll.u32 %v5187_v2, 16  ;;  %v5270_v11 = vsel %vm920_vm7, %v939_v49, %v943_v62  ;;  %v979_v12 = vrot.slane %v977_v53, 1 }
 0x112   : > { %1117 = vrot.lane.b32.xlu1 %v5206_v17, %s4912_s16  ;;  %v5262_v3 = vsel %vm1177_vm6, %v1193_v57, %v1194_v50  ;;  %v721_v13 = vpack.c.bf16 %v697_v6, %v696_v1  ;;  %v720_v14 = vpack.c.bf16 %v695_v7, %v694_v4  ;;  %v958_v15 = vshrl.u32 %v5198_v8, 16 }
 0x113   : > { %4631 = vmatmul.mubr.msk.bf16.gmra.mrb[36].mxu0 %vm1403_vm8, %v5262_v3  ;;  %v962_v16 = vrot.slane %v960_v63, 1  ;;  %v628_v2 = vadd.f32 %v4608_v46, %v5116_v47  ;;  %v620_v19 = vadd.f32 %v5116_v47, %v619_v51  ;;  %v967_v30 = vrot.slane %v965_v10, 1 }
 0x114   : > { %4634 = vmatprep.mubr.msk.bf16.mxu0 %vm1403_vm8, %v5259_v0  ;;  %v787_v22 = vshrl.u32 %v721_v13, 16  ;;  %v790_v23 = vshll.u32 %v721_v13, 16  ;;  %v780_v26 = vshrl.u32 %v720_v14, 16  ;;  %v783_v27 = vshll.u32 %v720_v14, 16 }
 0x115   : > { %1313 = vrot.lane.b32.xlu0 %v5209_v18, %s4912_s16  ;;  %v5282_v34 = vsel %vm920_vm7, %v975_v9, %v979_v12  ;;  %v631_v40 = vadd.f32 %v4609_v56, %v5116_v47  ;;  %v963_v42 = vor.u32 %v962_v16, %v958_v15  ;;  %v700_v44 = vmax.f32 %v628_v2, 0.0 }
 0x116   : > { %1115 = vrot.lane.b32.xlu1 %v5270_v11, %s4912_s16  ;;  %v4612_v20 = vpop.f32.mrb[20].mxu0  ;;  %v789_v37 = vrot.slane %v787_v22, 7  ;;  %v782_v38 = vrot.slane %v780_v26, 7  ;;  %v698_v45 = vmax.f32 %v620_v19, 0.0  ;;  %v623_v46 = vadd.f32 %v5116_v47, %v622_v61 }
 0x117   : > { %v635_v28 = vpop.f32.mrb[21].mxu0  ;;  %v701_v55 = vmax.f32 %v631_v40, 0.0  ;;  %v5313_v1 = vsel %vm920_vm7, %v963_v42, %v967_v30  ;;  %v644_v4 = vadd.f32 %v4612_v20, %v5116_v47 }
 0x118   : > { %v4613_v32 = vpop.f32.mrb[22].mxu0  ;;  %v792_v49 = vor.u32 %v790_v23, %v789_v37  ;;  %v5290_v50 = vsel %vm5060_vm5, %v789_v37, 0  ;;  %v785_v29 = vor.u32 %v783_v27, %v782_v38  ;;  %v5294_v51 = vsel %vm5060_vm5, %v782_v38, 0 }
 0x119   : > { %1311 = vrot.lane.b32.xlu0 %v5214_v21, %s4912_s16  ;;  %v638_v41 = vpop.f32.mrb[23].mxu0  ;;  %v1200_v53 = vrot.slane %v5294_v51, 1  ;;  %v1203_v54 = vrot.slane %v5290_v50, 1  ;;  %v699_v56 = vmax.f32 %v623_v46, 0.0  ;;  %v723_v61 = vpack.c.bf16 %v701_v55, %v700_v44 }
 0x11a   : > { %1265 = vrot.lane.b32.xlu1 %v5192_v5, %s4913_s28  ;;  %v5302_v57 = vsel %vm5060_vm5, 0, %v792_v49  ;;  %v5306_v58 = vsel %vm5060_vm5, 0, %v785_v29  ;;  %v636_v19 = vadd.f32 %v5116_v47, %v635_v28  ;;  %v647_v22 = vadd.f32 %v4613_v32, %v5116_v47 }
 0x11b   : > { %v1199_v59 = vrot.slane %v5306_v58, 1  ;;  %v1202_v60 = vrot.slane %v5302_v57, 1  ;;  %v722_v62 = vpack.c.bf16 %v699_v56, %v698_v45  ;;  %v801_v10 = vshrl.u32 %v723_v61, 16 }
 0x11c   : > { %v804_v12 = vshll.u32 %v723_v61, 16  ;;  %v704_v27 = vmax.f32 %v644_v4, 0.0  ;;  %v639_v30 = vadd.f32 %v5116_v47, %v638_v41  ;;  %v702_v28 = vmax.f32 %v636_v19, 0.0 }
 0x11d   : > { %1375 = vrot.lane.b32.xlu0 %v5282_v34, %s4913_s28  ;;  %v5319_v7 = vsel %vm1177_vm6, %v1199_v59, %v1200_v53  ;;  %v5322_v9 = vsel %vm1177_vm6, %v1202_v60, %v1203_v54  ;;  %v794_v14 = vshrl.u32 %v722_v62, 16  ;;  %v797_v15 = vshll.u32 %v722_v62, 16 }
 0x11e   : > { %1263 = vrot.lane.b32.xlu1 %v5198_v8, %s4913_s28  ;;  %v4616_v63 = vpop.f32.mrb[24].mxu0  ;;  %4635 = vmatmul.mubr.msk.bf16.gmra.mrb[40].mxu0 %vm1403_vm8, %v5319_v7  ;;  %v803_v2 = vrot.slane %v801_v10, 7  ;;  %v705_v41 = vmax.f32 %v647_v22, 0.0  ;;  %v703_v46 = vmax.f32 %v639_v30, 0.0  ;;  %v1001_v60 = vshll.u32 %v5226_v39, 16 }
 0x11f   : > { %v5316_v6 = vpop.f32.mrb[25].mxu0  ;;  %4638 = vmatprep.mubr.msk.bf16.mxu0 %vm1403_vm8, %v5322_v9  ;;  %v796_v20 = vrot.slane %v794_v14, 7  ;;  %v984_v10 = vshll.u32 %v5244_v52, 16  ;;  %v660_v39 = vadd.f32 %v4616_v63, %v5116_v47  ;;  %v989_v22 = vshll.u32 %v5233_v43, 16 }
 0x120   : > { %v4617_v13 = vpop.f32.mrb[26].mxu0  ;;  %v806_v23 = vor.u32 %v804_v12, %v803_v2  ;;  %v5338_v26 = vsel %vm5060_vm5, %v803_v2, 0  ;;  %v725_v53 = vpack.c.bf16 %v705_v41, %v704_v27  ;;  %v724_v56 = vpack.c.bf16 %v703_v46, %v702_v28 }
 0x121   : > { %1373 = vrot.lane.b32.xlu0 %v5313_v1, %s4913_s28  ;;  %v5328_v16 = vpop.f32.mrb[27].mxu0  ;;  %v5345_v37 = vsel %vm5060_vm5, %v796_v20, 0  ;;  %v1209_v40 = vrot.slane %v5338_v26, 1  ;;  %v663_v27 = vadd.f32 %v4617_v13, %v5116_v47  ;;  %v1003_v30 = vrot.slane %v1001_v60, 1 }
 0x122   : > { %1234 = vrot.lane.b32.xlu1 %v5209_v18, %s4911_s14  ;;  %v799_v18 = vor.u32 %v797_v15, %v796_v20  ;;  %v5351_v32 = vsel %vm5060_vm5, 0, %v806_v23  ;;  %v1206_v38 = vrot.slane %v5345_v37, 1  ;;  %v815_v62 = vshrl.u32 %v725_v53, 16 }
 0x123   : > { %v1208_v45 = vrot.slane %v5351_v32, 1  ;;  %v818_v4 = vshll.u32 %v725_v53, 16  ;;  %v808_v12 = vshrl.u32 %v724_v56, 16  ;;  %v811_v14 = vshll.u32 %v724_v56, 16 }
 0x124   : > { %v5359_v44 = vsel %vm5060_vm5, 0, %v799_v18  ;;  %v994_v15 = vshrl.u32 %v5238_v48, 16  ;;  %v817_v19 = vrot.slane %v815_v62, 7  ;;  %v982_v20 = vshrl.u32 %v5244_v52, 16 }
 0x125   : > { %1347 = vrot.lane.b32.xlu0 %v5238_v48, %s4911_s14  ;;  %v1205_v29 = vrot.slane %v5359_v44, 1  ;;  %v5369_v55 = vsel %vm1177_vm6, %v1208_v45, %v1209_v40  ;;  %v810_v23 = vrot.slane %v808_v12, 7  ;;  %v652_v63 = vadd.f32 %v5116_v47, %v5316_v6 }
 0x126   : > { %1232 = vrot.lane.b32.xlu1 %v5214_v21, %s4911_s14  ;;  %v5355_v42 = vpop.f32.mrb[28].mxu0  ;;  %v996_v21 = vshll.u32 %v5238_v48, 16  ;;  %v820_v18 = vor.u32 %v818_v4, %v817_v19  ;;  %v5395_v28 = vsel %vm5060_vm5, %v817_v19, 0  ;;  %v709_v53 = vmax.f32 %v663_v27, 0.0 }
 0x127   : > { %v5362_v49 = vpop.f32.mrb[29].mxu0  ;;  %v5377_v61 = vsel %vm1177_vm6, %v1205_v29, %v1206_v38  ;;  %v986_v38 = vrot.slane %v984_v10, 1  ;;  %v813_v40 = vor.u32 %v811_v14, %v810_v23  ;;  %v5401_v43 = vsel %vm5060_vm5, %v810_v23, 0 }
 0x128   : > { %v4621_v54 = vpop.f32.mrb[30].mxu0  ;;  %4639 = vmatmul.mubr.msk.bf16.gmra.mrb[44].mxu0 %vm1403_vm8, %v5377_v61  ;;  %v998_v2 = vrot.slane %v996_v21, 1  ;;  %v1215_v13 = vrot.slane %v5395_v28, 1  ;;  %v5406_v45 = vsel %vm5060_vm5, 0, %v820_v18  ;;  %v1212_v46 = vrot.slane %v5401_v43, 1 }
 0x129   : > { %1345 = vrot.lane.b32.xlu0 %v5244_v52, %s4911_s14  ;;  %v5371_v59 = vpop.f32.mrb[31].mxu0  ;;  %4642 = vmatprep.mubr.msk.bf16.mxu0 %vm1403_vm8, %v5369_v55  ;;  %v708_v21 = vmax.f32 %v660_v39, 0.0  ;;  %v5413_v6 = vsel %vm5060_vm5, 0, %v813_v40  ;;  %v1214_v29 = vrot.slane %v5406_v45, 1  ;;  %v706_v60 = vmax.f32 %v652_v63, 0.0 }
 0x12a   : > { %1121 = vrot.lane.b32.xlu1 %v5282_v34, %s4912_s16  ;;  %v999_v41 = vor.u32 %v998_v2, %v994_v15  ;;  %v1211_v56 = vrot.slane %v5413_v6, 1  ;;  %v655_v62 = vadd.f32 %v5116_v47, %v5328_v16  ;;  %v987_v4 = vor.u32 %v986_v38, %v982_v20 }
 0x12b   : > { %v5422_v10 = vsel %vm1177_vm6, %v1214_v29, %v1215_v13  ;;  %v727_v12 = vpack.c.bf16 %v709_v53, %v708_v21  ;;  %v991_v15 = vrot.slane %v989_v22, 1  ;;  %v676_v23 = vadd.f32 %v5355_v42, %v5116_v47 }
 0x12c   : > { %v5425_v14 = vsel %vm920_vm7, %v999_v41, %v1003_v30  ;;  %v5428_v2 = vsel %vm1177_vm6, %v1211_v56, %v1212_v46  ;;  %v707_v19 = vmax.f32 %v655_v62, 0.0  ;;  %v668_v27 = vadd.f32 %v5116_v47, %v5362_v49 }
 0x12d   : > { %1317 = vrot.lane.b32.xlu0 %v5259_v0, %s4912_s16  ;;  %v829_v16 = vshrl.u32 %v727_v12, 16  ;;  %v832_v39 = vshll.u32 %v727_v12, 16  ;;  %v679_v30 = vadd.f32 %v4621_v54, %v5116_v47  ;;  %v5444_v18 = vsel %vm920_vm7, %v987_v4, %v991_v15 }
 0x12e   : > { %1119 = vrot.lane.b32.xlu1 %v5313_v1, %s4912_s16  ;;  %v726_v20 = vpack.c.bf16 %v707_v19, %v706_v60  ;;  %v712_v41 = vmax.f32 %v676_v23, 0.0  ;;  %v710_v54 = vmax.f32 %v668_v27, 0.0  ;;  %v671_v21 = vadd.f32 %v5116_v47, %v5371_v59 }
 0x12f   : > { %v831_v22 = vrot.slane %v829_v16, 7  ;;  %v713_v46 = vmax.f32 %v679_v30, 0.0  ;;  %v1020_v16 = vshll.u32 %v5302_v57, 16  ;;  %v1025_v27 = vshll.u32 %v5290_v50, 16 }
 0x130   : > { %4643 = vmatmul.mubr.msk.bf16.gmra.mrb[48].mxu0 %vm1403_vm8, %v5428_v2  ;;  %v822_v63 = vshrl.u32 %v726_v20, 16  ;;  %v825_v38 = vshll.u32 %v726_v20, 16  ;;  %v711_v4 = vmax.f32 %v671_v21, 0.0 }
 0x131   : > { %1315 = vrot.lane.b32.xlu0 %v5262_v3, %s4912_s16  ;;  %4646 = vmatprep.mubr.msk.bf16.mxu0 %vm1403_vm8, %v5422_v10  ;;  %v834_v40 = vor.u32 %v832_v39, %v831_v22  ;;  %v5450_v13 = vsel %vm5060_vm5, %v831_v22, 0  ;;  %v729_v62 = vpack.c.bf16 %v713_v46, %v712_v41  ;;  %v1022_v41 = vrot.slane %v1020_v16, 1 }
 0x132   : > { %1269 = vrot.lane.b32.xlu1 %v5238_v48, %s4913_s28  ;;  %v824_v42 = vrot.slane %v822_v63, 7  ;;  %v1221_v60 = vrot.slane %v5450_v13, 1  ;;  %v728_v19 = vpack.c.bf16 %v711_v4, %v710_v54 }
 0x133   : > { %v5456_v49 = vsel %vm5060_vm5, 0, %v834_v40  ;;  %v843_v12 = vshrl.u32 %v729_v62, 16  ;;  %v846_v15 = vshll.u32 %v729_v62, 16  ;;  %v1018_v40 = vshrl.u32 %v5302_v57, 16 }
 0x134   : > { %v827_v29 = vor.u32 %v825_v38, %v824_v42  ;;  %v5462_v53 = vsel %vm5060_vm5, %v824_v42, 0  ;;  %v1220_v56 = vrot.slane %v5456_v49, 1  ;;  %v836_v22 = vshrl.u32 %v728_v19, 16 }
 0x135   : > { %1379 = vrot.lane.b32.xlu0 %v5425_v14, %s4913_s28  ;;  %v839_v23 = vshll.u32 %v728_v19, 16  ;;  %v1008_v42 = vshll.u32 %v5306_v58, 16  ;;  %v1023_v4 = vor.u32 %v1022_v41, %v1018_v40  ;;  %v1032_v40 = vshll.u32 %v5359_v44, 16 }
 0x136   : > { %1267 = vrot.lane.b32.xlu1 %v5244_v52, %s4913_s28  ;;  %v5473_v47 = vsel %vm5060_vm5, 0, %v827_v29  ;;  %v5478_v39 = vsel %vm1177_vm6, %v1220_v56, %v1221_v60  ;;  %v838_v38 = vrot.slane %v836_v22, 7  ;;  %v1027_v60 = vrot.slane %v1025_v27, 1 }
 0x137   : > { %v1217_v59 = vrot.slane %v5473_v47, 1  ;;  %v1044_v27 = vshll.u32 %v5351_v32, 16 }
 0x138   : > { %v841_v54 = vor.u32 %v839_v23, %v838_v38  ;;  %v5506_v46 = vsel %vm5060_vm5, %v838_v38, 0  ;;  %v5533_v16 = vsel %vm920_vm7, %v1023_v4, %v1027_v60  ;;  %v1049_v38 = vshll.u32 %v5338_v26, 16 }
 0x139   : > { %1377 = vrot.lane.b32.xlu0 %v5444_v18, %s4913_s28  ;;  %v1224_v29 = vrot.slane %v5506_v46, 1 }
 0x13a   : > { %1238 = vrot.lane.b32.xlu1 %v5259_v0, %s4911_s14  ;;  %v1218_v0 = vrot.slane %v5462_v53, 1  ;;  %v5516_v62 = vsel %vm5060_vm5, 0, %v841_v54  ;;  %v1034_v54 = vrot.slane %v1032_v40, 1 }
 0x13c   : > { %v5483_v20 = vsel %vm1177_vm6, %v1217_v59, %v1218_v0  ;;  %v1013_v0 = vshll.u32 %v5294_v51, 16  ;;  %v1006_v59 = vshrl.u32 %v5306_v58, 16 }
 0x13d   : > { %1351 = vrot.lane.b32.xlu0 %v5302_v57, %s4911_s14  ;;  %4647 = vmatmul.mubr.msk.bf16.gmra.mrb[52].mxu0 %vm1403_vm8, %v5483_v20 }
 0x13e   : > { %1236 = vrot.lane.b32.xlu1 %v5262_v3, %s4911_s14  ;;  %v845_v3 = vrot.slane %v843_v12, 7  ;;  %4650 = vmatprep.mubr.msk.bf16.mxu0 %vm1403_vm8, %v5478_v39  ;;  %v1010_v12 = vrot.slane %v1008_v42, 1  ;;  %v1015_v22 = vrot.slane %v1013_v0, 1  ;;  %v1051_v42 = vrot.slane %v1049_v38, 1  ;;  %v1114_v0 = vpop.permute.xlu0 %1113 }
 0x140   : > { %v848_v30 = vor.u32 %v846_v15, %v845_v3  ;;  %v5494_v63 = vsel %vm5060_vm5, %v845_v3, 0  ;;  %v1223_v15 = vrot.slane %v5516_v62, 1  ;;  %v1011_v3 = vor.u32 %v1010_v12, %v1006_v59 }
 0x141   : > { %1349 = vrot.lane.b32.xlu0 %v5306_v58, %s4911_s14  ;;  %v1305_v21 = vrot.slane %v5494_v63, 1  ;;  %v1068_v59 = vshll.u32 %v5406_v45, 16 }
 0x142   : > { %1125 = vrot.lane.b32.xlu1 %v5425_v14, %s4912_s16  ;;  %v5502_v50 = vsel %vm5060_vm5, 0, %v848_v30  ;;  %v5528_v51 = vsel %vm1177_vm6, %v1223_v15, %v1224_v29  ;;  %v5542_v23 = vsel %vm920_vm7, %v1011_v3, %v1015_v22  ;;  %v1042_v30 = vshrl.u32 %v5351_v32, 16 }
 0x143   : > { %v1304_v56 = vrot.slane %v5502_v50, 1  ;;  %v1066_v3 = vshrl.u32 %v5406_v45, 16  ;;  %v1070_v22 = vrot.slane %v1068_v59, 1 }
 0x145   : > { %1321 = vrot.lane.b32.xlu0 %v5322_v9, %s4912_s16  ;;  %v5523_v19 = vsel %vm1177_vm6, %v1304_v56, %v1305_v21  ;;  %4651 = vmatmul.mubr.msk.bf16.gmra.mrb[56].mxu0 %vm1403_vm8, %v5528_v51  ;;  %v1037_v21 = vshll.u32 %v5345_v37, 16  ;;  %v1227_v37 = vpop.permute.xlu1 %1226 }
 0x146   : > { %1123 = vrot.lane.b32.xlu1 %v5444_v18, %s4912_s16  ;;  %4654 = vmatprep.mubr.msk.bf16.mxu0 %vm1403_vm8, %v5523_v19 }
 0x147   : > { %v1039_v56 = vrot.slane %v1037_v21, 1 }
 0x149   : > { %1319 = vrot.lane.b32.xlu0 %v5319_v7, %s4912_s16 }
 0x14a   : > { %1273 = vrot.lane.b32.xlu1 %v5302_v57, %s4913_s28 }
 0x14d   : > { %1383 = vrot.lane.b32.xlu0 %v5533_v16, %s4913_s28  ;;  %4655 = vmatmul.mubr.msk.bf16.gmra.mrb[60].mxu0 %vm1403_vm8, %v5074_v33 }
 0x14e   : > { %1271 = vrot.lane.b32.xlu1 %v5306_v58, %s4913_s28 }
 0x151   : > { %1381 = vrot.lane.b32.xlu0 %v5542_v23, %s4913_s28 }
 0x152   : > { %1242 = vrot.lane.b32.xlu1 %v5322_v9, %s4911_s14  ;;  %v1046_v9 = vrot.slane %v1044_v27, 1  ;;  %v1405_v27 = vsel %vm1403_vm8, %v5066_v25, %v1114_v0 }
 0x154   : > { %v1047_v41 = vor.u32 %v1046_v9, %v1042_v30 }
 0x155   : > { %1355 = vrot.lane.b32.xlu0 %v5351_v32, %s4911_s14 }
 0x156   : > { %1240 = vrot.lane.b32.xlu1 %v5319_v7, %s4911_s14  ;;  %v1030_v7 = vshrl.u32 %v5359_v44, 16  ;;  %v5573_v26 = vsel %vm920_vm7, %v1047_v41, %v1051_v42  ;;  %v1061_v42 = vshll.u32 %v5401_v43, 16 }
 0x158   : > { %v1035_v29 = vor.u32 %v1034_v54, %v1030_v7  ;;  %v1071_v7 = vor.u32 %v1070_v22, %v1066_v3  ;;  %v1063_v59 = vrot.slane %v1061_v42, 1 }
 0x159   : > { %1353 = vrot.lane.b32.xlu0 %v5359_v44, %s4911_s14 }
 0x15a   : > { %1129 = vrot.lane.b32.xlu1 %v5533_v16, %s4912_s16  ;;  %v5580_v60 = vsel %vm920_vm7, %v1035_v29, %v1039_v56  ;;  %v1438_v29 = vsel %vm1436_vm9, %v1405_v27, %v1227_v37 }
 0x15d   : > { %1325 = vrot.lane.b32.xlu0 %v5369_v55, %s4912_s16 }
 0x15e   : > { %1127 = vrot.lane.b32.xlu1 %v5542_v23, %s4912_s16 }
 0x161   : > { %1323 = vrot.lane.b32.xlu0 %v5377_v61, %s4912_s16 }
 0x162   : > { %1277 = vrot.lane.b32.xlu1 %v5351_v32, %s4913_s28 }
 0x165   : > { %1387 = vrot.lane.b32.xlu0 %v5573_v26, %s4913_s28 }
 0x166   : > { %1275 = vrot.lane.b32.xlu1 %v5359_v44, %s4913_s28 }
 0x169   : > { %1385 = vrot.lane.b32.xlu0 %v5580_v60, %s4913_s28 }
 0x16a   : > { %1246 = vrot.lane.b32.xlu1 %v5369_v55, %s4911_s14  ;;  %v1073_v55 = vshll.u32 %v5395_v28, 16  ;;  %v1054_v28 = vshrl.u32 %v5413_v6, 16 }
 0x16c   : > { %v1075_v9 = vrot.slane %v1073_v55, 1 }
 0x16d   : > { %1359 = vrot.lane.b32.xlu0 %v5406_v45, %s4911_s14 }
 0x16e   : > { %1244 = vrot.lane.b32.xlu1 %v5377_v61, %s4911_s14  ;;  %v1056_v61 = vshll.u32 %v5413_v6, 16 }
 0x170   : > { %v1340_v4 = vpop.permute.xlu1 %1339  ;;  %v1058_v41 = vrot.slane %v1056_v61, 1 }
 0x171   : > { %1357 = vrot.lane.b32.xlu0 %v5413_v6, %s4911_s14 }
 0x172   : > { %1133 = vrot.lane.b32.xlu1 %v5573_v26, %s4912_s16  ;;  %v1059_v43 = vor.u32 %v1058_v41, %v1054_v28  ;;  %v1097_v28 = vshll.u32 %v5450_v13, 16 }
 0x173   : > { %v5595_v12 = vpop.permute.xlu0 %1309 }
 0x174   : > { %v5598_v15 = vpop.permute.xlu1 %1261  ;;  %v5630_v3 = vsel %vm920_vm7, %v1059_v43, %v1063_v59  ;;  %v1085_v43 = vshll.u32 %v5462_v53, 16  ;;  %v1523_v59 = vsel %vm1403_vm8, %v5206_v17, %v5595_v12 }
 0x175   : > { %1329 = vrot.lane.b32.xlu0 %v5422_v10, %s4912_s16 }
 0x176   : > { %1131 = vrot.lane.b32.xlu1 %v5580_v60, %s4912_s16  ;;  %v1087_v17 = vrot.slane %v1085_v43, 1  ;;  %v1299_v43 = vshll.u32 %v5494_v63, 16 }
 0x177   : > { %v1308_v30 = vpop.permute.xlu0 %1307 }
 0x178   : > { %v1520_v38 = vsel %vm1403_vm8, %v5270_v11, %v1308_v30  ;;  %v1260_v40 = vpop.permute.xlu1 %1259  ;;  %v5621_v11 = vsel %vm920_vm7, %v1071_v7, %v1075_v9  ;;  %v1092_v9 = vshll.u32 %v5456_v49, 16 }
 0x179   : > { %1327 = vrot.lane.b32.xlu0 %v5428_v2, %s4912_s16  ;;  %v1567_v21 = vsel %vm1436_vm9, %v1520_v38, %v1340_v4  ;;  %v1471_v55 = vsel %vm1469_vm10, %v1438_v29, %v1260_v40  ;;  %v1090_v40 = vshrl.u32 %v5456_v49, 16  ;;  %v1078_v29 = vshrl.u32 %v5473_v47, 16 }
 0x17a   : > { %1281 = vrot.lane.b32.xlu1 %v5406_v45, %s4913_s28  ;;  %v1094_v7 = vrot.slane %v1092_v9, 1 }
 0x17b   : > { %v1372_v54 = vpop.permute.xlu0 %1371 }
 0x17c   : > { %v5618_v56 = vpop.permute.xlu1 %1230  ;;  %v1599_v0 = vsel %vm1469_vm10, %v1567_v21, %v1372_v54  ;;  %v1099_v54 = vrot.slane %v1097_v28, 1  ;;  %v1095_v13 = vor.u32 %v1094_v7, %v1090_v40 }
 0x17d   : > { %1391 = vrot.lane.b32.xlu0 %v5621_v11, %s4913_s28  ;;  %1877 = vmatprep.mubr.bf16.mxu1 %v1599_v0 }
 0x17e   : > { %1279 = vrot.lane.b32.xlu1 %v5413_v6, %s4913_s28  ;;  %1878 = vmatmul.mubr.bf16.vlgmr.msra.gmra.mrb[0].mxu1 %v1471_v55  ;;  %v5674_v53 = vsel %vm920_vm7, %v1095_v13, %v1099_v54  ;;  %v1104_v54 = vshll.u32 %v5516_v62, 16 }
 0x17f   : > { %v1344_v37 = vpop.permute.xlu0 %1343 }
 0x180   : > { %v1229_v4 = vpop.permute.xlu1 %1228 }
 0x181   : > { %1389 = vrot.lane.b32.xlu0 %v5630_v3, %s4913_s28 }
 0x182   : > { %1250 = vrot.lane.b32.xlu1 %v5422_v10, %s4911_s14 }
 0x183   : > { %v1342_v22 = vpop.permute.xlu0 %1341 }
 0x184   : > { %v1118_v61 = vpop.permute.xlu1 %1117 }
 0x185   : > { %1363 = vrot.lane.b32.xlu0 %v5456_v49, %s4911_s14 }
 0x186   : > { %1248 = vrot.lane.b32.xlu1 %v5428_v2, %s4911_s14  ;;  %v1080_v2 = vshll.u32 %v5473_v47, 16 }
 0x187   : > { %v5640_v27 = vpop.permute.xlu0 %1313 }
 0x188   : > { %v1116_v30 = vpop.permute.xlu1 %1115  ;;  %v1082_v0 = vrot.slane %v1080_v2, 1 }
 0x189   : > { %1361 = vrot.lane.b32.xlu0 %v5473_v47, %s4911_s14  ;;  %v1407_v41 = vsel %vm1403_vm8, %v5163_v35, %v1116_v30  ;;  %v1569_v30 = vsel %vm1436_vm9, %v1523_v59, %v1342_v22 }
 0x18a   : > { %1137 = vrot.lane.b32.xlu1 %v5621_v11, %s4912_s16  ;;  %v1440_v35 = vsel %vm1436_vm9, %v1407_v41, %v1229_v4  ;;  %v1083_v7 = vor.u32 %v1082_v0, %v1078_v29  ;;  %v1409_v41 = vsel %vm1403_vm8, %v5158_v31, %v1118_v61  ;;  %v1106_v29 = vrot.slane %v1104_v54, 1 }
 0x18b   : > { %v1312_v10 = vpop.permute.xlu0 %1311  ;;  %v1109_v0 = vshll.u32 %v5506_v46, 16 }
 0x18c   : > { %v5648_v38 = vpop.permute.xlu1 %1265  ;;  %v1526_v55 = vsel %vm1403_vm8, %v5313_v1, %v1312_v10  ;;  %v1474_v1 = vsel %vm1469_vm10, %v1440_v35, %v5598_v15  ;;  %v5686_v2 = vsel %vm920_vm7, %v1083_v7, %v1087_v17 }
 0x18d   : > { %1333 = vrot.lane.b32.xlu0 %v5478_v39, %s4912_s16  ;;  %v1571_v12 = vsel %vm1436_vm9, %v1526_v55, %v1344_v37  ;;  %v1111_v35 = vrot.slane %v1109_v0, 1 }
 0x18e   : > { %1135 = vrot.lane.b32.xlu1 %v5630_v3, %s4912_s16 }
 0x18f   : > { %v1376_v42 = vpop.permute.xlu0 %1375 }
 0x190   : > { %v1264_v21 = vpop.permute.xlu1 %1263  ;;  %v1605_v4 = vsel %vm1469_vm10, %v1571_v12, %v1376_v42  ;;  %v1442_v42 = vsel %vm1436_vm9, %v1409_v41, %v5618_v56  ;;  %v1294_v56 = vshll.u32 %v5502_v50, 16  ;;  %v1529_v12 = vsel %vm1403_vm8, %v5282_v34, %v5640_v27 }
 0x191   : > { %1331 = vrot.lane.b32.xlu0 %v5483_v20, %s4912_s16  ;;  %v1477_v13 = vsel %vm1469_vm10, %v1442_v42, %v1264_v21 }
 0x192   : > { %1285 = vrot.lane.b32.xlu1 %v5456_v49, %s4913_s28 }
 0x193   : > { %v1374_v9 = vpop.permute.xlu0 %1373 }
 0x194   : > { %v5671_v28 = vpop.permute.xlu1 %1234  ;;  %v1602_v40 = vsel %vm1469_vm10, %v1569_v30, %v1374_v9  ;;  %v1292_v30 = vshrl.u32 %v5502_v50, 16  ;;  %v1296_v9 = vrot.slane %v1294_v56, 1 }
 0x195   : > { %1395 = vrot.lane.b32.xlu0 %v5674_v53, %s4913_s28  ;;  %1885 = vmatprep.mubr.bf16.mxu1 %v1602_v40 }
 0x196   : > { %1283 = vrot.lane.b32.xlu1 %v5473_v47, %s4913_s28  ;;  %1886 = vmatmul.mubr.bf16.gmra.mrb[4].mxu1 %v1474_v1  ;;  %v1297_v63 = vor.u32 %v1296_v9, %v1292_v30  ;;  %v1301_v1 = vrot.slane %v1299_v43, 1 }
 0x197   : > { %v1348_v22 = vpop.permute.xlu0 %1347  ;;  %1893 = vmatprep.mubr.bf16.mxu1 %v1605_v4 }
 0x198   : > { %v1233_v10 = vpop.permute.xlu1 %1232  ;;  %v5734_v54 = vsel %vm920_vm7, %v1297_v63, %v1301_v1 }
 0x199   : > { %1393 = vrot.lane.b32.xlu0 %v5686_v2, %s4913_s28 }
 0x19a   : > { %1252 = vrot.lane.b32.xlu1 %v5483_v20, %s4911_s14  ;;  %v1102_v20 = vshrl.u32 %v5516_v62, 16 }
 0x19b   : > { %v1346_v15 = vpop.permute.xlu0 %1345 }
 0x19c   : > { %v1122_v37 = vpop.permute.xlu1 %1121  ;;  %v1107_v55 = vor.u32 %v1106_v29, %v1102_v20  ;;  %v1573_v4 = vsel %vm1436_vm9, %v1529_v12, %v1346_v15 }
 0x19d   : > { %1367 = vrot.lane.b32.xlu0 %v5502_v50, %s4911_s14 }
 0x19e   : > { %1141 = vrot.lane.b32.xlu1 %v5674_v53, %s4912_s16  ;;  %1894 = vmatmul.mubr.bf16.gmra.mrb[8].mxu1 %v1477_v13  ;;  %v5720_v17 = vsel %vm920_vm7, %v1107_v55, %v1111_v35 }
 0x19f   : > { %v5702_v31 = vpop.permute.xlu0 %1317 }
 0x1a0   : > { %v1120_v61 = vpop.permute.xlu1 %1119 }
 0x1a1   : > { %1365 = vrot.lane.b32.xlu0 %v5516_v62, %s4911_s14  ;;  %v1411_v46 = vsel %vm1403_vm8, %v5198_v8, %v1120_v61  ;;  %v1413_v61 = vsel %vm1403_vm8, %v5192_v5, %v1122_v37 }
 0x1a2   : > { %1139 = vrot.lane.b32.xlu1 %v5686_v2, %s4912_s16  ;;  %v1444_v8 = vsel %vm1436_vm9, %v1411_v46, %v1233_v10 }
 0x1a3   : > { %v1316_v21 = vpop.permute.xlu0 %1315  ;;  %v1480_v34 = vsel %vm1469_vm10, %v1444_v8, %v5648_v38 }
 0x1a4   : > { %v1270_v59 = vpop.permute.xlu1 %1269 }
 0x1a5   : > { %1335 = vrot.lane.b32.xlu0 %v5528_v51, %s4912_s16 }
 0x1a6   : > { %1254 = vrot.lane.b32.xlu1 %v5478_v39, %s4911_s14  ;;  %v1532_v39 = vsel %vm1403_vm8, %v5444_v18, %v1316_v21 }
 0x1a7   : > { %v1380_v40 = vpop.permute.xlu0 %1379  ;;  %v1575_v18 = vsel %vm1436_vm9, %v1532_v39, %v1348_v22 }
 0x1a8   : > { %v1268_v7 = vpop.permute.xlu1 %1267  ;;  %v1611_v27 = vsel %vm1469_vm10, %v1575_v18, %v1380_v40 }
 0x1a9   : > { %1397 = vrot.lane.b32.xlu0 %v5720_v17, %s4913_s28 }
 0x1aa   : > { %1287 = vrot.lane.b32.xlu1 %v5516_v62, %s4913_s28 }
 0x1ab   : > { %v1378_v41 = vpop.permute.xlu0 %1377 }
 0x1ac   : > { %v1239_v42 = vpop.permute.xlu1 %1238  ;;  %v1608_v13 = vsel %vm1469_vm10, %v1573_v4, %v1378_v41 }
 0x1ad   : > { %1399 = vrot.lane.b32.xlu0 %v5734_v54, %s4913_s28  ;;  %1901 = vmatprep.mubr.bf16.mxu1 %v1608_v13 }
 0x1ae   : > { %1256 = vrot.lane.b32.xlu1 %v5528_v51, %s4911_s14  ;;  %1902 = vmatmul.mubr.bf16.gmra.mrb[12].mxu1 %v1480_v34  ;;  %v1446_v51 = vsel %vm1436_vm9, %v1413_v61, %v5671_v28 }
 0x1af   : > { %v1352_v10 = vpop.permute.xlu0 %1351  ;;  %1909 = vmatprep.mubr.bf16.mxu1 %v1611_v27  ;;  %v1483_v20 = vsel %vm1469_vm10, %v1446_v51, %v1268_v7 }
 0x1b0   : > { %v1237_v15 = vpop.permute.xlu1 %1236 }
 0x1b1   : > { %1337 = vrot.lane.b32.xlu0 %v5523_v19, %s4912_s16 }
 0x1b2   : > { %1143 = vrot.lane.b32.xlu1 %v5720_v17, %s4912_s16  ;;  %s6875_s16 = scalar_lea.hbm %s6926_s9, %s4181_s25 }
 0x1b3   : > { %v1350_v38 = vpop.permute.xlu0 %1349 }
 0x1b4   : > { %v1126_v22 = vpop.permute.xlu1 %1125 }
 0x1b5   : > { %1369 = vrot.lane.b32.xlu0 %v5066_v25, %s4911_s14 }
 0x1b6   : > { %1289 = vrot.lane.b32.xlu1 %v5502_v50, %s4913_s28  ;;  %1910 = vmatmul.mubr.bf16.gmra.mrb[16].mxu1 %v1483_v20  ;;  %v1535_v50 = vsel %vm1403_vm8, %v5425_v14, %v5702_v31 }
 0x1b7   : > { %v1322_v5 = vpop.permute.xlu0 %1321  ;;  %v1577_v55 = vsel %vm1436_vm9, %v1535_v50, %v1350_v38 }
 0x1b8   : > { %v1124_v37 = vpop.permute.xlu1 %1123  ;;  %v1541_v34 = vsel %vm1403_vm8, %v5533_v16, %v1322_v5 }
 0x1b9   : > { %1401 = vrot.lane.b32.xlu0 %v5079_v36, %s4913_s28  ;;  %v1415_v28 = vsel %vm1403_vm8, %v5244_v52, %v1124_v37 }
 0x1ba   : > { %2571 = vrot.lane.b32.xlu1 %v5079_v36, %s4911_s14  ;;  %v1448_v43 = vsel %vm1436_vm9, %v1415_v28, %v1237_v15 }
 0x1bb   : > { %v1320_v19 = vpop.permute.xlu0 %1319  ;;  %v1486_v52 = vsel %vm1469_vm10, %v1448_v43, %v1270_v59 }
 0x1bc   : > { %v1274_v29 = vpop.permute.xlu1 %1273  ;;  %v1538_v21 = vsel %vm1403_vm8, %v5542_v23, %v1320_v19  ;;  %v1417_v23 = vsel %vm1403_vm8, %v5238_v48, %v1126_v22 }
 0x1bd   : > { %v1579_v9 = vsel %vm1436_vm9, %v1538_v21, %v1352_v10  ;;  %v1450_v63 = vsel %vm1436_vm9, %v1417_v23, %v1239_v42 }
 0x1bf   : > { %v1384_v0 = vpop.permute.xlu0 %1383 }
 0x1c0   : > { %v1272_v56 = vpop.permute.xlu1 %1271  ;;  %v1617_v46 = vsel %vm1469_vm10, %v1579_v9, %v1384_v0 }
 0x1c1   : > { %v1489_v1 = vsel %vm1469_vm10, %v1450_v63, %v1272_v56 }
 0x1c3   : > { %v1382_v35 = vpop.permute.xlu0 %1381 }
 0x1c4   : > { %v1243_v36 = vpop.permute.xlu1 %1242  ;;  %v1614_v30 = vsel %vm1469_vm10, %v1577_v55, %v1382_v35 }
 0x1c5   : > { %1917 = vmatprep.mubr.bf16.mxu1 %v1614_v30 }
 0x1c6   : > { %1918 = vmatmul.mubr.bf16.gmra.mrb[20].mxu1 %v1486_v52 }
 0x1c7   : > { %v1356_v14 = vpop.permute.xlu0 %1355  ;;  %1925 = vmatprep.mubr.bf16.mxu1 %v1617_v46 }
 0x1c8   : > { %v1241_v31 = vpop.permute.xlu1 %1240 }
 0x1cb   : > { %v1354_v40 = vpop.permute.xlu0 %1353 }
 0x1cc   : > { %v1130_v7 = vpop.permute.xlu1 %1129  ;;  %v1581_v18 = vsel %vm1436_vm9, %v1541_v34, %v1354_v40 }
 0x1cd   : > { %v1421_v37 = vsel %vm1403_vm8, %v5302_v57, %v1130_v7 }
 0x1ce   : > { %1926 = vmatmul.mubr.bf16.gmra.mrb[24].mxu1 %v1489_v1 }
 0x1cf   : > { %v1326_v12 = vpop.permute.xlu0 %1325 }
 0x1d0   : > { %v1128_v59 = vpop.permute.xlu1 %1127  ;;  %v1547_v46 = vsel %vm1403_vm8, %v5573_v26, %v1326_v12 }
 0x1d1   : > { %v1419_v4 = vsel %vm1403_vm8, %v5306_v58, %v1128_v59 }
 0x1d2   : > { %v1452_v42 = vsel %vm1436_vm9, %v1419_v4, %v1241_v31 }
 0x1d3   : > { %v1324_v39 = vpop.permute.xlu0 %1323  ;;  %v1492_v58 = vsel %vm1469_vm10, %v1452_v42, %v1274_v29  ;;  %v1454_v29 = vsel %vm1436_vm9, %v1421_v37, %v1243_v36 }
 0x1d4   : > { %v1278_v8 = vpop.permute.xlu1 %1277  ;;  %v1544_v48 = vsel %vm1403_vm8, %v5580_v60, %v1324_v39 }
 0x1d5   : > { %v1583_v38 = vsel %vm1436_vm9, %v1544_v48, %v1356_v14 }
 0x1d7   : > { %v1388_v41 = vpop.permute.xlu0 %1387 }
 0x1d8   : > { %v1276_v13 = vpop.permute.xlu1 %1275  ;;  %v1623_v60 = vsel %vm1469_vm10, %v1583_v38, %v1388_v41 }
 0x1d9   : > { %v1495_v0 = vsel %vm1469_vm10, %v1454_v29, %v1276_v13 }
 0x1db   : > { %v1386_v27 = vpop.permute.xlu0 %1385 }
 0x1dc   : > { %v1247_v10 = vpop.permute.xlu1 %1246  ;;  %v1620_v15 = vsel %vm1469_vm10, %v1581_v18, %v1386_v27 }
 0x1dd   : > { %1933 = vmatprep.mubr.bf16.mxu1 %v1620_v15  ;;  %v5788_v61 = vpop.f32.mrb[32].mxu0 }
 0x1de   : > { %1934 = vmatmul.mubr.bf16.gmra.mrb[28].mxu1 %v1492_v58  ;;  %v5792_v16 = vpop.f32.mrb[33].mxu0 }
 0x1df   : > { %v5795_v22 = vpop.f32.mrb[34].mxu0  ;;  %v1360_v51 = vpop.permute.xlu0 %1359  ;;  %1941 = vmatprep.mubr.bf16.mxu1 %v1623_v60 }
 0x1e0   : > { %v5797_v20 = vpop.f32.mrb[35].mxu0  ;;  %v1245_v5 = vpop.permute.xlu1 %1244 }
 0x1e3   : > { %v1358_v19 = vpop.permute.xlu0 %1357 }
 0x1e4   : > { %v1134_v28 = vpop.permute.xlu1 %1133  ;;  %v1585_v23 = vsel %vm1436_vm9, %v1547_v46, %v1358_v19 }
 0x1e5   : > { %v1425_v13 = vsel %vm1403_vm8, %v5351_v32, %v1134_v28 }
 0x1e6   : > { %1942 = vmatmul.mubr.bf16.gmra.mrb[32].mxu1 %v1495_v0  ;;  %v5803_v50 = vpop.f32.mrb[36].mxu0 }
 0x1e7   : > { %v1330_v56 = vpop.permute.xlu0 %1329  ;;  %v5805_v43 = vpop.f32.mrb[37].mxu0 }
 0x1e8   : > { %v1132_v21 = vpop.permute.xlu1 %1131  ;;  %v5807_v55 = vpop.f32.mrb[38].mxu0  ;;  %v1553_v29 = vsel %vm1403_vm8, %v5621_v11, %v1330_v56 }
 0x1e9   : > { %v5809_v35 = vpop.f32.mrb[39].mxu0  ;;  %v1423_v57 = vsel %vm1403_vm8, %v5359_v44, %v1132_v21 }
 0x1ea   : > { %v1456_v31 = vsel %vm1436_vm9, %v1423_v57, %v1245_v5 }
 0x1eb   : > { %v1328_v30 = vpop.permute.xlu0 %1327  ;;  %v1498_v44 = vsel %vm1469_vm10, %v1456_v31, %v1278_v8  ;;  %v1458_v8 = vsel %vm1436_vm9, %v1425_v13, %v1247_v10 }
 0x1ec   : > { %v1282_v52 = vpop.permute.xlu1 %1281  ;;  %v1550_v14 = vsel %vm1403_vm8, %v5630_v3, %v1328_v30 }
 0x1ed   : > { %v1587_v59 = vsel %vm1436_vm9, %v1550_v14, %v1360_v51 }
 0x1ef   : > { %v1392_v9 = vpop.permute.xlu0 %1391 }
 0x1f0   : > { %v1280_v36 = vpop.permute.xlu1 %1279  ;;  %v1629_v26 = vsel %vm1469_vm10, %v1587_v59, %v1392_v9 }
 0x1f1   : > { %v5820_v1 = vpop.f32.mrb[40].mxu0  ;;  %v1501_v42 = vsel %vm1469_vm10, %v1458_v8, %v1280_v36 }
 0x1f2   : > { %v5824_v39 = vpop.f32.mrb[41].mxu0 }
 0x1f3   : > { %v1390_v40 = vpop.permute.xlu0 %1389  ;;  %v5827_v3 = vpop.f32.mrb[42].mxu0 }
 0x1f4   : > { %v1251_v7 = vpop.permute.xlu1 %1250  ;;  %v1626_v63 = vsel %vm1469_vm10, %v1585_v23, %v1390_v40  ;;  %v5829_v4 = vpop.f32.mrb[43].mxu0 }
 0x1f5   : > { %1949 = vmatprep.mubr.bf16.mxu1 %v1626_v63 }
 0x1f6   : > { %1950 = vmatmul.mubr.bf16.gmra.mrb[36].mxu1 %v1498_v44 }
 0x1f7   : > { %v1364_v12 = vpop.permute.xlu0 %1363  ;;  %1957 = vmatprep.mubr.bf16.mxu1 %v1629_v26 }
 0x1f8   : > { %v1249_v41 = vpop.permute.xlu1 %1248 }
 0x1fb   : > { %v1362_v34 = vpop.permute.xlu0 %1361  ;;  %v5835_v18 = vpop.f32.mrb[44].mxu0 }
 0x1fc   : > { %v1138_v48 = vpop.permute.xlu1 %1137  ;;  %v5837_v15 = vpop.f32.mrb[45].mxu0  ;;  %v1589_v57 = vsel %vm1436_vm9, %v1553_v29, %v1362_v34 }
 0x1fd   : > { %v5839_v38 = vpop.f32.mrb[46].mxu0  ;;  %v1429_v23 = vsel %vm1403_vm8, %v5406_v45, %v1138_v48 }
 0x1fe   : > { %1958 = vmatmul.mubr.bf16.gmra.mrb[40].mxu1 %v1501_v42  ;;  %v5841_v60 = vpop.f32.mrb[47].mxu0  ;;  %v1462_v44 = vsel %vm1436_vm9, %v1429_v23, %v1251_v7 }
 0x1ff   : > { %v1334_v27 = vpop.permute.xlu0 %1333 }
 0x200   : > { %v1136_v58 = vpop.permute.xlu1 %1135  ;;  %v1559_v45 = vsel %vm1403_vm8, %v5674_v53, %v1334_v27 }
 0x201   : > { %v1427_v32 = vsel %vm1403_vm8, %v5413_v6, %v1136_v58 }
 0x202   : > { %v1460_v21 = vsel %vm1436_vm9, %v1427_v32, %v1249_v41 }
 0x203   : > { %v1332_v51 = vpop.permute.xlu0 %1331  ;;  %v5845_v19 = vpop.f32.mrb[48].mxu0  ;;  %v1504_v14 = vsel %vm1469_vm10, %v1460_v21, %v1282_v52 }
 0x204   : > { %v1286_v5 = vpop.permute.xlu1 %1285  ;;  %v5847_v28 = vpop.f32.mrb[49].mxu0  ;;  %v1556_v0 = vsel %vm1403_vm8, %v5686_v2, %v1332_v51 }
 0x205   : > { %v5854_v30 = vpop.f32.mrb[50].mxu0  ;;  %v1591_v11 = vsel %vm1436_vm9, %v1556_v0, %v1364_v12 }
 0x206   : > { %v5857_v6 = vpop.f32.mrb[51].mxu0 }
 0x207   : > { %v1396_v37 = vpop.permute.xlu0 %1395 }
 0x208   : > { %v1284_v10 = vpop.permute.xlu1 %1283  ;;  %v1635_v2 = vsel %vm1469_vm10, %v1591_v11, %v1396_v37 }
 0x209   : > { %v1507_v59 = vsel %vm1469_vm10, %v1462_v44, %v1284_v10 }
 0x20b   : > { %v1394_v9 = vpop.permute.xlu0 %1393 }
 0x20c   : > { %v1253_v36 = vpop.permute.xlu1 %1252  ;;  %v1632_v46 = vsel %vm1469_vm10, %v1589_v57, %v1394_v9 }
 0x20d   : > { %1965 = vmatprep.mubr.bf16.mxu1 %v1632_v46 }
 0x20e   : > { %1966 = vmatmul.mubr.bf16.gmra.mrb[44].mxu1 %v1504_v14 }
 0x20f   : > { %v1368_v56 = vpop.permute.xlu0 %1367  ;;  %1973 = vmatprep.mubr.bf16.mxu1 %v1635_v2 }
 0x210   : > { %v1142_v31 = vpop.permute.xlu1 %1141  ;;  %v5867_v26 = vpop.f32.mrb[52].mxu0 }
 0x211   : > { %v5869_v52 = vpop.f32.mrb[53].mxu0  ;;  %v1433_v57 = vsel %vm1403_vm8, %v5456_v49, %v1142_v31 }
 0x212   : > { %v5873_v13 = vpop.f32.mrb[54].mxu0 }
 0x213   : > { %v1366_v40 = vpop.permute.xlu0 %1365  ;;  %v5875_v8 = vpop.f32.mrb[55].mxu0 }
 0x214   : > { %v1140_v63 = vpop.permute.xlu1 %1139  ;;  %v1593_v48 = vsel %vm1436_vm9, %v1559_v45, %v1366_v40 }
 0x215   : > { %v1431_v12 = vsel %vm1403_vm8, %v5473_v47, %v1140_v63 }
 0x216   : > { %1974 = vmatmul.mubr.bf16.gmra.mrb[48].mxu1 %v1507_v59  ;;  %v1464_v7 = vsel %vm1436_vm9, %v1431_v12, %v1253_v36 }
 0x217   : > { %v1336_v41 = vpop.permute.xlu0 %1335  ;;  %v1510_v32 = vsel %vm1469_vm10, %v1464_v7, %v1286_v5 }
 0x218   : > { %v1255_v34 = vpop.permute.xlu1 %1254  ;;  %v1562_v58 = vsel %vm1403_vm8, %v5720_v17, %v1336_v41  ;;  %v5885_v37 = vpop.f32.mrb[56].mxu0 }
 0x219   : > { %v1595_v53 = vsel %vm1436_vm9, %v1562_v58, %v1368_v56  ;;  %v5888_v27 = vpop.f32.mrb[57].mxu0  ;;  %v1466_v9 = vsel %vm1436_vm9, %v1433_v57, %v1255_v34 }
 0x21a   : > { %v5891_v21 = vpop.f32.mrb[58].mxu0 }
 0x21b   : > { %v1398_v42 = vpop.permute.xlu0 %1397  ;;  %v5893_v17 = vpop.f32.mrb[59].mxu0 }
 0x21c   : > { %v1288_v51 = vpop.permute.xlu1 %1287  ;;  %v1638_v47 = vsel %vm1469_vm10, %v1593_v48, %v1398_v42  ;;  %v4801_v48 = vld [vmem:[%s6922_s5] sm:$0xff]  }
 0x21d   : > { %1981 = vmatprep.mubr.bf16.mxu1 %v1638_v47  ;;  %v1513_v46 = vsel %vm1469_vm10, %v1466_v9, %v1288_v51  ;;  %v4802_v51 = vld [vmem:[%s6922_s5 + $0x48] sm:$0xff]  }
 0x21e   : > { %1982 = vmatmul.mubr.bf16.gmra.mrb[52].mxu1 %v1510_v32  ;;  %v4803_v32 = vld [vmem:[%s6922_s5 + $0x8] sm:$0xff]  }
 0x21f   : > { %v1400_v10 = vpop.permute.xlu0 %1399 }
 0x220   : > { %v1257_v29 = vpop.permute.xlu1 %1256  ;;  %v1641_v0 = vsel %vm1469_vm10, %v1595_v53, %v1400_v10  ;;  %v4804_v10 = vld [vmem:[%s6922_s5 + $0x50] sm:$0xff]  }
 0x221   : > { %1989 = vmatprep.mubr.bf16.mxu1 %v1641_v0  ;;  %v4805_v0 = vld [vmem:[%s6922_s5 + $0x10] sm:$0xff]  }
 0x223   : > { %v1338_v5 = vpop.permute.xlu0 %1337 }
 0x224   : > { %v1144_v36 = vpop.permute.xlu1 %1143  ;;  %v1565_v2 = vsel %vm1403_vm8, %v5734_v54, %v1338_v5  ;;  %v5913_v54 = vld [vmem:[%s6921_s4] ss:$0 sm:$0xff] }
 0x225   : > { %v1435_v11 = vsel %vm1403_vm8, %v5516_v62, %v1144_v36  ;;  %v4800_v62 = vld [vmem:[%s6922_s5 + $0x40] sm:$0xff]  }
 0x226   : > { %1990 = vmatmul.mubr.bf16.gmra.mrb[56].mxu1 %v1513_v46  ;;  %v1468_v31 = vsel %vm1436_vm9, %v1435_v11, %v1257_v29  ;;  %4333 = vmatprep.subr.bf16.mxu0 %v4800_v62  ;;  %v4806_v36 = vld [vmem:[%s6922_s5 + $0xc0] sm:$0xff]  }
 0x227   : > { %v1370_v14 = vpop.permute.xlu0 %1369  ;;  %4334 = vmatpush3.bf16.msra.mxu0 %v4801_v48  ;;  %v4807_v46 = vld [vmem:[%s6922_s5 + $0x80] sm:$0xff]   ;;  %4445 = vmatprep.subr.bf16.mxu1 %v4806_v36 }
 0x228   : > { %v1290_v56 = vpop.permute.xlu1 %1289  ;;  %v1597_v23 = vsel %vm1436_vm9, %v1565_v2, %v1370_v14  ;;  %4335 = vmatprep.subr.bf16.mxu0 %v4802_v51  ;;  %v4809_v14 = vld [vmem:[%s6922_s5 + $0x18] sm:$0xff]   ;;  %v4810_v11 = vld [vmem:[%s6922_s5 + $0x60] sm:$0xff]   ;;  %4446 = vmatpush3.bf16.msra.mxu1 %v4807_v46 }
 0x229   : > { %v1516_v63 = vsel %vm1469_vm10, %v1468_v31, %v1290_v56 }
 0x22b   : > { %v1402_v40 = vpop.permute.xlu0 %1401  ;;  %4336 = vmatpush3.bf16.msra.mxu0 %v4803_v32 }
 0x22c   : > { %v1644_v49 = vsel %vm1469_vm10, %v1597_v23, %v1402_v40  ;;  %4337 = vmatprep.subr.bf16.mxu0 %v4804_v10  ;;  %v4811_v23 = vld [vmem:[%s6922_s5 + $0x20] sm:$0xff]   ;;  %v4812_v40 = vld [vmem:[%s6922_s5 + $0x68] sm:$0xff]   ;;  %v4815_v10 = vld [vmem:[%s6922_s5 + $0x30] sm:$0xff]  }
 0x22d   : > { %1997 = vmatprep.mubr.bf16.mxu1 %v1644_v49 }
 0x22e   : > { %1998 = vmatmul.mubr.bf16.gmra.mrb[60].mxu1 %v1516_v63 }
 0x22f   : > { %4338 = vmatpush3.bf16.msra.mxu0 %v4805_v0 }
 0x251   : > { %v4219_v44 = vpop.f32.mrb[0].mxu1 }
 0x252   : > { %v4220_v59 = vpop.f32.mrb[1].mxu1 }
 0x253   : > { %v4221_v12 = vadd.f32 %v4220_v59, %v4219_v44  ;;  %v4222_v41 = vpop.f32.mrb[2].mxu1  ;;  %v4813_v44 = vld [vmem:[%s6922_s5 + $0x28] sm:$0xff]  }
 0x254   : > { %v4223_v34 = vpop.f32.mrb[3].mxu1 }
 0x255   : > { %v1880_v45 = vadd.f32 %v4221_v12, %v5913_v54  ;;  %v4224_v7 = vadd.f32 %v4223_v34, %v4222_v41  ;;  %v4814_v41 = vld [vmem:[%s6922_s5 + $0x70] sm:$0xff]  }
 0x257   : > { %v2041_v42 = vadd.f32 %v5792_v16, %v1880_v45  ;;  %v1883_v58 = vadd.f32 %v4224_v7, %v5913_v54 }
 0x259   : > { %v2044_v47 = vadd.f32 %v5797_v20, %v1883_v58  ;;  %v2167_v53 = vmax.f32 %v2041_v42, 0.0  ;;  %v4808_v20 = vld [vmem:[%s6922_s5 + $0x58] sm:$0xff]  }
 0x25a   : > { %4339 = vmatprep.subr.bf16.mxu0 %v4808_v20  ;;  %v4816_v20 = vld [vmem:[%s6922_s5 + $0xc8] sm:$0xff]  }
 0x25b   : > { %v2168_v16 = vmax.f32 %v2044_v47, 0.0  ;;  %4340 = vmatpush3.bf16.msra.mxu0 %v4809_v14  ;;  %4447 = vmatprep.subr.bf16.mxu1 %v4816_v20 }
 0x25c   : > { %4341 = vmatprep.subr.bf16.mxu0 %v4810_v11 }
 0x25d   : > { %v2199_v29 = vpack.c.bf16 %v2168_v16, %v2167_v53 }
 0x25f   : > { %v2216_v57 = vshrl.u32 %v2199_v29, 16  ;;  %v2219_v9 = vshll.u32 %v2199_v29, 16  ;;  %4342 = vmatpush3.bf16.msra.mxu0 %v4811_v23  ;;  %v4818_v29 = vld [vmem:[%s6922_s5 + $0x78] sm:$0xff]  }
 0x260   : > { %4343 = vmatprep.subr.bf16.mxu0 %v4812_v40 }
 0x261   : > { %v2218_v5 = vrot.slane %v2216_v57, 7 }
 0x263   : > { %v2221_v2 = vor.u32 %v2219_v9, %v2218_v5  ;;  %v5951_v56 = vsel %vm5060_vm5, %v2218_v5, 0  ;;  %4344 = vmatpush3.bf16.msra.mxu0 %v4813_v44  ;;  %v4817_v5 = vld [vmem:[%s6922_s5 + $0x88] sm:$0xff]  }
 0x264   : > { %v2399_v63 = vshll.u32 %v5951_v56, 16  ;;  %4345 = vmatprep.subr.bf16.mxu0 %v4814_v41  ;;  %4448 = vmatpush3.bf16.msra.mxu1 %v4817_v5 }
 0x265   : > { %v5961_v49 = vsel %vm5060_vm5, 0, %v2221_v2 }
 0x266   : > { %2679 = vrot.lane.b32.xlu0 %v5961_v49, %s4911_s14  ;;  %v2394_v31 = vshll.u32 %v5961_v49, 16  ;;  %v2392_v62 = vshrl.u32 %v5961_v49, 16  ;;  %v2401_v7 = vrot.slane %v2399_v63, 1 }
 0x267   : > { %4346 = vmatpush3.bf16.msra.mxu0 %v4815_v10 }
 0x268   : > { %v2396_v59 = vrot.slane %v2394_v31, 1  ;;  %4347 = vmatprep.subr.bf16.mxu0 %v4818_v29  ;;  %v4820_v29 = vld [vmem:[%s6922_s5 + $0xd0] sm:$0xff]  }
 0x269   : > { %v4225_v12 = vpop.f32.mrb[4].mxu1  ;;  %4449 = vmatprep.subr.bf16.mxu1 %v4820_v29 }
 0x26a   : > { %v4226_v34 = vpop.f32.mrb[5].mxu1  ;;  %v2397_v45 = vor.u32 %v2396_v59, %v2392_v62 }
 0x26b   : > { %v4227_v48 = vadd.f32 %v4226_v34, %v4225_v12  ;;  %v4228_v42 = vpop.f32.mrb[6].mxu1 }
 0x26c   : > { %v4229_v58 = vpop.f32.mrb[7].mxu1  ;;  %v5975_v51 = vsel %vm920_vm7, %v2397_v45, %v2401_v7 }
 0x26d   : > { %v1888_v47 = vadd.f32 %v4227_v48, %v5913_v54  ;;  %v4230_v32 = vadd.f32 %v4229_v58, %v4228_v42  ;;  %2573 = vrot.lane.b32.xlu1 %v5975_v51, %s4911_s14 }
 0x26f   : > { %v2049_v53 = vadd.f32 %v5788_v61, %v1888_v47  ;;  %v1891_v16 = vadd.f32 %v4230_v32, %v5913_v54  ;;  %v4819_v61 = vld [vmem:[%s6922_s5 + $0x38] sm:$0xff]  }
 0x270   : > { %4348 = vmatpush3.bf16.msra.mxu0 %v4819_v61 }
 0x271   : > { %v2052_v0 = vadd.f32 %v5795_v22, %v1891_v16  ;;  %v4231_v57 = vpop.f32.mrb[8].mxu1  ;;  %v2169_v36 = vmax.f32 %v2049_v53, 0.0 }
 0x272   : > { %v4232_v9 = vpop.f32.mrb[9].mxu1 }
 0x273   : > { %v2170_v46 = vmax.f32 %v2052_v0, 0.0  ;;  %v4233_v14 = vadd.f32 %v4232_v9, %v4231_v57  ;;  %v4234_v11 = vpop.f32.mrb[10].mxu1  ;;  %v4821_v0 = vld [vmem:[%s6922_s5 + $0x90] sm:$0xff]   ;;  %v6021_v57 = vpop.f32.mrb[60].mxu0 }
 0x274   : > { %v4235_v22 = vpop.f32.mrb[11].mxu1  ;;  %v6023_v9 = vpop.f32.mrb[61].mxu0  ;;  %4450 = vmatpush3.bf16.msra.mxu1 %v4821_v0 }
 0x275   : > { %v2200_v2 = vpack.c.bf16 %v2170_v46, %v2169_v36  ;;  %v1896_v23 = vadd.f32 %v4233_v14, %v5913_v54  ;;  %v4236_v40 = vadd.f32 %v4235_v22, %v4234_v11  ;;  %v6029_v22 = vpop.f32.mrb[62].mxu0 }
 0x277   : > { %v2223_v31 = vshrl.u32 %v2200_v2, 16  ;;  %v2057_v63 = vadd.f32 %v5805_v43, %v1896_v23  ;;  %v1899_v44 = vadd.f32 %v4236_v40, %v5913_v54  ;;  %v2226_v59 = vshll.u32 %v2200_v2, 16  ;;  %v6034_v40 = vpop.f32.mrb[63].mxu0 }
 0x279   : > { %v2225_v62 = vrot.slane %v2223_v31, 7  ;;  %v2060_v12 = vadd.f32 %v5809_v35, %v1899_v44  ;;  %v2171_v41 = vmax.f32 %v2057_v63, 0.0 }
 0x27b   : > { %v2172_v34 = vmax.f32 %v2060_v12, 0.0  ;;  %v2228_v45 = vor.u32 %v2226_v59, %v2225_v62  ;;  %v6004_v7 = vsel %vm5060_vm5, %v2225_v62, 0 }
 0x27c   : > { %v2411_v58 = vshll.u32 %v6004_v7, 16 }
 0x27d   : > { %v2201_v48 = vpack.c.bf16 %v2172_v34, %v2171_v41  ;;  %v6008_v42 = vsel %vm5060_vm5, 0, %v2228_v45 }
 0x27e   : > { %2681 = vrot.lane.b32.xlu0 %v6008_v42, %s4911_s14  ;;  %v2406_v43 = vshll.u32 %v6008_v42, 16  ;;  %v2404_v47 = vshrl.u32 %v6008_v42, 16  ;;  %v2413_v61 = vrot.slane %v2411_v58, 1 }
 0x27f   : > { %v2230_v35 = vshrl.u32 %v2201_v48, 16  ;;  %v2233_v53 = vshll.u32 %v2201_v48, 16 }
 0x280   : > { %v2408_v32 = vrot.slane %v2406_v43, 1 }
 0x281   : > { %v2232_v10 = vrot.slane %v2230_v35, 7  ;;  %v4237_v16 = vpop.f32.mrb[12].mxu1 }
 0x282   : > { %v4238_v20 = vpop.f32.mrb[13].mxu1  ;;  %v2409_v5 = vor.u32 %v2408_v32, %v2404_v47 }
 0x283   : > { %v4239_v36 = vadd.f32 %v4238_v20, %v4237_v16  ;;  %v4240_v46 = vpop.f32.mrb[14].mxu1  ;;  %v2235_v14 = vor.u32 %v2233_v53, %v2232_v10  ;;  %v6027_v11 = vsel %vm5060_vm5, %v2232_v10, 0 }
 0x284   : > { %v4241_v2 = vpop.f32.mrb[15].mxu1  ;;  %v6032_v23 = vsel %vm920_vm7, %v2409_v5, %v2413_v61  ;;  %v2423_v59 = vshll.u32 %v6027_v11, 16 }
 0x285   : > { %v1904_v31 = vadd.f32 %v4239_v36, %v5913_v54  ;;  %v4242_v63 = vadd.f32 %v4241_v2, %v4240_v46  ;;  %2575 = vrot.lane.b32.xlu1 %v6032_v23, %s4911_s14  ;;  %v6041_v44 = vsel %vm5060_vm5, 0, %v2235_v14 }
 0x286   : > { %2683 = vrot.lane.b32.xlu0 %v6041_v44, %s4911_s14  ;;  %v2418_v62 = vshll.u32 %v6041_v44, 16  ;;  %v2416_v34 = vshrl.u32 %v6041_v44, 16  ;;  %v2425_v47 = vrot.slane %v2423_v59, 1 }
 0x287   : > { %v2065_v12 = vadd.f32 %v5803_v50, %v1904_v31  ;;  %v1907_v41 = vadd.f32 %v4242_v63, %v5913_v54  ;;  %v4822_v31 = vld [vmem:[%s6922_s5 + $0xd8] sm:$0xff]  }
 0x288   : > { %v2420_v45 = vrot.slane %v2418_v62, 1  ;;  %v4823_v63 = vld [vmem:[%s6922_s5 + $0x98] sm:$0xff]   ;;  %4451 = vmatprep.subr.bf16.mxu1 %v4822_v31 }
 0x289   : > { %v2068_v48 = vadd.f32 %v5807_v55, %v1907_v41  ;;  %v4243_v43 = vpop.f32.mrb[16].mxu1  ;;  %v2173_v32 = vmax.f32 %v2065_v12, 0.0  ;;  %v6076_v41 = vld [vmem:[%s6922_s5 + $0x100] sm:$0xff]   ;;  %4452 = vmatpush3.bf16.msra.mxu1 %v4823_v63 }
 0x28a   : > { %v4244_v58 = vpop.f32.mrb[17].mxu1  ;;  %v2421_v35 = vor.u32 %v2420_v45, %v2416_v34  ;;  %v4826_v34 = vld [vmem:[%s6922_s5 + $0xa0] sm:$0xff]   ;;  %4658 = vmatprep.subr.bf16.mxu0 %v6076_v41 }
 0x28b   : > { %v2174_v10 = vmax.f32 %v2068_v48, 0.0  ;;  %v4245_v53 = vadd.f32 %v4244_v58, %v4243_v43  ;;  %v4246_v16 = vpop.f32.mrb[18].mxu1 }
 0x28c   : > { %v4247_v29 = vpop.f32.mrb[19].mxu1  ;;  %v6052_v0 = vsel %vm920_vm7, %v2421_v35, %v2425_v47 }
 0x28d   : > { %v2202_v50 = vpack.c.bf16 %v2174_v10, %v2173_v32  ;;  %v1912_v20 = vadd.f32 %v4245_v53, %v5913_v54  ;;  %v4248_v5 = vadd.f32 %v4247_v29, %v4246_v16  ;;  %2577 = vrot.lane.b32.xlu1 %v6052_v0, %s4911_s14 }
 0x28f   : > { %v2237_v55 = vshrl.u32 %v2202_v50, 16  ;;  %v2073_v61 = vadd.f32 %v5824_v39, %v1912_v20  ;;  %v1915_v36 = vadd.f32 %v4248_v5, %v5913_v54  ;;  %v2240_v14 = vshll.u32 %v2202_v50, 16 }
 0x291   : > { %v2239_v46 = vrot.slane %v2237_v55, 7  ;;  %v2076_v2 = vadd.f32 %v5829_v4, %v1915_v36  ;;  %v2175_v62 = vmax.f32 %v2073_v61, 0.0  ;;  %v4824_v4 = vld [vmem:[%s6922_s5 + $0xe0] sm:$0xff]  }
 0x292   : > { %4453 = vmatprep.subr.bf16.mxu1 %v4824_v4 }
 0x293   : > { %v2176_v59 = vmax.f32 %v2076_v2, 0.0  ;;  %v2242_v12 = vor.u32 %v2240_v14, %v2239_v46  ;;  %v6068_v39 = vsel %vm5060_vm5, %v2239_v46, 0  ;;  %4454 = vmatpush3.bf16.msra.mxu1 %v4826_v34 }
 0x294   : > { %v2435_v58 = vshll.u32 %v6068_v39, 16 }
 0x295   : > { %v2203_v45 = vpack.c.bf16 %v2176_v59, %v2175_v62  ;;  %v6083_v48 = vsel %vm5060_vm5, 0, %v2242_v12 }
 0x296   : > { %2685 = vrot.lane.b32.xlu0 %v6083_v48, %s4911_s14  ;;  %v2430_v43 = vshll.u32 %v6083_v48, 16  ;;  %v2428_v47 = vshrl.u32 %v6083_v48, 16  ;;  %v2437_v20 = vrot.slane %v2435_v58, 1 }
 0x297   : > { %v2244_v35 = vshrl.u32 %v2203_v45, 16  ;;  %v2247_v53 = vshll.u32 %v2203_v45, 16 }
 0x298   : > { %v2432_v32 = vrot.slane %v2430_v43, 1 }
 0x299   : > { %v2246_v10 = vrot.slane %v2244_v35, 7  ;;  %v4249_v16 = vpop.f32.mrb[20].mxu1 }
 0x29a   : > { %v4250_v29 = vpop.f32.mrb[21].mxu1  ;;  %v2433_v50 = vor.u32 %v2432_v32, %v2428_v47 }
 0x29b   : > { %v4251_v5 = vadd.f32 %v4250_v29, %v4249_v16  ;;  %v4252_v55 = vpop.f32.mrb[22].mxu1  ;;  %v2249_v61 = vor.u32 %v2247_v53, %v2246_v10  ;;  %v6093_v36 = vsel %vm5060_vm5, %v2246_v10, 0 }
 0x29c   : > { %v4253_v46 = vpop.f32.mrb[23].mxu1  ;;  %v6096_v14 = vsel %vm920_vm7, %v2433_v50, %v2437_v20  ;;  %v2447_v59 = vshll.u32 %v6093_v36, 16 }
 0x29d   : > { %v1920_v2 = vadd.f32 %v4251_v5, %v5913_v54  ;;  %v4254_v31 = vadd.f32 %v4253_v46, %v4252_v55  ;;  %2579 = vrot.lane.b32.xlu1 %v6096_v14, %s4911_s14  ;;  %v6103_v63 = vsel %vm5060_vm5, 0, %v2249_v61 }
 0x29e   : > { %2687 = vrot.lane.b32.xlu0 %v6103_v63, %s4911_s14  ;;  %v2442_v62 = vshll.u32 %v6103_v63, 16  ;;  %v2440_v34 = vshrl.u32 %v6103_v63, 16  ;;  %v2449_v32 = vrot.slane %v2447_v59, 1 }
 0x29f   : > { %v2081_v12 = vadd.f32 %v5820_v1, %v1920_v2  ;;  %v1923_v4 = vadd.f32 %v4254_v31, %v5913_v54  ;;  %v4827_v1 = vld [vmem:[%s6922_s5 + $0xe8] sm:$0xff]  }
 0x2a0   : > { %v2444_v45 = vrot.slane %v2442_v62, 1  ;;  %4455 = vmatprep.subr.bf16.mxu1 %v4827_v1 }
 0x2a1   : > { %v2084_v43 = vadd.f32 %v5827_v3, %v1923_v4  ;;  %v4255_v58 = vpop.f32.mrb[24].mxu1  ;;  %v2177_v10 = vmax.f32 %v2081_v12, 0.0  ;;  %v4828_v3 = vld [vmem:[%s6922_s5 + $0xa8] sm:$0xff]  }
 0x2a2   : > { %v4256_v35 = vpop.f32.mrb[25].mxu1  ;;  %v2445_v47 = vor.u32 %v2444_v45, %v2440_v34  ;;  %4456 = vmatpush3.bf16.msra.mxu1 %v4828_v3 }
 0x2a3   : > { %v2178_v53 = vmax.f32 %v2084_v43, 0.0  ;;  %v4257_v16 = vadd.f32 %v4256_v35, %v4255_v58  ;;  %v4258_v29 = vpop.f32.mrb[26].mxu1 }
 0x2a4   : > { %v4259_v50 = vpop.f32.mrb[27].mxu1  ;;  %v6114_v20 = vsel %vm920_vm7, %v2445_v47, %v2449_v32  ;;  %v4829_v32 = vld [vmem:[%s6922_s5 + $0xf0] sm:$0xff]  }
 0x2a5   : > { %v2204_v5 = vpack.c.bf16 %v2178_v53, %v2177_v10  ;;  %v1928_v55 = vadd.f32 %v4257_v16, %v5913_v54  ;;  %v4260_v61 = vadd.f32 %v4259_v50, %v4258_v29  ;;  %2581 = vrot.lane.b32.xlu1 %v6114_v20, %s4911_s14  ;;  %v4831_v10 = vld [vmem:[%s6922_s5 + $0xb0] sm:$0xff]   ;;  %4457 = vmatprep.subr.bf16.mxu1 %v4829_v32 }
 0x2a6   : > { %4458 = vmatpush3.bf16.msra.mxu1 %v4831_v10 }
 0x2a7   : > { %v2251_v46 = vshrl.u32 %v2204_v5, 16  ;;  %v2089_v2 = vadd.f32 %v5837_v15, %v1928_v55  ;;  %v1931_v31 = vadd.f32 %v4260_v61, %v5913_v54  ;;  %v2254_v59 = vshll.u32 %v2204_v5, 16 }
 0x2a9   : > { %v2253_v62 = vrot.slane %v2251_v46, 7  ;;  %v2092_v12 = vadd.f32 %v5841_v60, %v1931_v31  ;;  %v2179_v4 = vmax.f32 %v2089_v2, 0.0 }
 0x2ab   : > { %v2180_v34 = vmax.f32 %v2092_v12, 0.0  ;;  %v2256_v45 = vor.u32 %v2254_v59, %v2253_v62  ;;  %v6130_v43 = vsel %vm5060_vm5, %v2253_v62, 0 }
 0x2ac   : > { %v2459_v47 = vshll.u32 %v6130_v43, 16 }
 0x2ad   : > { %v2205_v58 = vpack.c.bf16 %v2180_v34, %v2179_v4  ;;  %v6134_v35 = vsel %vm5060_vm5, 0, %v2256_v45 }
 0x2ae   : > { %2689 = vrot.lane.b32.xlu0 %v6134_v35, %s4911_s14  ;;  %v2454_v15 = vshll.u32 %v6134_v35, 16  ;;  %v2452_v53 = vshrl.u32 %v6134_v35, 16  ;;  %v2461_v55 = vrot.slane %v2459_v47, 1 }
 0x2af   : > { %v2258_v60 = vshrl.u32 %v2205_v58, 16  ;;  %v2261_v50 = vshll.u32 %v2205_v58, 16 }
 0x2b0   : > { %v2456_v16 = vrot.slane %v2454_v15, 1 }
 0x2b1   : > { %v2260_v29 = vrot.slane %v2258_v60, 7  ;;  %v4261_v1 = vpop.f32.mrb[28].mxu1 }
 0x2b2   : > { %v4262_v3 = vpop.f32.mrb[29].mxu1  ;;  %v2457_v5 = vor.u32 %v2456_v16, %v2452_v53 }
 0x2b3   : > { %v4263_v61 = vadd.f32 %v4262_v3, %v4261_v1  ;;  %v4264_v46 = vpop.f32.mrb[30].mxu1  ;;  %v2263_v2 = vor.u32 %v2261_v50, %v2260_v29  ;;  %v6149_v31 = vsel %vm5060_vm5, %v2260_v29, 0 }
 0x2b4   : > { %v4265_v62 = vpop.f32.mrb[31].mxu1  ;;  %v6152_v59 = vsel %vm920_vm7, %v2457_v5, %v2461_v55  ;;  %v2471_v58 = vshll.u32 %v6149_v31, 16 }
 0x2b5   : > { %v1936_v12 = vadd.f32 %v4263_v61, %v5913_v54  ;;  %v4266_v4 = vadd.f32 %v4265_v62, %v4264_v46  ;;  %2583 = vrot.lane.b32.xlu1 %v6152_v59, %s4911_s14  ;;  %v6159_v34 = vsel %vm5060_vm5, 0, %v2263_v2 }
 0x2b6   : > { %2691 = vrot.lane.b32.xlu0 %v6159_v34, %s4911_s14  ;;  %v2466_v45 = vshll.u32 %v6159_v34, 16  ;;  %v2464_v60 = vshrl.u32 %v6159_v34, 16  ;;  %v2473_v50 = vrot.slane %v2471_v58, 1 }
 0x2b7   : > { %v2097_v15 = vadd.f32 %v5835_v18, %v1936_v12  ;;  %v1939_v47 = vadd.f32 %v4266_v4, %v5913_v54 }
 0x2b8   : > { %v2468_v32 = vrot.slane %v2466_v45, 1 }
 0x2b9   : > { %v2100_v10 = vadd.f32 %v5839_v38, %v1939_v47  ;;  %v4267_v53 = vpop.f32.mrb[32].mxu1  ;;  %v2181_v1 = vmax.f32 %v2097_v15, 0.0  ;;  %v4832_v47 = vld [vmem:[%s6922_s5 + $0xf8] sm:$0xff]  }
 0x2ba   : > { %v4268_v16 = vpop.f32.mrb[33].mxu1  ;;  %v2469_v29 = vor.u32 %v2468_v32, %v2464_v60  ;;  %4459 = vmatprep.subr.bf16.mxu1 %v4832_v47 }
 0x2bb   : > { %v2182_v3 = vmax.f32 %v2100_v10, 0.0  ;;  %v4269_v5 = vadd.f32 %v4268_v16, %v4267_v53  ;;  %v4270_v55 = vpop.f32.mrb[34].mxu1 }
 0x2bc   : > { %v4271_v61 = vpop.f32.mrb[35].mxu1  ;;  %v6170_v46 = vsel %vm920_vm7, %v2469_v29, %v2473_v50 }
 0x2bd   : > { %v2206_v18 = vpack.c.bf16 %v2182_v3, %v2181_v1  ;;  %v1944_v2 = vadd.f32 %v4269_v5, %v5913_v54  ;;  %v4272_v62 = vadd.f32 %v4271_v61, %v4270_v55  ;;  %2585 = vrot.lane.b32.xlu1 %v6170_v46, %s4911_s14 }
 0x2bf   : > { %v2265_v38 = vshrl.u32 %v2206_v18, 16  ;;  %v2105_v12 = vadd.f32 %v5847_v28, %v1944_v2  ;;  %v1947_v4 = vadd.f32 %v4272_v62, %v5913_v54  ;;  %v2268_v58 = vshll.u32 %v2206_v18, 16  ;;  %v4833_v28 = vld [vmem:[%s6922_s5 + $0xb8] sm:$0xff]  }
 0x2c0   : > { %4460 = vmatpush3.bf16.msra.mxu1 %v4833_v28  ;;  %v2633_v28 = vrot.slane %v5961_v49, 1 }
 0x2c1   : > { %v2267_v45 = vrot.slane %v2265_v38, 7  ;;  %v2108_v15 = vadd.f32 %v5857_v6, %v1947_v4  ;;  %v2183_v60 = vmax.f32 %v2105_v12, 0.0 }
 0x2c3   : > { %v2184_v32 = vmax.f32 %v2108_v15, 0.0  ;;  %v2270_v10 = vor.u32 %v2268_v58, %v2267_v45  ;;  %v6183_v53 = vsel %vm5060_vm5, %v2267_v45, 0 }
 0x2c4   : > { %v2483_v50 = vshll.u32 %v6183_v53, 16 }
 0x2c5   : > { %v2207_v16 = vpack.c.bf16 %v2184_v32, %v2183_v60  ;;  %v6190_v6 = vsel %vm5060_vm5, 0, %v2270_v10 }
 0x2c6   : > { %2693 = vrot.lane.b32.xlu0 %v6190_v6, %s4911_s14  ;;  %v2478_v29 = vshll.u32 %v6190_v6, 16  ;;  %v2476_v3 = vshrl.u32 %v6190_v6, 16  ;;  %v2485_v38 = vrot.slane %v2483_v50, 1 }
 0x2c7   : > { %v2272_v1 = vshrl.u32 %v2207_v16, 16  ;;  %v2275_v61 = vshll.u32 %v2207_v16, 16 }
 0x2c8   : > { %v2480_v5 = vrot.slane %v2478_v29, 1 }
 0x2c9   : > { %v2274_v55 = vrot.slane %v2272_v1, 7  ;;  %v4273_v18 = vpop.f32.mrb[36].mxu1 }
 0x2ca   : > { %v4274_v2 = vpop.f32.mrb[37].mxu1  ;;  %v2481_v62 = vor.u32 %v2480_v5, %v2476_v3  ;;  %v2634_v3 = vrot.slane %v5951_v56, 1 }
 0x2cb   : > { %v4275_v12 = vadd.f32 %v4274_v2, %v4273_v18  ;;  %v4276_v4 = vpop.f32.mrb[38].mxu1  ;;  %v2277_v45 = vor.u32 %v2275_v61, %v2274_v55  ;;  %v6199_v58 = vsel %vm5060_vm5, %v2274_v55, 0 }
 0x2cc   : > { %v4277_v15 = vpop.f32.mrb[39].mxu1  ;;  %v6202_v47 = vsel %vm920_vm7, %v2481_v62, %v2485_v38  ;;  %v2495_v29 = vshll.u32 %v6199_v58, 16  ;;  %v6222_v2 = vsel %vm1177_vm6, %v2633_v28, %v2634_v3 }
 0x2cd   : > { %v1952_v60 = vadd.f32 %v4275_v12, %v5913_v54  ;;  %v4278_v32 = vadd.f32 %v4277_v15, %v4276_v4  ;;  %2587 = vrot.lane.b32.xlu1 %v6202_v47, %s4911_s14  ;;  %v6209_v10 = vsel %vm5060_vm5, 0, %v2277_v45 }
 0x2ce   : > { %2695 = vrot.lane.b32.xlu0 %v6209_v10, %s4911_s14  ;;  %v2490_v16 = vshll.u32 %v6209_v10, 16  ;;  %v2488_v5 = vshrl.u32 %v6209_v10, 16  ;;  %v2497_v12 = vrot.slane %v2495_v29, 1 }
 0x2cf   : > { %v2113_v50 = vadd.f32 %v5845_v19, %v1952_v60  ;;  %v1955_v1 = vadd.f32 %v4278_v32, %v5913_v54 }
 0x2d0   : > { %v2492_v55 = vrot.slane %v2490_v16, 1 }
 0x2d1   : > { %v2116_v61 = vadd.f32 %v5854_v30, %v1955_v1  ;;  %v4279_v18 = vpop.f32.mrb[40].mxu1  ;;  %v2185_v19 = vmax.f32 %v2113_v50, 0.0  ;;  %v2572_v50 = vpop.permute.xlu1 %2571 }
 0x2d2   : > { %v4280_v62 = vpop.f32.mrb[41].mxu1  ;;  %2727 = vrot.lane.b32.xlu0 %v6222_v2, %s4911_s14  ;;  %v2493_v38 = vor.u32 %v2492_v55, %v2488_v5  ;;  %v6236_v5 = vsel %vm1436_vm9, %v5066_v25, %v2572_v50 }
 0x2d3   : > { %v2186_v4 = vmax.f32 %v2116_v61, 0.0  ;;  %v4281_v45 = vadd.f32 %v4280_v62, %v4279_v18  ;;  %v4282_v15 = vpop.f32.mrb[42].mxu1 }
 0x2d4   : > { %v4283_v56 = vpop.f32.mrb[43].mxu1  ;;  %v6227_v60 = vsel %vm920_vm7, %v2493_v38, %v2497_v12  ;;  %v4830_v38 = vld [vmem:[%s6922_s5 + $0x108] sm:$0xff]  }
 0x2d5   : > { %v2208_v32 = vpack.c.bf16 %v2186_v4, %v2185_v19  ;;  %v1960_v30 = vadd.f32 %v4281_v45, %v5913_v54  ;;  %v4284_v16 = vadd.f32 %v4283_v56, %v4282_v15  ;;  %v2636_v45 = vrot.slane %v6008_v42, 1  ;;  %v4834_v15 = vld [vmem:[%s6922_s5 + $0x110] sm:$0xff]  }
 0x2d6   : > { %2589 = vrot.lane.b32.xlu0 %v6227_v60, %s4911_s14 }
 0x2d7   : > { %v2279_v28 = vshrl.u32 %v2208_v32, 16  ;;  %v2121_v1 = vadd.f32 %v5869_v52, %v1960_v30  ;;  %v1963_v29 = vadd.f32 %v4284_v16, %v5913_v54  ;;  %v2282_v61 = vshll.u32 %v2208_v32, 16 }
 0x2d8   : > { %v2680_v3 = vpop.permute.xlu0 %2679  ;;  %v2637_v30 = vrot.slane %v6004_v7, 1 }
 0x2d9   : > { %v2281_v55 = vrot.slane %v2279_v28, 7  ;;  %v2124_v18 = vadd.f32 %v5875_v8, %v1963_v29  ;;  %v2810_v62 = vsel %vm1436_vm9, %v5074_v33, %v2680_v3  ;;  %v2187_v52 = vmax.f32 %v2121_v1, 0.0 }
 0x2da   : > { %3299 = vmatprep.mubr.bf16.mxu0 %v2810_v62  ;;  %v6265_v3 = vsel %vm1177_vm6, %v2636_v45, %v2637_v30 }
 0x2db   : > { %v2188_v12 = vmax.f32 %v2124_v18, 0.0  ;;  %v2284_v19 = vor.u32 %v2282_v61, %v2281_v55  ;;  %v6246_v4 = vsel %vm5060_vm5, %v2281_v55, 0  ;;  %3300 = vmatmul.mubr.bf16.vlgmr.msra.gmra.mrb[64].mxu0 %v6236_v5 }
 0x2dc   : > { %4659 = vmatpush3.bf16.msra.mxu0 %v6076_v41  ;;  %v2507_v32 = vshll.u32 %v6246_v4, 16 }
 0x2dd   : > { %v2209_v25 = vpack.c.bf16 %v2188_v12, %v2187_v52  ;;  %v6252_v8 = vsel %vm5060_vm5, 0, %v2284_v19  ;;  %4660 = vmatprep.subr.bf16.mxu0 %v4830_v38 }
 0x2de   : > { %2697 = vrot.lane.b32.xlu1 %v6252_v8, %s4911_s14  ;;  %v2502_v56 = vshll.u32 %v6252_v8, 16  ;;  %v2500_v16 = vshrl.u32 %v6252_v8, 16  ;;  %v2509_v18 = vrot.slane %v2507_v32, 1  ;;  %v2639_v32 = vrot.slane %v6041_v44, 1 }
 0x2df   : > { %v2286_v41 = vshrl.u32 %v2209_v25, 16  ;;  %v2289_v29 = vshll.u32 %v2209_v25, 16 }
 0x2e0   : > { %v2504_v28 = vrot.slane %v2502_v56, 1  ;;  %4661 = vmatpush3.bf16.msra.mxu0 %v4830_v38 }
 0x2e1   : > { %v2288_v1 = vrot.slane %v2286_v41, 7  ;;  %v4285_v50 = vpop.f32.mrb[44].mxu1  ;;  %4662 = vmatprep.subr.bf16.mxu0 %v4834_v15 }
 0x2e2   : > { %v4286_v55 = vpop.f32.mrb[45].mxu1  ;;  %2729 = vrot.lane.b32.xlu1 %v6265_v3, %s4911_s14  ;;  %v2505_v61 = vor.u32 %v2504_v28, %v2500_v16  ;;  %v2640_v28 = vrot.slane %v6027_v11, 1 }
 0x2e3   : > { %v4287_v62 = vadd.f32 %v4286_v55, %v4285_v50  ;;  %v4288_v52 = vpop.f32.mrb[46].mxu1  ;;  %v2291_v7 = vor.u32 %v2289_v29, %v2288_v1  ;;  %v6271_v12 = vsel %vm5060_vm5, %v2288_v1, 0 }
 0x2e4   : > { %v4289_v38 = vpop.f32.mrb[47].mxu1  ;;  %v6274_v19 = vsel %vm920_vm7, %v2505_v61, %v2509_v18  ;;  %4663 = vmatpush3.bf16.msra.mxu0 %v4834_v15  ;;  %v2519_v30 = vshll.u32 %v6271_v12, 16  ;;  %v6294_v61 = vsel %vm1177_vm6, %v2639_v32, %v2640_v28  ;;  %v2574_v32 = vpop.permute.xlu1 %2573 }
 0x2e5   : > { %v1968_v25 = vadd.f32 %v4287_v62, %v5913_v54  ;;  %v4290_v45 = vadd.f32 %v4289_v38, %v4288_v52  ;;  %v6279_v56 = vsel %vm5060_vm5, 0, %v2291_v7 }
 0x2e6   : > { %2699 = vrot.lane.b32.xlu0 %v6279_v56, %s4911_s14  ;;  %2591 = vrot.lane.b32.xlu1 %v6274_v19, %s4911_s14  ;;  %v2514_v41 = vshll.u32 %v6279_v56, 16  ;;  %v2512_v1 = vshrl.u32 %v6279_v56, 16  ;;  %v2521_v52 = vrot.slane %v2519_v30, 1 }
 0x2e7   : > { %v2129_v15 = vadd.f32 %v5867_v26, %v1968_v25  ;;  %v1971_v16 = vadd.f32 %v4290_v45, %v5913_v54 }
 0x2e8   : > { %v2516_v29 = vrot.slane %v2514_v41, 1 }
 0x2e9   : > { %v2132_v50 = vadd.f32 %v5873_v13, %v1971_v16  ;;  %v4291_v55 = vpop.f32.mrb[48].mxu1  ;;  %v2189_v26 = vmax.f32 %v2129_v15, 0.0 }
 0x2ea   : > { %v4292_v18 = vpop.f32.mrb[49].mxu1  ;;  %2731 = vrot.lane.b32.xlu0 %v6294_v61, %s4911_s14  ;;  %v2517_v62 = vor.u32 %v2516_v29, %v2512_v1 }
 0x2eb   : > { %v2190_v7 = vmax.f32 %v2132_v50, 0.0  ;;  %v4293_v38 = vadd.f32 %v4292_v18, %v4291_v55  ;;  %v4294_v25 = vpop.f32.mrb[50].mxu1 }
 0x2ec   : > { %v4295_v11 = vpop.f32.mrb[51].mxu1  ;;  %v6299_v45 = vsel %vm920_vm7, %v2517_v62, %v2521_v52 }
 0x2ed   : > { %v2210_v41 = vpack.c.bf16 %v2190_v7, %v2189_v26  ;;  %v1976_v13 = vadd.f32 %v4293_v38, %v5913_v54  ;;  %v4296_v16 = vadd.f32 %v4295_v11, %v4294_v25  ;;  %v2765_v7 = vsel %vm1436_vm9, %v5961_v49, %v2574_v32 }
 0x2ee   : > { %2593 = vrot.lane.b32.xlu0 %v6299_v45, %s4911_s14 }
 0x2ef   : > { %v2293_v28 = vshrl.u32 %v2210_v41, 16  ;;  %v2137_v1 = vadd.f32 %v5888_v27, %v1976_v13  ;;  %v1979_v30 = vadd.f32 %v4296_v16, %v5913_v54  ;;  %v2296_v50 = vshll.u32 %v2210_v41, 16 }
 0x2f0   : > { %v2682_v15 = vpop.permute.xlu0 %2681  ;;  %v2642_v13 = vrot.slane %v6083_v48, 1 }
 0x2f1   : > { %v2295_v29 = vrot.slane %v2293_v28, 7  ;;  %v2140_v55 = vadd.f32 %v5893_v17, %v1979_v30  ;;  %v4297_v18 = vpop.f32.mrb[52].mxu1  ;;  %v2814_v62 = vsel %vm1436_vm9, %v6222_v2, %v2682_v15  ;;  %v2191_v52 = vmax.f32 %v2137_v1, 0.0  ;;  %v4835_v2 = vld [vmem:[%s6922_s5 + $0x118] sm:$0xff]  }
 0x2f2   : > { %v4298_v26 = vpop.f32.mrb[53].mxu1  ;;  %3307 = vmatprep.mubr.bf16.mxu0 %v2814_v62  ;;  %v2643_v1 = vrot.slane %v6068_v39, 1  ;;  %4664 = vmatprep.subr.bf16.mxu0 %v4835_v2 }
 0x2f3   : > { %v2192_v38 = vmax.f32 %v2140_v55, 0.0  ;;  %v4299_v25 = vadd.f32 %v4298_v26, %v4297_v18  ;;  %v4300_v27 = vpop.f32.mrb[54].mxu1  ;;  %3308 = vmatmul.mubr.bf16.gmra.mrb[68].mxu0 %v2765_v7  ;;  %v2298_v11 = vor.u32 %v2296_v50, %v2295_v29  ;;  %v6313_v41 = vsel %vm5060_vm5, %v2295_v29, 0 }
 0x2f4   : > { %v4301_v17 = vpop.f32.mrb[55].mxu1  ;;  %v2531_v15 = vshll.u32 %v6313_v41, 16  ;;  %4665 = vmatpush3.bf16.msra.mxu0 %v4835_v2  ;;  %v6334_v26 = vsel %vm1177_vm6, %v2642_v13, %v2643_v1 }
 0x2f5   : > { %v2211_v16 = vpack.c.bf16 %v2192_v38, %v2191_v52  ;;  %v1984_v28 = vadd.f32 %v4299_v25, %v5913_v54  ;;  %v4302_v49 = vadd.f32 %v4301_v17, %v4300_v27  ;;  %v6322_v32 = vsel %vm5060_vm5, 0, %v2298_v11 }
 0x2f6   : > { %2701 = vrot.lane.b32.xlu1 %v6322_v32, %s4911_s14  ;;  %v2526_v30 = vshll.u32 %v6322_v32, 16  ;;  %v2524_v39 = vshrl.u32 %v6322_v32, 16  ;;  %v2533_v13 = vrot.slane %v2531_v15, 1 }
 0x2f7   : > { %v2300_v29 = vshrl.u32 %v2211_v16, 16  ;;  %v2145_v50 = vadd.f32 %v5885_v37, %v1984_v28  ;;  %v1987_v55 = vadd.f32 %v4302_v49, %v5913_v54  ;;  %v2576_v18 = vpop.permute.xlu1 %2575  ;;  %v2303_v25 = vshll.u32 %v2211_v16, 16 }
 0x2f8   : > { %v2684_v62 = vpop.permute.xlu0 %2683  ;;  %v2768_v52 = vsel %vm1436_vm9, %v6008_v42, %v2576_v18  ;;  %v2528_v7 = vrot.slane %v2526_v30, 1 }
 0x2f9   : > { %v2302_v38 = vrot.slane %v2300_v29, 7  ;;  %v2148_v27 = vadd.f32 %v5891_v21, %v1987_v55  ;;  %v4303_v11 = vpop.f32.mrb[56].mxu1  ;;  %3460 = vmatprep.mubr.bf16.mxu1 %v2768_v52  ;;  %v2818_v37 = vsel %vm1436_vm9, %v6265_v3, %v2684_v62  ;;  %v2193_v17 = vmax.f32 %v2145_v50, 0.0 }
 0x2fa   : > { %v4304_v2 = vpop.f32.mrb[57].mxu1  ;;  %2733 = vrot.lane.b32.xlu1 %v6334_v26, %s4911_s14  ;;  %3315 = vmatprep.mubr.bf16.mxu0 %v2818_v37  ;;  %v2529_v42 = vor.u32 %v2528_v7, %v2524_v39  ;;  %v2645_v50 = vrot.slane %v6103_v63, 1 }
 0x2fb   : > { %v2194_v28 = vmax.f32 %v2148_v27, 0.0  ;;  %v4305_v49 = vadd.f32 %v4304_v2, %v4303_v11  ;;  %v4306_v1 = vpop.f32.mrb[58].mxu1  ;;  %3316 = vmatmul.mubr.bf16.gmra.mrb[72].mxu0 %v2768_v52  ;;  %v2305_v16 = vor.u32 %v2303_v25, %v2302_v38  ;;  %v6344_v21 = vsel %vm5060_vm5, %v2302_v38, 0 }
 0x2fc   : > { %v4307_v30 = vpop.f32.mrb[59].mxu1  ;;  %v6347_v29 = vsel %vm920_vm7, %v2529_v42, %v2533_v13  ;;  %v2543_v39 = vshll.u32 %v6344_v21, 16  ;;  %v2646_v27 = vrot.slane %v6093_v36, 1  ;;  %v2670_v24 = vrot.slane %v6344_v21, 1 }
 0x2fd   : > { %v2212_v55 = vpack.c.bf16 %v2194_v28, %v2193_v17  ;;  %v1992_v18 = vadd.f32 %v4305_v49, %v5913_v54  ;;  %v4308_v62 = vadd.f32 %v4307_v30, %v4306_v1  ;;  %v6353_v15 = vsel %vm5060_vm5, 0, %v2305_v16 }
 0x2fe   : > { %2703 = vrot.lane.b32.xlu0 %v6353_v15, %s4911_s14  ;;  %2595 = vrot.lane.b32.xlu1 %v6347_v29, %s4911_s14  ;;  %v2538_v52 = vshll.u32 %v6353_v15, 16  ;;  %v2536_v11 = vshrl.u32 %v6353_v15, 16  ;;  %v6367_v28 = vsel %vm1177_vm6, %v2645_v50, %v2646_v27  ;;  %v2648_v50 = vrot.slane %v6134_v35, 1 }
 0x2ff   : > { %v2307_v7 = vshrl.u32 %v2212_v55, 16  ;;  %v2153_v38 = vadd.f32 %v6023_v9, %v1992_v18  ;;  %v1995_v25 = vadd.f32 %v4308_v62, %v5913_v54  ;;  %v2310_v2 = vshll.u32 %v2212_v55, 16 }
 0x300   : > { %v2540_v37 = vrot.slane %v2538_v52, 1  ;;  %v2545_v54 = vrot.slane %v2543_v39, 1  ;;  %v2649_v27 = vrot.slane %v6130_v43, 1 }
 0x301   : > { %v2309_v17 = vrot.slane %v2307_v7, 7  ;;  %v2156_v42 = vadd.f32 %v6034_v40, %v1995_v25  ;;  %v4309_v13 = vpop.f32.mrb[60].mxu1  ;;  %v2195_v49 = vmax.f32 %v2153_v38, 0.0  ;;  %v4844_v7 = vld [vmem:[%s6921_s4] ss:$0 sm:$0xff] }
 0x302   : > { %v4310_v1 = vpop.f32.mrb[61].mxu1  ;;  %2735 = vrot.lane.b32.xlu0 %v6367_v28, %s4911_s14  ;;  %v2541_v9 = vor.u32 %v2540_v37, %v2536_v11 }
 0x303   : > { %v2196_v16 = vmax.f32 %v2156_v42, 0.0  ;;  %v4311_v36 = vadd.f32 %v4310_v1, %v4309_v13  ;;  %v4312_v30 = vpop.f32.mrb[62].mxu1  ;;  %v2312_v18 = vor.u32 %v2310_v2, %v2309_v17  ;;  %v6373_v55 = vsel %vm5060_vm5, %v2309_v17, 0  ;;  %v2578_v2 = vpop.permute.xlu1 %2577 }
 0x304   : > { %v4313_v40 = vpop.f32.mrb[63].mxu1  ;;  %v6376_v62 = vsel %vm920_vm7, %v2541_v9, %v2545_v54  ;;  %v2555_v37 = vshll.u32 %v6373_v55, 16  ;;  %v6395_v1 = vsel %vm1177_vm6, %v2648_v50, %v2649_v27 }
 0x305   : > { %v2213_v52 = vpack.c.bf16 %v2196_v16, %v2195_v49  ;;  %v2000_v39 = vadd.f32 %v4844_v7, %v4311_v36  ;;  %v4314_v38 = vadd.f32 %v4313_v40, %v4312_v30  ;;  %v6384_v25 = vsel %vm5060_vm5, 0, %v2312_v18 }
 0x306   : > { %2597 = vrot.lane.b32.xlu0 %v6376_v62, %s4911_s14  ;;  %2705 = vrot.lane.b32.xlu1 %v6384_v25, %s4911_s14  ;;  %v2550_v11 = vshll.u32 %v6384_v25, 16  ;;  %v2548_v9 = vshrl.u32 %v6384_v25, 16  ;;  %v2557_v40 = vrot.slane %v2555_v37, 1 }
 0x307   : > { %v2314_v17 = vshrl.u32 %v2213_v52, 16  ;;  %v2161_v42 = vadd.f32 %v6021_v57, %v2000_v39  ;;  %v2003_v13 = vadd.f32 %v4844_v7, %v4314_v38  ;;  %v2317_v36 = vshll.u32 %v2213_v52, 16 }
 0x308   : > { %v2686_v49 = vpop.permute.xlu0 %2685  ;;  %v2552_v54 = vrot.slane %v2550_v11, 1  ;;  %v6405_v57 = vsel %vm1436_vm9, %v6041_v44, %v2578_v2  ;;  %v2651_v44 = vrot.slane %v6159_v34, 1 }
 0x309   : > { %v2316_v16 = vrot.slane %v2314_v17, 7  ;;  %v2164_v43 = vadd.f32 %v6029_v22, %v2003_v13  ;;  %v2822_v30 = vsel %vm1436_vm9, %v6294_v61, %v2686_v49  ;;  %v2197_v52 = vmax.f32 %v2161_v42, 0.0 }
 0x30a   : > { %2737 = vrot.lane.b32.xlu1 %v6395_v1, %s4911_s14  ;;  %3323 = vmatprep.mubr.bf16.mxu0 %v2822_v30  ;;  %v2553_v18 = vor.u32 %v2552_v54, %v2548_v9  ;;  %v2652_v42 = vrot.slane %v6149_v31, 1 }
 0x30b   : > { %v2319_v50 = vor.u32 %v2317_v36, %v2316_v16  ;;  %v6409_v7 = vsel %vm5060_vm5, %v2316_v16, 0  ;;  %v2198_v22 = vmax.f32 %v2164_v43, 0.0  ;;  %3324 = vmatmul.mubr.bf16.gmra.mrb[76].mxu0 %v6405_v57 }
 0x30c   : > { %v6413_v39 = vsel %vm920_vm7, %v2553_v18, %v2557_v40  ;;  %v2567_v37 = vshll.u32 %v6409_v7, 16  ;;  %v6429_v36 = vsel %vm1177_vm6, %v2651_v44, %v2652_v42  ;;  %v2658_v44 = vrot.slane %v6199_v58, 1 }
 0x30d   : > { %v2214_v38 = vpack.c.bf16 %v2198_v22, %v2197_v52  ;;  %v6417_v27 = vsel %vm5060_vm5, 0, %v2319_v50  ;;  %v2654_v52 = vrot.slane %v6190_v6, 1  ;;  %v2661_v58 = vrot.slane %v6246_v4, 1 }
 0x30e   : > { %2707 = vrot.lane.b32.xlu0 %v6417_v27, %s4911_s14  ;;  %2599 = vrot.lane.b32.xlu1 %v6413_v39, %s4911_s14  ;;  %v2562_v11 = vshll.u32 %v6417_v27, 16  ;;  %v2560_v49 = vshrl.u32 %v6417_v27, 16  ;;  %v2569_v18 = vrot.slane %v2567_v37, 1  ;;  %v2667_v4 = vrot.slane %v6313_v41, 1 }
 0x30f   : > { %v2321_v17 = vshrl.u32 %v2214_v38, 16  ;;  %v2580_v2 = vpop.permute.xlu1 %2579  ;;  %v2324_v16 = vshll.u32 %v2214_v38, 16  ;;  %v2657_v38 = vrot.slane %v6209_v10, 1 }
 0x310   : > { %v2688_v13 = vpop.permute.xlu0 %2687  ;;  %v2564_v9 = vrot.slane %v2562_v11, 1  ;;  %v6437_v30 = vsel %vm1436_vm9, %v6083_v48, %v2580_v2  ;;  %v2655_v48 = vrot.slane %v6183_v53, 1  ;;  %v2660_v2 = vrot.slane %v6252_v8, 1 }
 0x311   : > { %v2323_v54 = vrot.slane %v2321_v17, 7  ;;  %v2826_v43 = vsel %vm1436_vm9, %v6334_v26, %v2688_v13  ;;  %v6459_v37 = vsel %vm1177_vm6, %v2657_v38, %v2658_v44  ;;  %v2663_v17 = vrot.slane %v6279_v56, 1 }
 0x312   : > { %2739 = vrot.lane.b32.xlu0 %v6429_v36, %s4911_s14  ;;  %3331 = vmatprep.mubr.bf16.mxu0 %v2826_v43  ;;  %v2565_v31 = vor.u32 %v2564_v9, %v2560_v49  ;;  %v6456_v11 = vsel %vm1177_vm6, %v2654_v52, %v2655_v48  ;;  %v2664_v53 = vrot.slane %v6271_v12, 1  ;;  %v2666_v13 = vrot.slane %v6322_v32, 1 }
 0x313   : > { %3332 = vmatmul.mubr.bf16.gmra.mrb[80].mxu0 %v6437_v30  ;;  %v2326_v40 = vor.u32 %v2324_v16, %v2323_v54  ;;  %v2390_v49 = vsel %vm5060_vm5, %v2323_v54, 0  ;;  %v6477_v16 = vsel %vm1177_vm6, %v2660_v2, %v2661_v58  ;;  %v2669_v43 = vrot.slane %v6353_v15, 1 }
 0x314   : > { %v6441_v50 = vsel %vm920_vm7, %v2565_v31, %v2569_v18  ;;  %v6474_v9 = vsel %vm1177_vm6, %v2663_v17, %v2664_v53  ;;  %v2719_v54 = vshll.u32 %v2390_v49, 16  ;;  %v6488_v52 = vsel %vm1177_vm6, %v2666_v13, %v2667_v4 }
 0x315   : > { %v6446_v22 = vsel %vm5060_vm5, 0, %v2326_v40  ;;  %v6491_v38 = vsel %vm1177_vm6, %v2669_v43, %v2670_v24  ;;  %v2672_v17 = vrot.slane %v6384_v25, 1  ;;  %v2673_v2 = vrot.slane %v6373_v55, 1 }
 0x316   : > { %2601 = vrot.lane.b32.xlu0 %v6441_v50, %s4911_s14  ;;  %2709 = vrot.lane.b32.xlu1 %v6446_v22, %s4911_s14  ;;  %v2714_v42 = vshll.u32 %v6446_v22, 16  ;;  %v2712_v12 = vshrl.u32 %v6446_v22, 16  ;;  %v2721_v21 = vrot.slane %v2719_v54, 1  ;;  %v2724_v58 = vrot.slane %v6446_v22, 1 }
 0x317   : > { %v2582_v18 = vpop.permute.xlu1 %2581  ;;  %v6507_v53 = vsel %vm1177_vm6, %v2672_v17, %v2673_v2  ;;  %v2675_v13 = vrot.slane %v6417_v27, 1  ;;  %v2676_v55 = vrot.slane %v6409_v7, 1 }
 0x318   : > { %v2716_v31 = vrot.slane %v2714_v42, 1  ;;  %v2777_v41 = vsel %vm1436_vm9, %v6103_v63, %v2582_v18  ;;  %v2725_v63 = vrot.slane %v2390_v49, 1 }
 0x319   : > { %v6520_v24 = vsel %vm1177_vm6, %v2675_v13, %v2676_v55 }
 0x31a   : > { %2743 = vrot.lane.b32.xlu0 %v6459_v37, %s4911_s14  ;;  %2741 = vrot.lane.b32.xlu1 %v6456_v11, %s4911_s14  ;;  %v2717_v44 = vor.u32 %v2716_v31, %v2712_v12  ;;  %v6517_v4 = vsel %vm1177_vm6, %v2724_v58, %v2725_v63 }
 0x31c   : > { %v6504_v42 = vsel %vm920_vm7, %v2717_v44, %v2721_v21 }
 0x31e   : > { %2747 = vrot.lane.b32.xlu0 %v6474_v9, %s4911_s14  ;;  %2745 = vrot.lane.b32.xlu1 %v6477_v16, %s4911_s14 }
 0x320   : > { %v2690_v40 = vpop.permute.xlu0 %2689 }
 0x321   : > { %v2830_v48 = vsel %vm1436_vm9, %v6367_v28, %v2690_v40 }
 0x322   : > { %2751 = vrot.lane.b32.xlu0 %v6491_v38, %s4911_s14  ;;  %2749 = vrot.lane.b32.xlu1 %v6488_v52, %s4911_s14 }
 0x323   : > { %3339 = vmatprep.mubr.bf16.mxu0 %v2830_v48 }
 0x324   : > { %3340 = vmatmul.mubr.bf16.gmra.mrb[84].mxu0 %v2777_v41 }
 0x326   : > { %2759 = vrot.lane.b32.xlu0 %v6504_v42, %s4911_s14  ;;  %2753 = vrot.lane.b32.xlu1 %v6507_v53, %s4911_s14 }
 0x327   : > { %v2584_v43 = vpop.permute.xlu1 %2583 }
 0x328   : > { %v2692_v31 = vpop.permute.xlu0 %2691  ;;  %v2780_v7 = vsel %vm1436_vm9, %v6134_v35, %v2584_v43 }
 0x329   : > { %v2834_v12 = vsel %vm1436_vm9, %v6395_v1, %v2692_v31 }
 0x32a   : > { %2757 = vrot.lane.b32.xlu0 %v6517_v4, %s4911_s14  ;;  %2755 = vrot.lane.b32.xlu1 %v6520_v24, %s4911_s14 }
 0x32b   : > { %3347 = vmatprep.mubr.bf16.mxu0 %v2834_v12 }
 0x32c   : > { %3348 = vmatmul.mubr.bf16.gmra.mrb[88].mxu0 %v2780_v7 }
 0x32f   : > { %v2586_v49 = vpop.permute.xlu1 %2585 }
 0x330   : > { %v2783_v40 = vsel %vm1436_vm9, %v6159_v34, %v2586_v49 }
 0x338   : > { %v2694_v54 = vpop.permute.xlu0 %2693 }
 0x339   : > { %v2838_v18 = vsel %vm1436_vm9, %v6429_v36, %v2694_v54 }
 0x33a   : > { %3355 = vmatprep.mubr.bf16.mxu0 %v2838_v18 }
 0x33b   : > { %3356 = vmatmul.mubr.bf16.gmra.mrb[92].mxu0 %v2783_v40 }
 0x33f   : > { %v2588_v48 = vpop.permute.xlu1 %2587 }
 0x340   : > { %v2696_v44 = vpop.permute.xlu0 %2695  ;;  %v2786_v35 = vsel %vm1436_vm9, %v6190_v6, %v2588_v48 }
 0x341   : > { %v2842_v17 = vsel %vm1436_vm9, %v6456_v11, %v2696_v44 }
 0x342   : > { %3363 = vmatprep.mubr.bf16.mxu0 %v2842_v17 }
 0x343   : > { %3364 = vmatmul.mubr.bf16.gmra.mrb[96].mxu0 %v2786_v35 }
 0x344   : > { %v2728_v21 = vpop.permute.xlu0 %2727 }
 0x345   : > { %v2874_v2 = vsel %vm1436_vm9, %v5975_v51, %v2728_v21 }
 0x346   : > { %3461 = vmatmul.mubr.bf16.vlgmr.msra.gmra.mrb[64].mxu1 %v2874_v2 }
 0x347   : > { %3468 = vmatprep.mubr.bf16.mxu1 %v6405_v57 }
 0x348   : > { %v2590_v58 = vpop.permute.xlu0 %2589 }
 0x349   : > { %v2789_v63 = vsel %vm1436_vm9, %v6209_v10, %v2590_v58 }
 0x350   : > { %v2698_v34 = vpop.permute.xlu1 %2697 }
 0x351   : > { %v2846_v13 = vsel %vm1436_vm9, %v6459_v37, %v2698_v34 }
 0x352   : > { %3371 = vmatprep.mubr.bf16.mxu0 %v2846_v13 }
 0x353   : > { %3372 = vmatmul.mubr.bf16.gmra.mrb[100].mxu0 %v2789_v63 }
 0x354   : > { %v2730_v55 = vpop.permute.xlu1 %2729 }
 0x355   : > { %v2878_v6 = vsel %vm1436_vm9, %v6032_v23, %v2730_v55 }
 0x356   : > { %3469 = vmatmul.mubr.bf16.gmra.mrb[68].mxu1 %v2878_v6 }
 0x357   : > { %3476 = vmatprep.mubr.bf16.mxu1 %v6437_v30 }
 0x358   : > { %v2700_v51 = vpop.permute.xlu0 %2699  ;;  %v2592_v43 = vpop.permute.xlu1 %2591 }
 0x359   : > { %v2850_v57 = vsel %vm1436_vm9, %v6477_v16, %v2700_v51  ;;  %v2792_v31 = vsel %vm1436_vm9, %v6252_v8, %v2592_v43 }
 0x35a   : > { %3379 = vmatprep.mubr.bf16.mxu0 %v2850_v57 }
 0x35b   : > { %3380 = vmatmul.mubr.bf16.gmra.mrb[104].mxu0 %v2792_v31 }
 0x35c   : > { %v2732_v12 = vpop.permute.xlu0 %2731 }
 0x35d   : > { %v2882_v10 = vsel %vm1436_vm9, %v6052_v0, %v2732_v12 }
 0x35e   : > { %3477 = vmatmul.mubr.bf16.gmra.mrb[72].mxu1 %v2882_v10 }
 0x35f   : > { %3484 = vmatprep.mubr.bf16.mxu1 %v2777_v41 }
 0x360   : > { %v2594_v23 = vpop.permute.xlu0 %2593 }
 0x361   : > { %v2795_v54 = vsel %vm1436_vm9, %v6279_v56, %v2594_v23 }
 0x368   : > { %v2702_v49 = vpop.permute.xlu1 %2701 }
 0x369   : > { %v2854_v30 = vsel %vm1436_vm9, %v6474_v9, %v2702_v49 }
 0x36a   : > { %3387 = vmatprep.mubr.bf16.mxu0 %v2854_v30 }
 0x36b   : > { %3388 = vmatmul.mubr.bf16.gmra.mrb[108].mxu0 %v2795_v54 }
 0x36c   : > { %v2734_v18 = vpop.permute.xlu1 %2733 }
 0x36d   : > { %v2886_v8 = vsel %vm1436_vm9, %v6096_v14, %v2734_v18 }
 0x36e   : > { %3485 = vmatmul.mubr.bf16.gmra.mrb[76].mxu1 %v2886_v8 }
 0x36f   : > { %3492 = vmatprep.mubr.bf16.mxu1 %v2780_v7 }
 0x370   : > { %v2704_v48 = vpop.permute.xlu0 %2703  ;;  %v2596_v0 = vpop.permute.xlu1 %2595 }
 0x371   : > { %v2858_v41 = vsel %vm1436_vm9, %v6488_v52, %v2704_v48  ;;  %v2798_v44 = vsel %vm1436_vm9, %v6322_v32, %v2596_v0  ;;  %v4837_v48 = vld [vmem:[%s6924_s7 + $0x8] sm:$0xff]  }
 0x372   : > { %3395 = vmatprep.mubr.bf16.mxu0 %v2858_v41 }
 0x373   : > { %3396 = vmatmul.mubr.bf16.gmra.mrb[112].mxu0 %v2798_v44 }
 0x374   : > { %v2736_v17 = vpop.permute.xlu0 %2735 }
 0x375   : > { %v2890_v56 = vsel %vm1436_vm9, %v6114_v20, %v2736_v17 }
 0x376   : > { %3493 = vmatmul.mubr.bf16.gmra.mrb[80].mxu1 %v2890_v56  ;;  %v4838_v56 = vld [vmem:[%s6924_s7 + $0x10] sm:$0xff]  }
 0x377   : > { %3500 = vmatprep.mubr.bf16.mxu1 %v2783_v40 }
 0x378   : > { %v2598_v21 = vpop.permute.xlu0 %2597  ;;  %v2706_v14 = vpop.permute.xlu1 %2705 }
 0x379   : > { %v2862_v7 = vsel %vm1436_vm9, %v6491_v38, %v2706_v14  ;;  %v2801_v2 = vsel %vm1436_vm9, %v6353_v15, %v2598_v21 }
 0x37a   : > { %3403 = vmatprep.mubr.bf16.mxu0 %v2862_v7 }
 0x37b   : > { %3404 = vmatmul.mubr.bf16.gmra.mrb[116].mxu0 %v2801_v2 }
 0x37c   : > { %v2738_v58 = vpop.permute.xlu1 %2737 }
 0x37d   : > { %v2894_v32 = vsel %vm1436_vm9, %v6152_v59, %v2738_v58 }
 0x37e   : > { %3501 = vmatmul.mubr.bf16.gmra.mrb[84].mxu1 %v2894_v32 }
 0x37f   : > { %3508 = vmatprep.mubr.bf16.mxu1 %v2786_v35 }
 0x380   : > { %v2708_v34 = vpop.permute.xlu0 %2707  ;;  %v2600_v20 = vpop.permute.xlu1 %2599 }
 0x381   : > { %v2866_v40 = vsel %vm1436_vm9, %v6507_v53, %v2708_v34  ;;  %v2804_v13 = vsel %vm1436_vm9, %v6384_v25, %v2600_v20 }
 0x382   : > { %3411 = vmatprep.mubr.bf16.mxu0 %v2866_v40 }
 0x383   : > { %3412 = vmatmul.mubr.bf16.gmra.mrb[120].mxu0 %v2804_v13 }
 0x384   : > { %v2740_v55 = vpop.permute.xlu0 %2739 }
 0x385   : > { %v2898_v15 = vsel %vm1436_vm9, %v6170_v46, %v2740_v55 }
 0x386   : > { %3509 = vmatmul.mubr.bf16.gmra.mrb[88].mxu1 %v2898_v15 }
 0x387   : > { %3516 = vmatprep.mubr.bf16.mxu1 %v2789_v63 }
 0x388   : > { %v2602_v6 = vpop.permute.xlu0 %2601  ;;  %v2710_v59 = vpop.permute.xlu1 %2709 }
 0x389   : > { %v2870_v35 = vsel %vm1436_vm9, %v6520_v24, %v2710_v59  ;;  %v2807_v51 = vsel %vm1436_vm9, %v6417_v27, %v2602_v6  ;;  %v4839_v6 = vld [vmem:[%s6924_s7 + $0x18] sm:$0xff]  }
 0x38a   : > { %3419 = vmatprep.mubr.bf16.mxu0 %v2870_v35 }
 0x38b   : > { %3420 = vmatmul.mubr.bf16.gmra.mrb[124].mxu0 %v2807_v51 }
 0x38c   : > { %4666 = vmatprep.mubr.msk.bf16.mxu0 %vm1436_vm9, %v6265_v3  ;;  %v2742_v25 = vpop.permute.xlu1 %2741  ;;  %v2744_v46 = vpop.permute.xlu0 %2743 }
 0x38d   : > { %v2902_v43 = vsel %vm1436_vm9, %v6202_v47, %v2742_v25  ;;  %v2906_v27 = vsel %vm1436_vm9, %v6227_v60, %v2744_v46 }
 0x38e   : > { %3517 = vmatmul.mubr.bf16.gmra.mrb[92].mxu1 %v2902_v43 }
 0x38f   : > { %3524 = vmatprep.mubr.bf16.mxu1 %v2792_v31 }
 0x390   : > { %v2746_v63 = vpop.permute.xlu1 %2745  ;;  %v2748_v3 = vpop.permute.xlu0 %2747 }
 0x391   : > { %v2910_v47 = vsel %vm1436_vm9, %v6274_v19, %v2746_v63  ;;  %v2914_v60 = vsel %vm1436_vm9, %v6299_v45, %v2748_v3  ;;  %v4840_v63 = vld [vmem:[%s6924_s7 + $0x20] sm:$0xff]  }
 0x393   : > { %4667 = vmatmul.mubr.msk.bf16.vlgmr.msra.gmra.mrb[128].mxu0 %vm1436_vm9, %v6294_v61 }
 0x394   : > { %4670 = vmatprep.mubr.msk.bf16.mxu0 %vm1436_vm9, %v6334_v26  ;;  %v2750_v61 = vpop.permute.xlu1 %2749 }
 0x395   : > { %v2918_v19 = vsel %vm1436_vm9, %v6347_v29, %v2750_v61 }
 0x396   : > { %3525 = vmatmul.mubr.bf16.gmra.mrb[96].mxu1 %v2906_v27 }
 0x397   : > { %3532 = vmatprep.mubr.bf16.mxu1 %v2795_v54 }
 0x39b   : > { %4671 = vmatmul.mubr.msk.bf16.gmra.mrb[132].mxu0 %vm1436_vm9, %v6367_v28 }
 0x39c   : > { %4674 = vmatprep.mubr.msk.bf16.mxu0 %vm1436_vm9, %v6395_v1 }
 0x39e   : > { %3533 = vmatmul.mubr.bf16.gmra.mrb[100].mxu1 %v2910_v47 }
 0x39f   : > { %3540 = vmatprep.mubr.bf16.mxu1 %v2798_v44 }
 0x3a3   : > { %4675 = vmatmul.mubr.msk.bf16.gmra.mrb[136].mxu0 %vm1436_vm9, %v6429_v36 }
 0x3a4   : > { %4678 = vmatprep.mubr.msk.bf16.mxu0 %vm1436_vm9, %v6456_v11  ;;  %v2752_v11 = vpop.permute.xlu0 %2751 }
 0x3a5   : > { %v2922_v29 = vsel %vm1436_vm9, %v6376_v62, %v2752_v11 }
 0x3a6   : > { %3541 = vmatmul.mubr.bf16.gmra.mrb[104].mxu1 %v2914_v60 }
 0x3a7   : > { %3548 = vmatprep.mubr.bf16.mxu1 %v2801_v2 }
 0x3ab   : > { %4679 = vmatmul.mubr.msk.bf16.gmra.mrb[140].mxu0 %vm1436_vm9, %v6459_v37  ;;  %v2754_v37 = vpop.permute.xlu1 %2753 }
 0x3ac   : > { %4682 = vmatprep.mubr.msk.bf16.mxu0 %vm1436_vm9, %v6477_v16  ;;  %v2760_v16 = vpop.permute.xlu0 %2759  ;;  %v2926_v31 = vsel %vm1436_vm9, %v6413_v39, %v2754_v37  ;;  %v6693_v37 = vld [vmem:[%s6923_s6] ss:$0 sm:$0xff] }
 0x3ae   : > { %3549 = vmatmul.mubr.bf16.gmra.mrb[108].mxu1 %v2918_v19  ;;  %v4349_v26 = vpop.f32.mrb[64].mxu0 }
 0x3af   : > { %3556 = vmatprep.mubr.bf16.mxu1 %v2804_v13  ;;  %v4350_v28 = vpop.f32.mrb[65].mxu0 }
 0x3b0   : > { %v6610_v1 = vadd.f32 %v4350_v28, %v4349_v26  ;;  %v4352_v36 = vpop.f32.mrb[66].mxu0 }
 0x3b1   : > { %v4353_v45 = vpop.f32.mrb[67].mxu0 }
 0x3b2   : > { %v6612_v57 = vadd.f32 %v4353_v45, %v4352_v36 }
 0x3b3   : > { %4683 = vmatmul.mubr.msk.bf16.gmra.mrb[144].mxu0 %vm1436_vm9, %v6474_v9  ;;  %v2937_v9 = vsel %vm1436_vm9, %v6446_v22, %v2760_v16 }
 0x3b4   : > { %4686 = vmatprep.mubr.msk.bf16.mxu0 %vm1436_vm9, %v6488_v52  ;;  %v2756_v52 = vpop.permute.xlu1 %2755 }
 0x3b5   : > { %v2930_v62 = vsel %vm1436_vm9, %v6441_v50, %v2756_v52  ;;  %v2758_v50 = vpop.permute.xlu0 %2757 }
 0x3b6   : > { %3557 = vmatmul.mubr.bf16.gmra.mrb[112].mxu1 %v2922_v29  ;;  %v2934_v23 = vsel %vm1436_vm9, %v6504_v42, %v2758_v50 }
 0x3b7   : > { %3564 = vmatprep.mubr.bf16.mxu1 %v2807_v51 }
 0x3bb   : > { %4687 = vmatmul.mubr.msk.bf16.gmra.mrb[148].mxu0 %vm1436_vm9, %v6491_v38  ;;  %v4836_v38 = vld [vmem:[%s6924_s7] sm:$0xff]  }
 0x3bc   : > { %4690 = vmatprep.mubr.msk.bf16.mxu0 %vm1436_vm9, %v6507_v53  ;;  %v4914_v53 = vmov 0.0  }
 0x3bd   : > { %4698 = vmatprep.subr.bf16.mxu1 %v4914_v53 }
 0x3be   : > { %3565 = vmatmul.mubr.bf16.gmra.mrb[116].mxu1 %v2926_v31 }
 0x3bf   : > { %3572 = vmatprep.mubr.bf16.mxu1 %v2937_v9  ;;  %4699 = vmatpush3.bf16.msra.mxu1 %v4836_v38  ;;  %v3302_v9 = vadd.f32 %v6610_v1, %v6693_v37 }
 0x3c0   : > { %4700 = vmatprep.subr.bf16.mxu1 %v4914_v53 }
 0x3c3   : > { %4691 = vmatmul.mubr.msk.bf16.gmra.mrb[152].mxu0 %vm1436_vm9, %v6520_v24  ;;  %4701 = vmatpush3.bf16.msra.mxu1 %v4837_v48 }
 0x3c4   : > { %4694 = vmatprep.mubr.msk.bf16.mxu0 %vm1436_vm9, %v6517_v4  ;;  %4702 = vmatprep.subr.bf16.mxu1 %v4914_v53 }
 0x3c6   : > { %v4355_v39 = vpop.f32.mrb[68].mxu0  ;;  %3573 = vmatmul.mubr.bf16.gmra.mrb[120].mxu1 %v2930_v62 }
 0x3c7   : > { %v4356_v22 = vpop.f32.mrb[69].mxu0  ;;  %3580 = vmatprep.mubr.bf16.mxu1 %v6236_v5  ;;  %4703 = vmatpush3.bf16.msra.mxu1 %v4838_v56 }
 0x3c8   : > { %v6639_v24 = vadd.f32 %v4356_v22, %v4355_v39  ;;  %v4358_v12 = vpop.f32.mrb[70].mxu0  ;;  %4704 = vmatprep.subr.bf16.mxu1 %v4914_v53  ;;  %v3305_v39 = vadd.f32 %v6612_v57, %v6693_v37 }
 0x3c9   : > { %v4359_v4 = vpop.f32.mrb[71].mxu0 }
 0x3ca   : > { %v6642_v10 = vadd.f32 %v4359_v4, %v4358_v12  ;;  %v4841_v4 = vld [vmem:[%s6924_s7 + $0x28] sm:$0xff]  }
 0x3cb   : > { %4695 = vmatmul.mubr.msk.bf16.gmra.mrb[156].mxu0 %vm1436_vm9, %v5074_v33  ;;  %4705 = vmatpush3.bf16.msra.mxu1 %v4839_v6 }
 0x3cc   : > { %4706 = vmatprep.subr.bf16.mxu1 %v4914_v53  ;;  %v3313_v56 = vadd.f32 %v6642_v10, %v6693_v37 }
 0x3ce   : > { %v4361_v49 = vpop.f32.mrb[72].mxu0  ;;  %3581 = vmatmul.mubr.bf16.gmra.mrb[124].mxu1 %v2934_v23 }
 0x3cf   : > { %v4362_v30 = vpop.f32.mrb[73].mxu0  ;;  %4707 = vmatpush3.bf16.msra.mxu1 %v4840_v63  ;;  %4714 = vmatprep.mubr.msk.bf16.mxu1 %vm4915_vm11, %v4914_v53 }
 0x3d0   : > { %v6648_v5 = vadd.f32 %v4362_v30, %v4361_v49  ;;  %v4364_v54 = vpop.f32.mrb[74].mxu0  ;;  %4708 = vmatprep.subr.bf16.mxu1 %v4914_v53 }
 0x3d1   : > { %v4365_v18 = vpop.f32.mrb[75].mxu0 }
 0x3d2   : > { %v6650_v8 = vadd.f32 %v4365_v18, %v4364_v54 }
 0x3d3   : > { %4709 = vmatpush3.bf16.msra.mxu1 %v4841_v4 }
 0x3d4   : > { %4710 = vmatprep.subr.bf16.mxu1 %v4914_v53 }
 0x3de   : > { %v4367_v33 = vpop.f32.mrb[76].mxu0 }
 0x3df   : > { %v4368_v0 = vpop.f32.mrb[77].mxu0 }
 0x3e0   : > { %v6656_v41 = vadd.f32 %v4368_v0, %v4367_v33  ;;  %v4370_v42 = vpop.f32.mrb[78].mxu0  ;;  %v3310_v33 = vadd.f32 %v6639_v24, %v6693_v37 }
 0x3e1   : > { %v4371_v44 = vpop.f32.mrb[79].mxu0 }
 0x3e2   : > { %v6658_v17 = vadd.f32 %v4371_v44, %v4370_v42 }
 0x3e6   : > { %v4373_v21 = vpop.f32.mrb[80].mxu0 }
 0x3e7   : > { %v4374_v14 = vpop.f32.mrb[81].mxu0 }
 0x3e8   : > { %v6663_v7 = vadd.f32 %v4374_v14, %v4373_v21  ;;  %v4376_v2 = vpop.f32.mrb[82].mxu0 }
 0x3e9   : > { %v4377_v58 = vpop.f32.mrb[83].mxu0 }
 0x3ea   : > { %v6666_v32 = vadd.f32 %v4377_v58, %v4376_v2 }
 0x3f7   : > { %v4379_v34 = vpop.f32.mrb[84].mxu0 }
 0x3f8   : > { %v4380_v20 = vpop.f32.mrb[85].mxu0 }
 0x3f9   : > { %v6668_v40 = vadd.f32 %v4380_v20, %v4379_v34  ;;  %v4382_v13 = vpop.f32.mrb[86].mxu0 }
 0x3fa   : > { %v4383_v55 = vpop.f32.mrb[87].mxu0 }
 0x3fb   : > { %v6670_v15 = vadd.f32 %v4383_v55, %v4382_v13 }
 0x3ff   : > { %v4385_v59 = vpop.f32.mrb[88].mxu0 }
 0x400   : > { %v4386_v35 = vpop.f32.mrb[89].mxu0 }
 0x401   : > { %v6675_v51 = vadd.f32 %v4386_v35, %v4385_v59  ;;  %v4388_v25 = vpop.f32.mrb[90].mxu0  ;;  %v3318_v35 = vadd.f32 %v6648_v5, %v6693_v37  ;;  %v4843_v5 = vld [vmem:[%s6924_s7 + $0x38] sm:$0xff]  }
 0x402   : > { %v4389_v43 = vpop.f32.mrb[91].mxu0 }
 0x403   : > { %v6678_v46 = vadd.f32 %v4389_v43, %v4388_v25 }
 0x40e   : > { %v4391_v27 = vpop.f32.mrb[92].mxu0 }
 0x40f   : > { %v4392_v47 = vpop.f32.mrb[93].mxu0 }
 0x410   : > { %v6683_v3 = vadd.f32 %v4392_v47, %v4391_v27  ;;  %v4394_v60 = vpop.f32.mrb[94].mxu0  ;;  %v3321_v27 = vadd.f32 %v6650_v8, %v6693_v37 }
 0x411   : > { %v4395_v61 = vpop.f32.mrb[95].mxu0 }
 0x412   : > { %v6686_v19 = vadd.f32 %v4395_v61, %v4394_v60  ;;  %v4842_v61 = vld [vmem:[%s6924_s7 + $0x30] sm:$0xff]  }
 0x413   : > { %4711 = vmatpush3.bf16.msra.mxu1 %v4842_v61 }
 0x414   : > { %4712 = vmatprep.subr.bf16.mxu1 %v4914_v53  ;;  %v3329_v53 = vadd.f32 %v6658_v17, %v6693_v37 }
 0x416   : > { %v4397_v26 = vpop.f32.mrb[96].mxu0 }
 0x417   : > { %v4398_v28 = vpop.f32.mrb[97].mxu0  ;;  %4713 = vmatpush3.bf16.msra.mxu1 %v4843_v5  ;;  %v3345_v5 = vadd.f32 %v6670_v15, %v6693_v37 }
 0x418   : > { %v6688_v36 = vadd.f32 %v4398_v28, %v4397_v26  ;;  %v4400_v45 = vpop.f32.mrb[98].mxu0 }
 0x419   : > { %v4401_v11 = vpop.f32.mrb[99].mxu0  ;;  %v4461_v29 = vpop.f32.mrb[64].mxu1 }
 0x41a   : > { %v6695_v16 = vadd.f32 %v4401_v11, %v4400_v45  ;;  %v4462_v31 = vpop.f32.mrb[65].mxu1 }
 0x41b   : > { %v4463_v52 = vadd.f32 %v4462_v31, %v4461_v29  ;;  %v4464_v62 = vpop.f32.mrb[66].mxu1 }
 0x41c   : > { %v4465_v38 = vpop.f32.mrb[67].mxu1 }
 0x41d   : > { %v4466_v22 = vadd.f32 %v4465_v38, %v4464_v62  ;;  %v6701_v12 = vadd.f32 %v4463_v52, %v3302_v9  ;;  %v3326_v52 = vadd.f32 %v6656_v41, %v6693_v37 }
 0x41f   : > { %v6706_v50 = vadd.f32 %v4466_v22, %v3305_v39 }
 0x426   : > { %v4403_v23 = vpop.f32.mrb[100].mxu0 }
 0x427   : > { %v4404_v1 = vpop.f32.mrb[101].mxu0 }
 0x428   : > { %v6709_v49 = vadd.f32 %v4404_v1, %v4403_v23  ;;  %v4406_v30 = vpop.f32.mrb[102].mxu0 }
 0x429   : > { %v4407_v54 = vpop.f32.mrb[103].mxu0  ;;  %v4467_v18 = vpop.f32.mrb[68].mxu1 }
 0x42a   : > { %v6711_v57 = vadd.f32 %v4407_v54, %v4406_v30  ;;  %v4468_v48 = vpop.f32.mrb[69].mxu1 }
 0x42b   : > { %v4469_v0 = vadd.f32 %v4468_v48, %v4467_v18  ;;  %v4470_v42 = vpop.f32.mrb[70].mxu1 }
 0x42c   : > { %v4471_v44 = vpop.f32.mrb[71].mxu1 }
 0x42d   : > { %v4472_v21 = vadd.f32 %v4471_v44, %v4470_v42  ;;  %v6717_v14 = vadd.f32 %v4469_v0, %v3310_v33  ;;  %v3334_v42 = vadd.f32 %v6663_v7, %v6693_v37 }
 0x42e   : > { %v4409_v2 = vpop.f32.mrb[104].mxu0 }
 0x42f   : > { %v4410_v58 = vpop.f32.mrb[105].mxu0  ;;  %v6719_v34 = vadd.f32 %v4472_v21, %v3313_v56  ;;  %v3337_v21 = vadd.f32 %v6666_v32, %v6693_v37 }
 0x430   : > { %v6721_v20 = vadd.f32 %v4410_v58, %v4409_v2  ;;  %v4412_v13 = vpop.f32.mrb[106].mxu0 }
 0x431   : > { %v4413_v55 = vpop.f32.mrb[107].mxu0  ;;  %v4473_v6 = vpop.f32.mrb[72].mxu1 }
 0x432   : > { %v6723_v59 = vadd.f32 %v4413_v55, %v4412_v13  ;;  %v4474_v24 = vpop.f32.mrb[73].mxu1 }
 0x433   : > { %v4475_v25 = vadd.f32 %v4474_v24, %v4473_v6  ;;  %v4476_v10 = vpop.f32.mrb[74].mxu1 }
 0x434   : > { %v4477_v43 = vpop.f32.mrb[75].mxu1 }
 0x435   : > { %v4478_v63 = vadd.f32 %v4477_v43, %v4476_v10  ;;  %v6729_v47 = vadd.f32 %v4475_v25, %v3318_v35 }
 0x437   : > { %v6731_v60 = vadd.f32 %v4478_v63, %v3321_v27  ;;  %v3342_v27 = vadd.f32 %v6668_v40, %v6693_v37 }
 0x43e   : > { %v4415_v8 = vpop.f32.mrb[108].mxu0 }
 0x43f   : > { %v4416_v26 = vpop.f32.mrb[109].mxu0 }
 0x440   : > { %v6741_v28 = vadd.f32 %v4416_v26, %v4415_v8  ;;  %v4418_v45 = vpop.f32.mrb[110].mxu0 }
 0x441   : > { %v4419_v11 = vpop.f32.mrb[111].mxu0  ;;  %v4479_v29 = vpop.f32.mrb[76].mxu1 }
 0x442   : > { %v6743_v31 = vadd.f32 %v4419_v11, %v4418_v45  ;;  %v4480_v9 = vpop.f32.mrb[77].mxu1 }
 0x443   : > { %v4481_v62 = vadd.f32 %v4480_v9, %v4479_v29  ;;  %v4482_v38 = vpop.f32.mrb[78].mxu1 }
 0x444   : > { %v4483_v39 = vpop.f32.mrb[79].mxu1 }
 0x445   : > { %v4484_v22 = vadd.f32 %v4483_v39, %v4482_v38  ;;  %v6749_v4 = vadd.f32 %v4481_v62, %v3326_v52 }
 0x446   : > { %v4421_v23 = vpop.f32.mrb[112].mxu0 }
 0x447   : > { %v4422_v1 = vpop.f32.mrb[113].mxu0  ;;  %v6751_v30 = vadd.f32 %v4484_v22, %v3329_v53  ;;  %v3350_v53 = vadd.f32 %v6675_v51, %v6693_v37 }
 0x448   : > { %v6753_v54 = vadd.f32 %v4422_v1, %v4421_v23  ;;  %v4424_v18 = vpop.f32.mrb[114].mxu0  ;;  %v3353_v1 = vadd.f32 %v6678_v46, %v6693_v37 }
 0x449   : > { %v4425_v48 = vpop.f32.mrb[115].mxu0  ;;  %v4485_v33 = vpop.f32.mrb[80].mxu1 }
 0x44a   : > { %v6755_v0 = vadd.f32 %v4425_v48, %v4424_v18  ;;  %v4486_v41 = vpop.f32.mrb[81].mxu1 }
 0x44b   : > { %v4487_v44 = vadd.f32 %v4486_v41, %v4485_v33  ;;  %v4488_v17 = vpop.f32.mrb[82].mxu1 }
 0x44c   : > { %v4489_v56 = vpop.f32.mrb[83].mxu1 }
 0x44d   : > { %v4490_v2 = vadd.f32 %v4489_v56, %v4488_v17  ;;  %v6761_v58 = vadd.f32 %v4487_v44, %v3334_v42 }
 0x44e   : > { %v4427_v13 = vpop.f32.mrb[116].mxu0 }
 0x44f   : > { %v4428_v55 = vpop.f32.mrb[117].mxu0  ;;  %v6763_v6 = vadd.f32 %v4490_v2, %v3337_v21 }
 0x450   : > { %v6765_v24 = vadd.f32 %v4428_v55, %v4427_v13  ;;  %v4430_v35 = vpop.f32.mrb[118].mxu0  ;;  %v3358_v13 = vadd.f32 %v6683_v3, %v6693_v37 }
 0x451   : > { %v4431_v25 = vpop.f32.mrb[119].mxu0  ;;  %v4491_v10 = vpop.f32.mrb[84].mxu1 }
 0x452   : > { %v6767_v43 = vadd.f32 %v4431_v25, %v4430_v35  ;;  %v4492_v7 = vpop.f32.mrb[85].mxu1  ;;  %v3361_v25 = vadd.f32 %v6686_v19, %v6693_v37  ;;  %v3366_v19 = vadd.f32 %v6688_v36, %v6693_v37 }
 0x453   : > { %v4493_v63 = vadd.f32 %v4492_v7, %v4491_v10  ;;  %v4494_v32 = vpop.f32.mrb[86].mxu1 }
 0x454   : > { %v4495_v61 = vpop.f32.mrb[87].mxu1 }
 0x455   : > { %v4496_v8 = vadd.f32 %v4495_v61, %v4494_v32  ;;  %v6773_v26 = vadd.f32 %v4493_v63, %v3342_v27 }
 0x456   : > { %v4433_v45 = vpop.f32.mrb[120].mxu0 }
 0x457   : > { %v4434_v11 = vpop.f32.mrb[121].mxu0  ;;  %v6775_v29 = vadd.f32 %v4496_v8, %v3345_v5 }
 0x458   : > { %v6777_v9 = vadd.f32 %v4434_v11, %v4433_v45  ;;  %v4436_v52 = vpop.f32.mrb[122].mxu0 }
 0x459   : > { %v4437_v62 = vpop.f32.mrb[123].mxu0  ;;  %v4497_v38 = vpop.f32.mrb[88].mxu1 }
 0x45a   : > { %v6779_v39 = vadd.f32 %v4437_v62, %v4436_v52  ;;  %v4498_v40 = vpop.f32.mrb[89].mxu1 }
 0x45b   : > { %v4499_v22 = vadd.f32 %v4498_v40, %v4497_v38  ;;  %v4500_v15 = vpop.f32.mrb[90].mxu1 }
 0x45c   : > { %v4501_v23 = vpop.f32.mrb[91].mxu1 }
 0x45d   : > { %v4502_v18 = vadd.f32 %v4501_v23, %v4500_v15  ;;  %v6785_v48 = vadd.f32 %v4499_v22, %v3350_v53 }
 0x45e   : > { %v4439_v33 = vpop.f32.mrb[124].mxu0 }
 0x45f   : > { %v4440_v41 = vpop.f32.mrb[125].mxu0  ;;  %v6787_v42 = vadd.f32 %v4502_v18, %v3353_v1 }
 0x460   : > { %v6789_v44 = vadd.f32 %v4440_v41, %v4439_v33  ;;  %v4442_v17 = vpop.f32.mrb[126].mxu0 }
 0x461   : > { %v4443_v56 = vpop.f32.mrb[127].mxu0  ;;  %v4503_v21 = vpop.f32.mrb[92].mxu1 }
 0x462   : > { %v6791_v2 = vadd.f32 %v4443_v56, %v4442_v17  ;;  %v4504_v51 = vpop.f32.mrb[93].mxu1 }
 0x463   : > { %v4505_v55 = vadd.f32 %v4504_v51, %v4503_v21  ;;  %v4506_v46 = vpop.f32.mrb[94].mxu1 }
 0x464   : > { %v4507_v35 = vpop.f32.mrb[95].mxu1 }
 0x465   : > { %v4508_v10 = vadd.f32 %v4507_v35, %v4506_v46  ;;  %v6797_v7 = vadd.f32 %v4505_v55, %v3358_v13 }
 0x466   : > { %v4668_v27 = vpop.f32.mrb[128].mxu0 }
 0x467   : > { %v3632_v63 = vadd.f32 %v4668_v27, %v6717_v14  ;;  %v3623_v32 = vpop.f32.mrb[129].mxu0  ;;  %v6800_v61 = vadd.f32 %v4508_v10, %v3361_v25 }
 0x468   : > { %v3624_v5 = vadd.f32 %v3623_v32, %v6701_v12  ;;  %v4669_v8 = vpop.f32.mrb[130].mxu0  ;;  %v3369_v12 = vadd.f32 %v6695_v16, %v6693_v37 }
 0x469   : > { %v3635_v3 = vadd.f32 %v4669_v8, %v6719_v34  ;;  %v4509_v45 = vpop.f32.mrb[96].mxu1  ;;  %v3626_v11 = vpop.f32.mrb[131].mxu0  ;;  %v3752_v38 = vmax.f32 %v3632_v63, 0.0 }
 0x46a   : > { %v3627_v52 = vadd.f32 %v3626_v11, %v6706_v50  ;;  %v4510_v62 = vpop.f32.mrb[97].mxu1  ;;  %v3750_v22 = vmax.f32 %v3624_v5, 0.0 }
 0x46b   : > { %v3753_v40 = vmax.f32 %v3635_v3, 0.0  ;;  %v4511_v53 = vadd.f32 %v4510_v62, %v4509_v45  ;;  %v4512_v14 = vpop.f32.mrb[98].mxu1 }
 0x46c   : > { %v3751_v15 = vmax.f32 %v3627_v52, 0.0  ;;  %v4513_v23 = vpop.f32.mrb[99].mxu1 }
 0x46d   : > { %v3783_v1 = vpack.c.bf16 %v3753_v40, %v3752_v38  ;;  %v4514_v34 = vadd.f32 %v4513_v23, %v4512_v14  ;;  %v6809_v18 = vadd.f32 %v4511_v53, %v3366_v19 }
 0x46e   : > { %v3782_v33 = vpack.c.bf16 %v3751_v15, %v3750_v22  ;;  %v4672_v50 = vpop.f32.mrb[132].mxu0 }
 0x46f   : > { %v3648_v41 = vadd.f32 %v4672_v50, %v6749_v4  ;;  %v3639_v17 = vpop.f32.mrb[133].mxu0  ;;  %v6812_v36 = vadd.f32 %v4514_v34, %v3369_v12  ;;  %v3800_v35 = vunpack.c.l.bf16 %v3783_v1  ;;  %v3374_v4 = vadd.f32 %v6709_v49, %v6693_v37 }
 0x470   : > { %v3798_v56 = vunpack.c.l.bf16 %v3782_v33  ;;  %v3799_v21 = vunpack.c.h.bf16 %v3782_v33  ;;  %v3640_v51 = vadd.f32 %v3639_v17, %v6729_v47  ;;  %v4673_v13 = vpop.f32.mrb[134].mxu0  ;;  %v3801_v3 = vunpack.c.h.bf16 %v3783_v1 }
 0x471   : > { %v3651_v55 = vadd.f32 %v4673_v13, %v6751_v30  ;;  %v4515_v46 = vpop.f32.mrb[100].mxu1  ;;  %v3642_v16 = vpop.f32.mrb[135].mxu0  ;;  %v3756_v63 = vmax.f32 %v3648_v41, 0.0  ;;  %v3377_v30 = vadd.f32 %v6711_v57, %v6693_v37 }
 0x472   : > { %v3830_v25 = vadd.f32 %v3799_v21, %v3798_v56  ;;  %v3643_v10 = vadd.f32 %v3642_v16, %v6731_v60  ;;  %v4516_v27 = vpop.f32.mrb[101].mxu1  ;;  %v3754_v47 = vmax.f32 %v3640_v51, 0.0  ;;  %v3382_v56 = vadd.f32 %v6721_v20, %v6693_v37 }
 0x473   : > { %v3757_v32 = vmax.f32 %v3651_v55, 0.0  ;;  %v4517_v5 = vadd.f32 %v4516_v27, %v4515_v46  ;;  %v4518_v8 = vpop.f32.mrb[102].mxu1 }
 0x474   : > { %v3831_v45 = vadd.f32 %v3830_v25, %v3800_v35  ;;  %v3755_v11 = vmax.f32 %v3643_v10, 0.0  ;;  %v4519_v52 = vpop.f32.mrb[103].mxu1 }
 0x475   : > { %v3785_v62 = vpack.c.bf16 %v3757_v32, %v3756_v63  ;;  %v4520_v19 = vadd.f32 %v4519_v52, %v4518_v8  ;;  %v6821_v38 = vadd.f32 %v4517_v5, %v3374_v4 }
 0x476   : > { %v3784_v60 = vpack.c.bf16 %v3755_v11, %v3754_v47  ;;  %v3832_v40 = vadd.f32 %v3831_v45, %v3801_v3  ;;  %v4676_v53 = vpop.f32.mrb[136].mxu0 }
 0x477   : > { %v3664_v49 = vadd.f32 %v4676_v53, %v6773_v26  ;;  %v3655_v14 = vpop.f32.mrb[137].mxu0  ;;  %v6824_v22 = vadd.f32 %v4520_v19, %v3377_v30  ;;  %v3804_v55 = vunpack.c.l.bf16 %v3785_v62 }
 0x478   : > { %v3802_v15 = vunpack.c.l.bf16 %v3784_v60  ;;  %v3656_v23 = vadd.f32 %v3655_v14, %v6761_v58  ;;  %v4677_v12 = vpop.f32.mrb[138].mxu0  ;;  %v3803_v33 = vunpack.c.h.bf16 %v3784_v60 }
 0x479   : > { %v3667_v1 = vadd.f32 %v4677_v12, %v6775_v29  ;;  %v4521_v34 = vpop.f32.mrb[104].mxu1  ;;  %v3658_v57 = vpop.f32.mrb[139].mxu0  ;;  %v3760_v26 = vmax.f32 %v3664_v49, 0.0  ;;  %v3385_v29 = vadd.f32 %v6723_v59, %v6693_v37 }
 0x47a   : > { %v3833_v50 = vadd.f32 %v3832_v40, %v3802_v15  ;;  %v3659_v41 = vadd.f32 %v3658_v57, %v6763_v6  ;;  %v4522_v17 = vpop.f32.mrb[105].mxu1  ;;  %v3758_v58 = vmax.f32 %v3656_v23, 0.0  ;;  %v3805_v6 = vunpack.c.h.bf16 %v3785_v62 }
 0x47b   : > { %v3761_v21 = vmax.f32 %v3667_v1, 0.0  ;;  %v4523_v51 = vadd.f32 %v4522_v17, %v4521_v34  ;;  %v4524_v13 = vpop.f32.mrb[106].mxu1 }
 0x47c   : > { %v3834_v46 = vadd.f32 %v3833_v50, %v3803_v33  ;;  %v3759_v16 = vmax.f32 %v3659_v41, 0.0  ;;  %v4525_v35 = vpop.f32.mrb[107].mxu1 }
 0x47d   : > { %v3787_v25 = vpack.c.bf16 %v3761_v21, %v3760_v26  ;;  %v4526_v10 = vadd.f32 %v4525_v35, %v4524_v13  ;;  %v6833_v27 = vadd.f32 %v4523_v51, %v3382_v56 }
 0x47e   : > { %v3835_v4 = vadd.f32 %v3834_v46, %v3804_v55  ;;  %v3786_v63 = vpack.c.bf16 %v3759_v16, %v3758_v58  ;;  %v4680_v20 = vpop.f32.mrb[140].mxu0 }
 0x47f   : > { %v3680_v32 = vadd.f32 %v4680_v20, %v6797_v7  ;;  %v3671_v5 = vpop.f32.mrb[141].mxu0  ;;  %v6836_v8 = vadd.f32 %v4526_v10, %v3385_v29  ;;  %v3390_v7 = vadd.f32 %v6741_v28, %v6693_v37  ;;  %v3808_v23 = vunpack.c.l.bf16 %v3787_v25 }
 0x480   : > { %v3806_v3 = vunpack.c.l.bf16 %v3786_v63  ;;  %v3836_v45 = vadd.f32 %v3835_v4, %v3805_v6  ;;  %v3672_v47 = vadd.f32 %v3671_v5, %v6785_v48  ;;  %v4681_v11 = vpop.f32.mrb[142].mxu0  ;;  %v3807_v19 = vunpack.c.h.bf16 %v3786_v63 }
 0x481   : > { %v3683_v59 = vadd.f32 %v4681_v11, %v6800_v61  ;;  %v4527_v52 = vpop.f32.mrb[108].mxu1  ;;  %v3674_v30 = vpop.f32.mrb[143].mxu0  ;;  %v3764_v53 = vmax.f32 %v3680_v32, 0.0  ;;  %v3393_v61 = vadd.f32 %v6743_v31, %v6693_v37  ;;  %v3398_v6 = vadd.f32 %v6753_v54, %v6693_v37 }
 0x482   : > { %v3837_v60 = vadd.f32 %v3836_v45, %v3806_v3  ;;  %v3675_v62 = vadd.f32 %v3674_v30, %v6787_v42  ;;  %v4528_v40 = vpop.f32.mrb[109].mxu1  ;;  %v3762_v48 = vmax.f32 %v3672_v47, 0.0  ;;  %v3809_v42 = vunpack.c.h.bf16 %v3787_v25 }
 0x483   : > { %v3765_v49 = vmax.f32 %v3683_v59, 0.0  ;;  %v4529_v14 = vadd.f32 %v4528_v40, %v4527_v52  ;;  %v4530_v15 = vpop.f32.mrb[110].mxu1 }
 0x484   : > { %v3838_v12 = vadd.f32 %v3837_v60, %v3807_v19  ;;  %v3763_v1 = vmax.f32 %v3675_v62, 0.0  ;;  %v4531_v34 = vpop.f32.mrb[111].mxu1 }
 0x485   : > { %v3789_v57 = vpack.c.bf16 %v3765_v49, %v3764_v53  ;;  %v4532_v33 = vadd.f32 %v4531_v34, %v4530_v15  ;;  %v3551_v50 = vadd.f32 %v4529_v14, %v3390_v7  ;;  %v3406_v34 = vadd.f32 %v6765_v24, %v6693_v37 }
 0x486   : > { %v3839_v41 = vadd.f32 %v3838_v12, %v3808_v23  ;;  %v3788_v17 = vpack.c.bf16 %v3763_v1, %v3762_v48  ;;  %v4684_v56 = vpop.f32.mrb[144].mxu0 }
 0x487   : > { %v3696_v28 = vadd.f32 %v4684_v56, %v6821_v38  ;;  %v3687_v26 = vpop.f32.mrb[145].mxu0  ;;  %v3554_v21 = vadd.f32 %v4532_v33, %v3393_v61  ;;  %v3812_v32 = vunpack.c.l.bf16 %v3789_v57 }
 0x488   : > { %v3810_v51 = vunpack.c.l.bf16 %v3788_v17  ;;  %v3840_v13 = vadd.f32 %v3839_v41, %v3809_v42  ;;  %v3688_v55 = vadd.f32 %v3687_v26, %v6809_v18  ;;  %v4685_v46 = vpop.f32.mrb[146].mxu0  ;;  %v3811_v35 = vunpack.c.h.bf16 %v3788_v17 }
 0x489   : > { %v3699_v58 = vadd.f32 %v4685_v46, %v6824_v22  ;;  %v4533_v16 = vpop.f32.mrb[112].mxu1  ;;  %v3690_v31 = vpop.f32.mrb[147].mxu0  ;;  %v3768_v38 = vmax.f32 %v3696_v28, 0.0  ;;  %v3401_v22 = vadd.f32 %v6755_v0, %v6693_v37  ;;  %v3409_v28 = vadd.f32 %v6767_v43, %v6693_v37 }
 0x48a   : > { %v3841_v29 = vadd.f32 %v3840_v13, %v3810_v51  ;;  %v3691_v25 = vadd.f32 %v3690_v31, %v6812_v36  ;;  %v4534_v10 = vpop.f32.mrb[113].mxu1  ;;  %v3766_v18 = vmax.f32 %v3688_v55, 0.0  ;;  %v3813_v36 = vunpack.c.h.bf16 %v3789_v57 }
 0x48b   : > { %v3769_v4 = vmax.f32 %v3699_v58, 0.0  ;;  %v4535_v63 = vadd.f32 %v4534_v10, %v4533_v16  ;;  %v4536_v20 = vpop.f32.mrb[114].mxu1 }
 0x48c   : > { %v3842_v5 = vadd.f32 %v3841_v29, %v3811_v35  ;;  %v3767_v3 = vmax.f32 %v3691_v25, 0.0  ;;  %v4537_v45 = vpop.f32.mrb[115].mxu1 }
 0x48d   : > { %v3791_v47 = vpack.c.bf16 %v3769_v4, %v3768_v38  ;;  %v4538_v11 = vadd.f32 %v4537_v45, %v4536_v20  ;;  %v3559_v59 = vadd.f32 %v4535_v63, %v3398_v6 }
 0x48e   : > { %v3843_v52 = vadd.f32 %v3842_v5, %v3812_v32  ;;  %v3790_v30 = vpack.c.bf16 %v3767_v3, %v3766_v18  ;;  %v4688_v19 = vpop.f32.mrb[148].mxu0  ;;  %v3414_v32 = vadd.f32 %v6777_v9, %v6693_v37 }
 0x48f   : > { %v3712_v54 = vadd.f32 %v4688_v19, %v3551_v50  ;;  %v3703_v60 = vpop.f32.mrb[149].mxu0  ;;  %v3562_v62 = vadd.f32 %v4538_v11, %v3401_v22  ;;  %v3816_v42 = vunpack.c.l.bf16 %v3791_v47 }
 0x490   : > { %v3814_v40 = vunpack.c.l.bf16 %v3790_v30  ;;  %v3844_v7 = vadd.f32 %v3843_v52, %v3813_v36  ;;  %v3704_v53 = vadd.f32 %v3703_v60, %v6833_v27  ;;  %v4689_v49 = vpop.f32.mrb[150].mxu0  ;;  %v3815_v12 = vunpack.c.h.bf16 %v3790_v30 }
 0x491   : > { %v3715_v14 = vadd.f32 %v4689_v49, %v3554_v21  ;;  %v4539_v15 = vpop.f32.mrb[116].mxu1  ;;  %v3706_v23 = vpop.f32.mrb[151].mxu0  ;;  %v3772_v61 = vmax.f32 %v3712_v54, 0.0  ;;  %v3417_v52 = vadd.f32 %v6779_v39, %v6693_v37  ;;  %v3422_v39 = vadd.f32 %v6789_v44, %v6693_v37 }
 0x492   : > { %v3845_v0 = vadd.f32 %v3844_v7, %v3814_v40  ;;  %v3707_v48 = vadd.f32 %v3706_v23, %v6836_v8  ;;  %v4540_v1 = vpop.f32.mrb[117].mxu1  ;;  %v3770_v17 = vmax.f32 %v3704_v53, 0.0  ;;  %v3817_v8 = vunpack.c.h.bf16 %v3791_v47 }
 0x493   : > { %v3773_v57 = vmax.f32 %v3715_v14, 0.0  ;;  %v4541_v33 = vadd.f32 %v4540_v1, %v4539_v15  ;;  %v4542_v50 = vpop.f32.mrb[118].mxu1 }
 0x494   : > { %v3846_v41 = vadd.f32 %v3845_v0, %v3815_v12  ;;  %v3771_v27 = vmax.f32 %v3707_v48, 0.0  ;;  %v4543_v56 = vpop.f32.mrb[119].mxu1 }
 0x495   : > { %v3793_v26 = vpack.c.bf16 %v3773_v57, %v3772_v61  ;;  %v4544_v21 = vadd.f32 %v4543_v56, %v4542_v50  ;;  %v3567_v51 = vadd.f32 %v4541_v33, %v3406_v34  ;;  %v3425_v56 = vadd.f32 %v6791_v2, %v6693_v37 }
 0x496   : > { %v3847_v13 = vadd.f32 %v3846_v41, %v3816_v42  ;;  %v3792_v55 = vpack.c.bf16 %v3771_v27, %v3770_v17  ;;  %v4692_v46 = vpop.f32.mrb[152].mxu0 }
 0x497   : > { %v3728_v24 = vadd.f32 %v4692_v46, %v3567_v51  ;;  %v3719_v58 = vpop.f32.mrb[153].mxu0  ;;  %v3570_v16 = vadd.f32 %v4544_v21, %v3409_v28  ;;  %v3820_v22 = vunpack.c.l.bf16 %v3793_v26  ;;  %v3821_v60 = vunpack.c.h.bf16 %v3793_v26 }
 0x498   : > { %v3818_v31 = vunpack.c.l.bf16 %v3792_v55  ;;  %v3848_v35 = vadd.f32 %v3847_v13, %v3817_v8  ;;  %v3720_v29 = vadd.f32 %v3719_v58, %v3559_v59  ;;  %v4693_v25 = vpop.f32.mrb[154].mxu0  ;;  %v3819_v4 = vunpack.c.h.bf16 %v3792_v55 }
 0x499   : > { %v3731_v10 = vadd.f32 %v4693_v25, %v3570_v16  ;;  %v4545_v6 = vpop.f32.mrb[120].mxu1  ;;  %v3722_v38 = vpop.f32.mrb[155].mxu0  ;;  %v3776_v5 = vmax.f32 %v3728_v24, 0.0 }
 0x49a   : > { %v3849_v63 = vadd.f32 %v3848_v35, %v3818_v31  ;;  %v3723_v43 = vadd.f32 %v3722_v38, %v3562_v62  ;;  %v4546_v20 = vpop.f32.mrb[121].mxu1  ;;  %v3774_v11 = vmax.f32 %v3720_v29, 0.0 }
 0x49b   : > { %v3777_v18 = vmax.f32 %v3731_v10, 0.0  ;;  %v4547_v3 = vadd.f32 %v4546_v20, %v4545_v6  ;;  %v4548_v45 = vpop.f32.mrb[122].mxu1 }
 0x49c   : > { %v3850_v47 = vadd.f32 %v3849_v63, %v3819_v4  ;;  %v3775_v36 = vmax.f32 %v3723_v43, 0.0  ;;  %v4549_v59 = vpop.f32.mrb[123].mxu1 }
 0x49d   : > { %v3795_v30 = vpack.c.bf16 %v3777_v18, %v3776_v5  ;;  %v4550_v19 = vadd.f32 %v4549_v59, %v4548_v45  ;;  %v3575_v54 = vadd.f32 %v4547_v3, %v3414_v32  ;;  %v3885_v3 = vld [vmem:[%s6925_s8] sm:$0x1] }
 0x49e   : > { %v3851_v62 = vadd.f32 %v3850_v47, %v3820_v22  ;;  %v3794_v40 = vpack.c.bf16 %v3775_v36, %v3774_v11  ;;  %v4696_v7 = vpop.f32.mrb[156].mxu0 }
 0x49f   : > { %v3735_v9 = vpop.f32.mrb[157].mxu0  ;;  %v3578_v53 = vadd.f32 %v4550_v19, %v3417_v52  ;;  %v3824_v50 = vunpack.c.l.bf16 %v3795_v30  ;;  %v3825_v21 = vunpack.c.h.bf16 %v3795_v30 }
 0x4a0   : > { %v3822_v49 = vunpack.c.l.bf16 %v3794_v40  ;;  %v3852_v14 = vadd.f32 %v3851_v62, %v3821_v60  ;;  %v3736_v15 = vadd.f32 %v3735_v9, %v3575_v54  ;;  %v4697_v23 = vpop.f32.mrb[158].mxu0  ;;  %v3823_v48 = vunpack.c.h.bf16 %v3794_v40 }
 0x4a1   : > { %v4551_v12 = vpop.f32.mrb[124].mxu1  ;;  %v3738_v0 = vpop.f32.mrb[159].mxu0 }
 0x4a2   : > { %v3853_v1 = vadd.f32 %v3852_v14, %v3822_v49  ;;  %v3739_v34 = vadd.f32 %v3738_v0, %v3578_v53  ;;  %v4552_v61 = vpop.f32.mrb[125].mxu1  ;;  %v3778_v41 = vmax.f32 %v3736_v15, 0.0 }
 0x4a3   : > { %v4553_v57 = vadd.f32 %v4552_v61, %v4551_v12  ;;  %v4554_v33 = vpop.f32.mrb[126].mxu1 }
 0x4a4   : > { %v3854_v42 = vadd.f32 %v3853_v1, %v3823_v48  ;;  %v3779_v17 = vmax.f32 %v3739_v34, 0.0  ;;  %v4555_v27 = vpop.f32.mrb[127].mxu1 }
 0x4a5   : > { %v3583_v28 = vadd.f32 %v4553_v57, %v3422_v39  ;;  %v4556_v26 = vadd.f32 %v4555_v27, %v4554_v33 }
 0x4a6   : > { %v3855_v51 = vadd.f32 %v3854_v42, %v3824_v50  ;;  %v3796_v8 = vpack.c.bf16 %v3779_v17, %v3778_v41 }
 0x4a7   : > { %v3744_v13 = vadd.f32 %v4696_v7, %v3583_v28  ;;  %v3586_v55 = vadd.f32 %v4556_v26, %v3425_v56 }
 0x4a8   : > { %v3826_v46 = vunpack.c.l.bf16 %v3796_v8  ;;  %v3856_v24 = vadd.f32 %v3855_v51, %v3825_v21  ;;  %v3827_v58 = vunpack.c.h.bf16 %v3796_v8 }
 0x4a9   : > { %v3747_v44 = vadd.f32 %v4697_v23, %v3586_v55  ;;  %v3780_v31 = vmax.f32 %v3744_v13, 0.0 }
 0x4aa   : > { %v3857_v16 = vadd.f32 %v3856_v24, %v3826_v46 }
 0x4ab   : > { %v3781_v35 = vmax.f32 %v3747_v44, 0.0 }
 0x4ac   : > { %v3858_v29 = vadd.f32 %v3857_v16, %v3827_v58 }
 0x4ad   : > { %v3797_v25 = vpack.c.bf16 %v3781_v35, %v3780_v31 }
 0x4af   : > { %v3828_v10 = vunpack.c.l.bf16 %v3797_v25  ;;  %v3829_v37 = vunpack.c.h.bf16 %v3797_v25 }
 0x4b1   : > { %v3859_v2 = vadd.f32 %v3858_v29, %v3828_v10 }
 0x4b3   : > { %v3860_v6 = vadd.f32 %v3859_v2, %v3829_v37 }
 0x4b5   : > { %v3861_v38 = vrot.slane %v3860_v6, 4 }
 0x4b7   : > { %v3862_v4 = vadd.f32 %v3861_v38, %v3860_v6 }
 0x4b9   : > { %v3863_v63 = vrot.slane %v3862_v4, 2 }
 0x4bb   : > { %v3864_v43 = vadd.f32 %v3863_v63, %v3862_v4 }
 0x4bd   : > { %v3865_v20 = vrot.slane %v3864_v43, 1 }
 0x4bf   : > { %v3866_v32 = vadd.f32 %v3865_v20, %v3864_v43 }
 0x4c1   : > { %v3867_v5 = vmul.f32 0.00390625, %v3866_v32 }
 0x4c3   : > { %v3868_v18 = vpack.c.bf16 %v3867_v5, %v3867_v5 }
 0x4c5   : > { %4715 = vmatmul.mubr.bf16.vlgmr.msra.gmra.mrb[128].mxu1 %v3868_v18 }
 0x598   : > { %v3968_v45 = vpop.f32.mrb[128].mxu1 }
 0x599   : > { %v3969_v22 = vadd.f32 %v3968_v45, %v3885_v3  ;;  %v4716_v47 = vpop.f32.mrb[129].mxu1 }
 0x59a   : > { %v3971_v11 = vpop.f32.mrb[130].mxu1 }
 0x59b   : > { %v4717_v36 = vpop.f32.mrb[131].mxu1  ;;  %3975 = vst.msk [vmem:[%s324_s26] sm:$0x1] %vm3974_vm12, %v3969_v22 }
 0x59c   : > { %4858 = shalt.err (!%p4855_p3)
}
 0x59d   : > { %s4859_s22 = scalar_lea.hbm %s6875_s16, 16  ;;  %s4863_s26 = scalar_lea.hbm %s6926_s9, 32 }
 0x59e   : > { %p4860_p4 = scmp.ne.s32.totalorder %s6875_s16, %s4859_s22  ;;  %p4864_p9 = scmp.lt.u32.totalorder %s6875_s16, %s6926_s9 }
 0x59f   : > { %p4865_p10 = scmp.lt.u32.totalorder %s4863_s26, %s4859_s22  ;;  %p4867_p12 = scmp.lt.u32.totalorder %s4859_s22, %s6875_s16 }
 0x5a0   : > { %p4861_p7 = pnand %p4860_p4, %p5005_p5 }
 0x5a1   : > { %p4866_p11 = por %p4865_p10, %p4864_p9 }
 0x5a2   : > { %p4862_p8 = pneg %p4861_p7 }
 0x5a3   : > { %p4868_p13 = por %p4867_p12, %p4866_p11 }
 0x5a5   : > { %p4869_p0 = pnand %p4868_p13, %p4862_p8 }
 0x5a7   : > { %4872 = shalt.err (!%p4869_p0)
}
 0x5a8   : > { %4718 = dma.vmem_to_hbm [thread:$0]  (%p5005_p5), %s6877_s27, 16, %s6875_s16, %s3977_s13  }
 0x5a9 PF: > { %p4724_p1 = scmp.ge.s32.totalorder %s4907_s12, 2  ;;  %s4001_s29 = sand.u32 1, %s4895_s30  }
 0x5aa   : > { %s4002_s17 = scalar_lea.sflag [#allocation3], %s4001_s29 }
 0x5ab   : > { %p4721_p2 = pnand %p4724_p1, %p5009_p6 }
 0x5ad   : > { %4890 = dma.done.wait (!%p4721_p2), %s4002_s17, 16  }
 0x5ae   : > { %4892 = vsyncadd (!%p4721_p2), %s4002_s17, 4294967280  ;;  %p19_p3 = scmp.ge.s32.totalorder %s4992_s15, 4   ;;  %s6931_s30 = smov %s4899_s10 }
 0x5af   : > { %s6932_s10 = smov %s4903_s11  ;;  %s6933_s11 = smov %s5003_s18 }
 0x5b0   : > { %s6934_s12 = smov %s4992_s15  ;;  %21 = sbr.rel (!%p19_p3) target bundleno = 3 (0x3), region = 91 }
 0x5b7   :  { %4006 = vsyncpa [#allocation3], 1 }
 0x5b8   :  { %4008 = vsyncpa [#allocation3 + $0x1], 1 }

</bundles_post_ra>
